<compile_context>
chip_gen: v7x
topology: tpu7x:2x2x1
jax: 0.10.0
libtpu: 0.0.40
codegen_flags: <defaults>
</compile_context>

<pallas_src>
import functools
import math

import jax
import jax.numpy as jnp
from jax import lax
from jax.experimental import pallas as pl
from jax.experimental.pallas import tpu as pltpu

NEG_INF = -1e9   # finite stand-in for -inf of generate_square_subsequent_mask
LN_EPS = 1e-5    # nn.LayerNorm default


def _vmem_limit_bytes():
    """Generation-aware scoped-VMEM budget (≈48 MiB on v7x, 96 MiB on v5e/v6e)."""
    cap = 128 * 1024 * 1024
    try:
        cap = int(pltpu.get_tpu_info().vmem_capacity_bytes)
    except Exception:
        pass
    return min((cap * 3) // 4, 96 * 1024 * 1024)


def _batch_tile(B, S, target_rows=512):
    """Largest Bt dividing B with Bt*S <= target_rows (fills the MXU M dim and
    amortizes the per-layer weight DMA by Bt), but keep >= 2 parallel grid
    steps for v7x's two TensorCores when that does not starve the M dim."""
    bt = 1
    for cand in range(1, B + 1):
        if B % cand == 0 and cand * S <= max(target_rows, S):
            bt = cand
    if bt == B and B > 1 and B % 2 == 0 and (B // 2) * S >= 128:
        bt = B // 2
    return bt


def _pad_and_tile_vocab(V, target=2048, align=256):
    """Pad the vocab to a 256-aligned size and pick a lane-dense tile."""
    if V <= target:
        Vp = -(-V // align) * align
        return Vp, Vp
    Vp = -(-V // target) * target
    return Vp, target


def _layer_norm(x, w, b):
    mean = jnp.mean(x, axis=-1, keepdims=True)
    var = jnp.mean(jnp.square(x - mean), axis=-1, keepdims=True)
    return (x - mean) * lax.rsqrt(var + LN_EPS) * w + b


# --------------------------------------------------------------------------
# Pallas kernels
# --------------------------------------------------------------------------
def encoder_stack_kernel(x_ref, pad_ref,
                         wqkv_ref, bqkv_ref, wo_ref, bo_ref,
                         ln1w_ref, ln1b_ref,
                         w1_ref, b1_ref, w2_ref, b2_ref,
                         ln2w_ref, ln2b_ref,
                         lnf_w_ref, lnf_b_ref,
                         o_ref, x_scr, mask_scr, *, num_heads):
    """All L post-norm TransformerEncoderLayers for one batch tile.

    grid = (B // Bt, L); L is the inner 'arbitrary' axis.  The running
    activation lives flattened as (Bt*S, D) in the f32 VMEM scratch `x_scr`
    across the L axis: loaded from HBM at l == 0 and written back (with the
    fused final LayerNorm, in bf16) only at l == L-1.
    """
    l = pl.program_id(1)
    Bt, S, D = x_ref.shape
    hd = D // num_heads
    scale = 1.0 / math.sqrt(hd)

    @pl.when(l == 0)
    def _():
        # Load the batch tile once per layer-stack pass and build the causal
        # mask once (shared by all layers / heads / batch elements).
        x_scr[...] = x_ref[...].reshape(Bt * S, D).astype(jnp.float32)
        rows = lax.broadcasted_iota(jnp.int32, (S, S), 0)
        cols = lax.broadcasted_iota(jnp.int32, (S, S), 1)
        mask_scr[...] = jnp.where(cols > rows, NEG_INF, 0.0).astype(jnp.float32)

    x = x_scr[...]                                      # (Bt*S, D) f32

    # ---- packed, lane-dense QKV projection on the flattened batch tile ----
    qkv = jnp.dot(x.astype(jnp.bfloat16), wqkv_ref[0],
                  preferred_element_type=jnp.float32) + bqkv_ref[0]
    q = (qkv[:, :D] * scale).astype(jnp.bfloat16)       # whole-slab casts, one each
    k = qkv[:, D:2 * D].astype(jnp.bfloat16)
    v = qkv[:, 2 * D:].astype(jnp.bfloat16)

    # per-batch additive masks: hoisted causal scratch + key-padding row
    causal = mask_scr[...]
    masks = [causal + pad_ref[b] for b in range(Bt)]

    # ---- attention: per-head accumulation straight into the output
    # projection (no lane-wise head concat); PV->Wo GEMM keeps M = Bt*S ----
    wo = wo_ref[0]
    attn = None
    for h in range(num_heads):
        c = slice(h * hd, (h + 1) * hd)
        ctx_rows = []
        for b in range(Bt):
            r = slice(b * S, (b + 1) * S)
            s = lax.dot_general(q[r, c], k[r, c], (((1,), (1,)), ((), ())),
                                preferred_element_type=jnp.float32) + masks[b]
            s = s - jnp.max(s, axis=-1, keepdims=True)
            p = jnp.exp(s)
            p = p * pl.reciprocal(jnp.sum(p, axis=-1, keepdims=True), approx=True)
            ctx_rows.append(jnp.dot(p.astype(jnp.bfloat16), v[r, c],
                                    preferred_element_type=jnp.float32))
        ctx_h = ctx_rows[0] if Bt == 1 else jnp.concatenate(ctx_rows, axis=0)
        part = jnp.dot(ctx_h.astype(jnp.bfloat16), wo[c, :],
                       preferred_element_type=jnp.float32)
        attn = part if attn is None else attn + part
    attn = attn + bo_ref[0]

    # ---- residual + LayerNorm 1 (f32 VPU math) ----
    y = _layer_norm(x + attn, ln1w_ref[0], ln1b_ref[0])

    # ---- feed-forward (ReLU); bf16 MXU operands, f32 accumulation ----
    f = jnp.dot(y.astype(jnp.bfloat16), w1_ref[0],
                preferred_element_type=jnp.float32) + b1_ref[0]
    f = jnp.maximum(f, 0.0)
    f = jnp.dot(f.astype(jnp.bfloat16), w2_ref[0],
                preferred_element_type=jnp.float32) + b2_ref[0]

    # ---- residual + LayerNorm 2 ----
    z = _layer_norm(y + f, ln2w_ref[0], ln2b_ref[0])
    x_scr[...] = z

    @pl.when(l == pl.num_programs(1) - 1)
    def _():
        # fused final encoder LayerNorm; bf16 writeback halves HBM traffic
        zf = _layer_norm(z, lnf_w_ref[...], lnf_b_ref[...])
        o_ref[...] = zf.reshape(Bt, S, D).astype(o_ref.dtype)


def final_proj_kernel(x_ref, wout_ref, bout_ref, o_ref):
    """Pure vocab-tiled GEMM (the final LayerNorm is fused into the encoder)."""
    Bt, S, D = x_ref.shape
    x = x_ref[...].reshape(Bt * S, D)                   # bf16 activations
    logits = jnp.dot(x, wout_ref[...],
                     preferred_element_type=jnp.float32) + bout_ref[...]
    o_ref[...] = logits.reshape(Bt, S, -1).astype(o_ref.dtype)


# --------------------------------------------------------------------------
# Wrappers (pallas_call plumbing)
# --------------------------------------------------------------------------
def _layer_block_spec(w):
    nd = w.ndim - 1
    return pl.BlockSpec((1,) + tuple(w.shape[1:]),
                        lambda b, l, _nd=nd: (l,) + (0,) * _nd)


def encoder_stack(x, pad_bias, params):
    B, S, D = x.shape
    H = int(params['num_heads'])
    L = params['wqkv'].shape[0]
    Dff = params['w1'].shape[-1]
    Bt = _batch_tile(B, S)

    weights = [params['wqkv'], params['bqkv'], params['wo'], params['bo'],
               params['ln1_w'], params['ln1_b'],
               params['w1'], params['b1'], params['w2'], params['b2'],
               params['ln2_w'], params['ln2_b']]
    in_specs = [pl.BlockSpec((Bt, S, D), lambda b, l: (b, 0, 0)),
                pl.BlockSpec((Bt, 1, S), lambda b, l: (b, 0, 0))]
    in_specs += [_layer_block_spec(w) for w in weights]
    in_specs += [pl.BlockSpec((1, D), lambda b, l: (0, 0)),   # ln_f weight
                 pl.BlockSpec((1, D), lambda b, l: (0, 0))]   # ln_f bias

    flops = B * L * (2 * S * D * 3 * D        # packed qkv projection
                     + 4 * S * S * D          # q@k^T + p@v over all heads
                     + 2 * S * D * D          # out projection
                     + 4 * S * D * Dff)       # feed-forward
    wbytes = sum(int(w.size) * w.dtype.itemsize for w in weights)
    cost = pl.CostEstimate(
        flops=int(flops),
        transcendentals=int(B * L * S * S),
        bytes_accessed=int((B // Bt) * wbytes          # weights streamed per batch tile
                           + B * S * D * (4 + 2)       # f32 in, bf16 out
                           + B * S * 4))               # padding bias

    return pl.pallas_call(
        functools.partial(encoder_stack_kernel, num_heads=H),
        out_shape=jax.ShapeDtypeStruct((B, S, D), jnp.bfloat16),
        grid_spec=pltpu.PrefetchScalarGridSpec(
            num_scalar_prefetch=0,
            grid=(B // Bt, L),                 # L innermost: activation stays in VMEM
            in_specs=in_specs,
            out_specs=pl.BlockSpec((Bt, S, D), lambda b, l: (b, 0, 0)),
            scratch_shapes=[pltpu.VMEM((Bt * S, D), jnp.float32),   # resident activation
                            pltpu.VMEM((S, S), jnp.float32)]),      # hoisted causal mask
        compiler_params=pltpu.CompilerParams(
            dimension_semantics=("parallel", "arbitrary"),
            vmem_limit_bytes=_vmem_limit_bytes()),
        cost_estimate=cost,
    )(x, pad_bias, *weights, params['ln_f_w'], params['ln_f_b'])


def final_projection(x, params):
    B, S, D = x.shape
    V = params['wout'].shape[1]
    Vp, vt = _pad_and_tile_vocab(V)
    wout, bout = params['wout'], params['bout']
    if Vp != V:
        wout = jnp.pad(wout, ((0, 0), (0, Vp - V)))
        bout = jnp.pad(bout, ((0, 0), (0, Vp - V)))
    Bt = _batch_tile(B, S)

    cost = pl.CostEstimate(
        flops=int(2 * B * S * D * Vp),
        transcendentals=0,
        bytes_accessed=int((B // Bt) * D * Vp * 2 + B * S * D * 2 + B * S * Vp * 4))

    logits = pl.pallas_call(
        final_proj_kernel,
        out_shape=jax.ShapeDtypeStruct((B, S, Vp), jnp.float32),
        grid_spec=pltpu.PrefetchScalarGridSpec(
            num_scalar_prefetch=0,
            grid=(B // Bt, Vp // vt),
            in_specs=[pl.BlockSpec((Bt, S, D), lambda b, j: (b, 0, 0)),
                      pl.BlockSpec((D, vt), lambda b, j: (0, j)),
                      pl.BlockSpec((1, vt), lambda b, j: (0, j))],
            out_specs=pl.BlockSpec((Bt, S, vt), lambda b, j: (b, 0, j))),
        compiler_params=pltpu.CompilerParams(
            dimension_semantics=("parallel", "parallel"),
            vmem_limit_bytes=_vmem_limit_bytes()),
        cost_estimate=cost,
    )(x, wout, bout)
    # TODO(synk): add an S tile to this grid for very long sequences on v7x.
    return logits[:, :, :V] if Vp != V else logits


# --------------------------------------------------------------------------
# Model glue (embedding gather, positional-encoding table, padding bias)
# --------------------------------------------------------------------------
def positional_encoding_table(max_len, d_model):
    position = jnp.arange(max_len, dtype=jnp.float32)[:, None]
    div_term = jnp.exp(jnp.arange(0, d_model, 2, dtype=jnp.float32)
                       * (-math.log(10000.0) / d_model))
    pe = jnp.zeros((max_len, d_model), jnp.float32)
    pe = pe.at[:, 0::2].set(jnp.sin(position * div_term))
    pe = pe.at[:, 1::2].set(jnp.cos(position * div_term))
    return pe


def music_transformer_forward(params, input_ids, attention_mask):
    """Equivalent of MusicTransformer.forward -> raw logits [B, S, vocab]."""
    B, S = input_ids.shape
    # token embedding (gather) + positional encoding: plain-JAX glue
    x = jnp.take(params['embedding'], input_ids, axis=0) + params['pe'][None, :S, :]
    # only the (B,1,S) key-padding bias is shipped; causal mask is built in-kernel
    pad_bias = jnp.where(attention_mask, NEG_INF, 0.0).astype(jnp.float32)[:, None, :]
    h = encoder_stack(x.astype(jnp.float32), pad_bias, params)   # bf16, ln_f applied
    return final_projection(h, params)


# --------------------------------------------------------------------------
# Deterministic parameter init (shapes follow the torch module's __init__)
# --------------------------------------------------------------------------
def init_params(key, vocab, d_model, n_heads, d_ff, n_layers, max_seq_len):
    keys = iter(jax.random.split(key, 32))
    nrm = lambda shape: 0.02 * jax.random.normal(next(keys), shape, jnp.float32)
    ones = lambda shape: jnp.ones(shape, jnp.float32)
    L, D, F = n_layers, d_model, d_ff
    return {
        'num_heads': n_heads,
        'embedding': nrm((vocab, D)),
        'pe': positional_encoding_table(max_seq_len, D),
        # per-layer weights stacked on a leading L axis; matmul weights in bf16
        'wqkv': nrm((L, D, 3 * D)).astype(jnp.bfloat16),   # packed [Wq | Wk | Wv]
        'bqkv': nrm((L, 1, 3 * D)),
        'wo': nrm((L, D, D)).astype(jnp.bfloat16),
        'bo': nrm((L, 1, D)),
        'ln1_w': ones((L, 1, D)) + nrm((L, 1, D)),
        'ln1_b': nrm((L, 1, D)),
        'w1': nrm((L, D, F)).astype(jnp.bfloat16),
        'b1': nrm((L, 1, F)),
        'w2': nrm((L, F, D)).astype(jnp.bfloat16),
        'b2': nrm((L, 1, D)),
        'ln2_w': ones((L, 1, D)) + nrm((L, 1, D)),
        'ln2_b': nrm((L, 1, D)),
        'ln_f_w': ones((1, D)) + nrm((1, D)),
        'ln_f_b': nrm((1, D)),
        'wout': nrm((D, vocab)).astype(jnp.bfloat16),
        'bout': nrm((1, vocab)),
    }


# --------------------------------------------------------------------------
# Pure-JAX reference (f32 math, same bf16-rounded weights) for correctness
# --------------------------------------------------------------------------
def reference_forward(params, input_ids, attention_mask):
    B, S = input_ids.shape
    D = params['embedding'].shape[1]
    H = int(params['num_heads'])
    hd = D // H
    L = params['wqkv'].shape[0]
    scale = 1.0 / math.sqrt(hd)
    f32 = lambda a: a.astype(jnp.float32)

    x = jnp.take(params['embedding'], input_ids, axis=0) + params['pe'][None, :S, :]
    idx = jnp.arange(S)
    causal = jnp.where(idx[None, :] > idx[:, None], NEG_INF, 0.0).astype(jnp.float32)
    mask = causal[None] + jnp.where(attention_mask, NEG_INF, 0.0)[:, None, :]   # (B,S,S)

    for l in range(L):
        qkv = x @ f32(params['wqkv'][l]) + params['bqkv'][l]
        q, k, v = jnp.split(qkv, 3, axis=-1)
        q = q.reshape(B, S, H, hd)
        k = k.reshape(B, S, H, hd)
        v = v.reshape(B, S, H, hd)
        s = jnp.einsum('bqhd,bkhd->bhqk', q, k) * scale + mask[:, None, :, :]
        p = jax.nn.softmax(s, axis=-1)
        ctx = jnp.einsum('bhqk,bkhd->bqhd', p, v).reshape(B, S, D)
        attn = ctx @ f32(params['wo'][l]) + params['bo'][l]
        y = _layer_norm(x + attn, params['ln1_w'][l], params['ln1_b'][l])
        f = jnp.maximum(y @ f32(params['w1'][l]) + params['b1'][l], 0.0)
        f = f @ f32(params['w2'][l]) + params['b2'][l]
        x = _layer_norm(y + f, params['ln2_w'][l], params['ln2_b'][l])

    y = _layer_norm(x, params['ln_f_w'], params['ln_f_b'])
    return y @ f32(params['wout']) + params['bout']


if __name__ == "__main__":
    VOCAB, D_MODEL, N_HEADS, D_FF, N_LAYERS = 384, 128, 4, 256, 2
    MAX_SEQ_LEN, B, S = 32, 2, 16

    key = jax.random.PRNGKey(0)
    pkey, ikey = jax.random.split(key)
    params = init_params(pkey, VOCAB, D_MODEL, N_HEADS, D_FF, N_LAYERS, MAX_SEQ_LEN)

    input_ids = jax.random.randint(ikey, (B, S), 0, VOCAB, dtype=jnp.int32)
    # key-padding mask: True = position is ignored.  NOTE: fully-masked score
    # rows give a uniform (not NaN) softmax since NEG_INF is finite — a
    # documented, intentional divergence from PyTorch's NaN behaviour.
    attention_mask = jnp.zeros((B, S), dtype=bool).at[1, -4:].set(True)

    logits = music_transformer_forward(params, input_ids, attention_mask)
    logits = jax.block_until_ready(logits)

    ref = reference_forward(params, input_ids, attention_mask)
    assert logits.shape == (B, S, VOCAB), logits.shape
    assert bool(jnp.isfinite(logits).all())
    max_err = float(jnp.max(jnp.abs(logits - ref)))
    assert max_err < 2e-2, f"mismatch vs reference: {max_err}"
    print("KERNEL_OK")
</pallas_src>

<mosaic_0001>
module attributes {stable_mosaic.version = 11 : i64} {
  func.func @encoder_stack_kernel(%arg0: i32, %arg1: i32, %arg2: memref<2x16x128xf32, #tpu.memory_space<vmem>>, %arg3: memref<2x1x16xf32, #tpu.memory_space<vmem>>, %arg4: memref<1x128x384xbf16, #tpu.memory_space<vmem>>, %arg5: memref<1x1x384xf32, #tpu.memory_space<vmem>>, %arg6: memref<1x128x128xbf16, #tpu.memory_space<vmem>>, %arg7: memref<1x1x128xf32, #tpu.memory_space<vmem>>, %arg8: memref<1x1x128xf32, #tpu.memory_space<vmem>>, %arg9: memref<1x1x128xf32, #tpu.memory_space<vmem>>, %arg10: memref<1x128x256xbf16, #tpu.memory_space<vmem>>, %arg11: memref<1x1x256xf32, #tpu.memory_space<vmem>>, %arg12: memref<1x256x128xbf16, #tpu.memory_space<vmem>>, %arg13: memref<1x1x128xf32, #tpu.memory_space<vmem>>, %arg14: memref<1x1x128xf32, #tpu.memory_space<vmem>>, %arg15: memref<1x1x128xf32, #tpu.memory_space<vmem>>, %arg16: memref<1x128xf32, #tpu.memory_space<vmem>>, %arg17: memref<1x128xf32, #tpu.memory_space<vmem>>, %arg18: memref<2x16x128xbf16, #tpu.memory_space<vmem>>, %arg19: memref<32x128xf32, #tpu.memory_space<vmem>>, %arg20: memref<16x16xf32, #tpu.memory_space<vmem>>) attributes {dimension_semantics = [#tpu.dimension_semantics<parallel>, #tpu.dimension_semantics<arbitrary>], iteration_bounds = array<i64: 1, 2>, scalar_prefetch = 0 : i64, scratch_operands = 2 : i64, tpu.core_type = #tpu.core_type<tc>, window_params = [{transform_indices = @transform_0, window_bounds = array<i64: 2, 16, 128>}, {transform_indices = @transform_1, window_bounds = array<i64: 2, 1, 16>}, {transform_indices = @transform_2, window_bounds = array<i64: 1, 128, 384>}, {transform_indices = @transform_3, window_bounds = array<i64: 1, 1, 384>}, {transform_indices = @transform_4, window_bounds = array<i64: 1, 128, 128>}, {transform_indices = @transform_5, window_bounds = array<i64: 1, 1, 128>}, {transform_indices = @transform_6, window_bounds = array<i64: 1, 1, 128>}, {transform_indices = @transform_7, window_bounds = array<i64: 1, 1, 128>}, {transform_indices = @transform_8, window_bounds = array<i64: 1, 128, 256>}, {transform_indices = @transform_9, window_bounds = array<i64: 1, 1, 256>}, {transform_indices = @transform_10, window_bounds = array<i64: 1, 256, 128>}, {transform_indices = @transform_11, window_bounds = array<i64: 1, 1, 128>}, {transform_indices = @transform_12, window_bounds = array<i64: 1, 1, 128>}, {transform_indices = @transform_13, window_bounds = array<i64: 1, 1, 128>}, {pipeline_mode = #tpu.pipeline_mode<synchronous>, transform_indices = @transform_14, window_bounds = array<i64: 1, 128>}, {pipeline_mode = #tpu.pipeline_mode<synchronous>, transform_indices = @transform_15, window_bounds = array<i64: 1, 128>}, {transform_indices = @transform_16, window_bounds = array<i64: 2, 16, 128>}]} {
    %c0_i32 = arith.constant 0 : i32
    %0 = arith.cmpi eq, %arg1, %c0_i32 : i32
    %1 = arith.extui %0 : i1 to i32
    %c0_i32_0 = arith.constant 0 : i32
    %2 = arith.cmpi ne, %1, %c0_i32_0 : i32
    scf.if %2 {
      %c0_98 = arith.constant 0 : index
      %c0_99 = arith.constant 0 : index
      %c0_100 = arith.constant 0 : index
      %266 = vector.load %arg2[%c0_98, %c0_99, %c0_100] : memref<2x16x128xf32, #tpu.memory_space<vmem>>, vector<2x16x128xf32>
      %267 = vector.shape_cast %266 : vector<2x16x128xf32> to vector<32x128xf32>
      %c0_101 = arith.constant 0 : index
      %c0_102 = arith.constant 0 : index
      %268 = vector.load %arg19[%c0_101, %c0_102] : memref<32x128xf32, #tpu.memory_space<vmem>>, vector<32x128xf32>
      tpu.vector_store %arg19[%c0_101, %c0_102], %267 {strides = array<i32>} : memref<32x128xf32, #tpu.memory_space<vmem>>, vector<32x128xf32>,
      %269 = tpu.iota {dimensions = array<i32: 0>} : vector<16x16xi32>
      %270 = tpu.iota {dimensions = array<i32: 1>} : vector<16x16xi32>
      %271 = arith.cmpi sgt, %270, %269 : vector<16x16xi32>
      %cst_103 = arith.constant -1.000000e+09 : f32
      %cst_104 = arith.constant 0.000000e+00 : f32
      %272 = vector.broadcast %cst_103 : f32 to vector<16x16xf32>
      %273 = vector.broadcast %cst_104 : f32 to vector<16x16xf32>
      %274 = arith.select %271, %272, %273 : vector<16x16xi1>, vector<16x16xf32>
      %c0_105 = arith.constant 0 : index
      %c0_106 = arith.constant 0 : index
      %275 = vector.load %arg20[%c0_105, %c0_106] : memref<16x16xf32, #tpu.memory_space<vmem>>, vector<16x16xf32>
      tpu.vector_store %arg20[%c0_105, %c0_106], %274 {strides = array<i32>} : memref<16x16xf32, #tpu.memory_space<vmem>>, vector<16x16xf32>,
    } else {
    }
    %c0 = arith.constant 0 : index
    %c0_1 = arith.constant 0 : index
    %3 = vector.load %arg19[%c0, %c0_1] : memref<32x128xf32, #tpu.memory_space<vmem>>, vector<32x128xf32>
    %4 = arith.truncf %3 : vector<32x128xf32> to vector<32x128xbf16>
    %c0_2 = arith.constant 0 : index
    %c0_3 = arith.constant 0 : index
    %c0_4 = arith.constant 0 : index
    %5 = vector.load %arg4[%c0_2, %c0_3, %c0_4] : memref<1x128x384xbf16, #tpu.memory_space<vmem>>, vector<1x128x384xbf16>
    %6 = vector.shape_cast %5 : vector<1x128x384xbf16> to vector<128x384xbf16>
    %cst = arith.constant dense<0.000000e+00> : vector<32x384xf32>
    %7 = tpu.matmul %4, %6, %cst {dimension_numbers = #tpu.dot_dimension_numbers<[1], [0], [0], [1], [0, 0, 1, 1], [], []>} : vector<32x128xbf16>, vector<128x384xbf16>, vector<32x384xf32> -> vector<32x384xf32>
    %c0_5 = arith.constant 0 : index
    %c0_6 = arith.constant 0 : index
    %c0_7 = arith.constant 0 : index
    %8 = vector.load %arg5[%c0_5, %c0_6, %c0_7] : memref<1x1x384xf32, #tpu.memory_space<vmem>>, vector<1x1x384xf32>
    %9 = vector.shape_cast %8 : vector<1x1x384xf32> to vector<1x384xf32>
    %10 = vector.broadcast %9 : vector<1x384xf32> to vector<32x384xf32>
    %11 = arith.addf %7, %10 : vector<32x384xf32>
    %12 = vector.extract_strided_slice %11 {offsets = [0, 0], sizes = [32, 128], strides = [1, 1]} : vector<32x384xf32> to vector<32x128xf32>
    %cst_8 = arith.constant 0.176776692 : f32
    %13 = vector.broadcast %cst_8 : f32 to vector<32x128xf32>
    %14 = arith.mulf %12, %13 : vector<32x128xf32>
    %15 = arith.truncf %14 : vector<32x128xf32> to vector<32x128xbf16>
    %16 = vector.extract_strided_slice %11 {offsets = [0, 128], sizes = [32, 128], strides = [1, 1]} : vector<32x384xf32> to vector<32x128xf32>
    %17 = arith.truncf %16 : vector<32x128xf32> to vector<32x128xbf16>
    %18 = vector.extract_strided_slice %11 {offsets = [0, 256], sizes = [32, 128], strides = [1, 1]} : vector<32x384xf32> to vector<32x128xf32>
    %19 = arith.truncf %18 : vector<32x128xf32> to vector<32x128xbf16>
    %c0_9 = arith.constant 0 : index
    %c0_10 = arith.constant 0 : index
    %20 = vector.load %arg20[%c0_9, %c0_10] : memref<16x16xf32, #tpu.memory_space<vmem>>, vector<16x16xf32>
    %c0_11 = arith.constant 0 : index
    %c0_12 = arith.constant 0 : index
    %c0_13 = arith.constant 0 : index
    %21 = vector.load %arg3[%c0_11, %c0_12, %c0_13] : memref<2x1x16xf32, #tpu.memory_space<vmem>>, vector<1x1x16xf32>
    %22 = vector.shape_cast %21 : vector<1x1x16xf32> to vector<1x16xf32>
    %23 = vector.broadcast %22 : vector<1x16xf32> to vector<16x16xf32>
    %24 = arith.addf %20, %23 : vector<16x16xf32>
    %c1 = arith.constant 1 : index
    %c0_14 = arith.constant 0 : index
    %c0_15 = arith.constant 0 : index
    %25 = vector.load %arg3[%c1, %c0_14, %c0_15] : memref<2x1x16xf32, #tpu.memory_space<vmem>>, vector<1x1x16xf32>
    %26 = vector.shape_cast %25 : vector<1x1x16xf32> to vector<1x16xf32>
    %27 = vector.broadcast %26 : vector<1x16xf32> to vector<16x16xf32>
    %28 = arith.addf %20, %27 : vector<16x16xf32>
    %c0_16 = arith.constant 0 : index
    %c0_17 = arith.constant 0 : index
    %c0_18 = arith.constant 0 : index
    %29 = vector.load %arg6[%c0_16, %c0_17, %c0_18] : memref<1x128x128xbf16, #tpu.memory_space<vmem>>, vector<1x128x128xbf16>
    %30 = vector.shape_cast %29 : vector<1x128x128xbf16> to vector<128x128xbf16>
    %31 = vector.extract_strided_slice %15 {offsets = [0, 0], sizes = [16, 32], strides = [1, 1]} : vector<32x128xbf16> to vector<16x32xbf16>
    %32 = vector.extract_strided_slice %17 {offsets = [0, 0], sizes = [16, 32], strides = [1, 1]} : vector<32x128xbf16> to vector<16x32xbf16>
    %cst_19 = arith.constant dense<0.000000e+00> : vector<16x16xf32>
    %33 = tpu.matmul %31, %32, %cst_19 {dimension_numbers = #tpu.dot_dimension_numbers<[1], [1], [0], [0], [0, 0, 1, 0], [], []>} : vector<16x32xbf16>, vector<16x32xbf16>, vector<16x16xf32> -> vector<16x16xf32>
    %34 = arith.addf %33, %24 : vector<16x16xf32>
    %cst_20 = arith.constant dense<0xFF800000> : vector<16xf32>
    %35 = vector.multi_reduction <maximumf>, %34, %cst_20 [1] : vector<16x16xf32> to vector<16xf32>
    %36 = vector.shape_cast %35 : vector<16xf32> to vector<16x1xf32>
    %37 = vector.broadcast %36 : vector<16x1xf32> to vector<16x16xf32>
    %38 = arith.subf %34, %37 : vector<16x16xf32>
    %39 = math.exp %38 : vector<16x16xf32>
    %cst_21 = arith.constant dense<0.000000e+00> : vector<16xf32>
    %40 = vector.multi_reduction <add>, %39, %cst_21 [1] : vector<16x16xf32> to vector<16xf32>
    %41 = vector.shape_cast %40 : vector<16xf32> to vector<16x1xf32>
    %42 = tpu.reciprocal %41 {approx = true} : vector<16x1xf32> -> vector<16x1xf32>
    %43 = vector.broadcast %42 : vector<16x1xf32> to vector<16x16xf32>
    %44 = arith.mulf %39, %43 : vector<16x16xf32>
    %45 = arith.truncf %44 : vector<16x16xf32> to vector<16x16xbf16>
    %46 = vector.extract_strided_slice %19 {offsets = [0, 0], sizes = [16, 32], strides = [1, 1]} : vector<32x128xbf16> to vector<16x32xbf16>
    %cst_22 = arith.constant dense<0.000000e+00> : vector<16x32xf32>
    %47 = tpu.matmul %45, %46, %cst_22 {dimension_numbers = #tpu.dot_dimension_numbers<[1], [0], [0], [1], [0, 0, 1, 1], [], []>} : vector<16x16xbf16>, vector<16x32xbf16>, vector<16x32xf32> -> vector<16x32xf32>
    %48 = vector.extract_strided_slice %15 {offsets = [16, 0], sizes = [16, 32], strides = [1, 1]} : vector<32x128xbf16> to vector<16x32xbf16>
    %49 = vector.extract_strided_slice %17 {offsets = [16, 0], sizes = [16, 32], strides = [1, 1]} : vector<32x128xbf16> to vector<16x32xbf16>
    %cst_23 = arith.constant dense<0.000000e+00> : vector<16x16xf32>
    %50 = tpu.matmul %48, %49, %cst_23 {dimension_numbers = #tpu.dot_dimension_numbers<[1], [1], [0], [0], [0, 0, 1, 0], [], []>} : vector<16x32xbf16>, vector<16x32xbf16>, vector<16x16xf32> -> vector<16x16xf32>
    %51 = arith.addf %50, %28 : vector<16x16xf32>
    %cst_24 = arith.constant dense<0xFF800000> : vector<16xf32>
    %52 = vector.multi_reduction <maximumf>, %51, %cst_24 [1] : vector<16x16xf32> to vector<16xf32>
    %53 = vector.shape_cast %52 : vector<16xf32> to vector<16x1xf32>
    %54 = vector.broadcast %53 : vector<16x1xf32> to vector<16x16xf32>
    %55 = arith.subf %51, %54 : vector<16x16xf32>
    %56 = math.exp %55 : vector<16x16xf32>
    %cst_25 = arith.constant dense<0.000000e+00> : vector<16xf32>
    %57 = vector.multi_reduction <add>, %56, %cst_25 [1] : vector<16x16xf32> to vector<16xf32>
    %58 = vector.shape_cast %57 : vector<16xf32> to vector<16x1xf32>
    %59 = tpu.reciprocal %58 {approx = true} : vector<16x1xf32> -> vector<16x1xf32>
    %60 = vector.broadcast %59 : vector<16x1xf32> to vector<16x16xf32>
    %61 = arith.mulf %56, %60 : vector<16x16xf32>
    %62 = arith.truncf %61 : vector<16x16xf32> to vector<16x16xbf16>
    %63 = vector.extract_strided_slice %19 {offsets = [16, 0], sizes = [16, 32], strides = [1, 1]} : vector<32x128xbf16> to vector<16x32xbf16>
    %cst_26 = arith.constant dense<0.000000e+00> : vector<16x32xf32>
    %64 = tpu.matmul %62, %63, %cst_26 {dimension_numbers = #tpu.dot_dimension_numbers<[1], [0], [0], [1], [0, 0, 1, 1], [], []>} : vector<16x16xbf16>, vector<16x32xbf16>, vector<16x32xf32> -> vector<16x32xf32>
    %65 = tpu.concatenate %47, %64 in 0 : vector<16x32xf32>, vector<16x32xf32> -> vector<32x32xf32>
    %66 = arith.truncf %65 : vector<32x32xf32> to vector<32x32xbf16>
    %67 = vector.extract_strided_slice %30 {offsets = [0, 0], sizes = [32, 128], strides = [1, 1]} : vector<128x128xbf16> to vector<32x128xbf16>
    %cst_27 = arith.constant dense<0.000000e+00> : vector<32x128xf32>
    %68 = tpu.matmul %66, %67, %cst_27 {dimension_numbers = #tpu.dot_dimension_numbers<[1], [0], [0], [1], [0, 0, 1, 1], [], []>} : vector<32x32xbf16>, vector<32x128xbf16>, vector<32x128xf32> -> vector<32x128xf32>
    %69 = vector.extract_strided_slice %15 {offsets = [0, 32], sizes = [16, 32], strides = [1, 1]} : vector<32x128xbf16> to vector<16x32xbf16>
    %70 = vector.extract_strided_slice %17 {offsets = [0, 32], sizes = [16, 32], strides = [1, 1]} : vector<32x128xbf16> to vector<16x32xbf16>
    %cst_28 = arith.constant dense<0.000000e+00> : vector<16x16xf32>
    %71 = tpu.matmul %69, %70, %cst_28 {dimension_numbers = #tpu.dot_dimension_numbers<[1], [1], [0], [0], [0, 0, 1, 0], [], []>} : vector<16x32xbf16>, vector<16x32xbf16>, vector<16x16xf32> -> vector<16x16xf32>
    %72 = arith.addf %71, %24 : vector<16x16xf32>
    %cst_29 = arith.constant dense<0xFF800000> : vector<16xf32>
    %73 = vector.multi_reduction <maximumf>, %72, %cst_29 [1] : vector<16x16xf32> to vector<16xf32>
    %74 = vector.shape_cast %73 : vector<16xf32> to vector<16x1xf32>
    %75 = vector.broadcast %74 : vector<16x1xf32> to vector<16x16xf32>
    %76 = arith.subf %72, %75 : vector<16x16xf32>
    %77 = math.exp %76 : vector<16x16xf32>
    %cst_30 = arith.constant dense<0.000000e+00> : vector<16xf32>
    %78 = vector.multi_reduction <add>, %77, %cst_30 [1] : vector<16x16xf32> to vector<16xf32>
    %79 = vector.shape_cast %78 : vector<16xf32> to vector<16x1xf32>
    %80 = tpu.reciprocal %79 {approx = true} : vector<16x1xf32> -> vector<16x1xf32>
    %81 = vector.broadcast %80 : vector<16x1xf32> to vector<16x16xf32>
    %82 = arith.mulf %77, %81 : vector<16x16xf32>
    %83 = arith.truncf %82 : vector<16x16xf32> to vector<16x16xbf16>
    %84 = vector.extract_strided_slice %19 {offsets = [0, 32], sizes = [16, 32], strides = [1, 1]} : vector<32x128xbf16> to vector<16x32xbf16>
    %cst_31 = arith.constant dense<0.000000e+00> : vector<16x32xf32>
    %85 = tpu.matmul %83, %84, %cst_31 {dimension_numbers = #tpu.dot_dimension_numbers<[1], [0], [0], [1], [0, 0, 1, 1], [], []>} : vector<16x16xbf16>, vector<16x32xbf16>, vector<16x32xf32> -> vector<16x32xf32>
    %86 = vector.extract_strided_slice %15 {offsets = [16, 32], sizes = [16, 32], strides = [1, 1]} : vector<32x128xbf16> to vector<16x32xbf16>
    %87 = vector.extract_strided_slice %17 {offsets = [16, 32], sizes = [16, 32], strides = [1, 1]} : vector<32x128xbf16> to vector<16x32xbf16>
    %cst_32 = arith.constant dense<0.000000e+00> : vector<16x16xf32>
    %88 = tpu.matmul %86, %87, %cst_32 {dimension_numbers = #tpu.dot_dimension_numbers<[1], [1], [0], [0], [0, 0, 1, 0], [], []>} : vector<16x32xbf16>, vector<16x32xbf16>, vector<16x16xf32> -> vector<16x16xf32>
    %89 = arith.addf %88, %28 : vector<16x16xf32>
    %cst_33 = arith.constant dense<0xFF800000> : vector<16xf32>
    %90 = vector.multi_reduction <maximumf>, %89, %cst_33 [1] : vector<16x16xf32> to vector<16xf32>
    %91 = vector.shape_cast %90 : vector<16xf32> to vector<16x1xf32>
    %92 = vector.broadcast %91 : vector<16x1xf32> to vector<16x16xf32>
    %93 = arith.subf %89, %92 : vector<16x16xf32>
    %94 = math.exp %93 : vector<16x16xf32>
    %cst_34 = arith.constant dense<0.000000e+00> : vector<16xf32>
    %95 = vector.multi_reduction <add>, %94, %cst_34 [1] : vector<16x16xf32> to vector<16xf32>
    %96 = vector.shape_cast %95 : vector<16xf32> to vector<16x1xf32>
    %97 = tpu.reciprocal %96 {approx = true} : vector<16x1xf32> -> vector<16x1xf32>
    %98 = vector.broadcast %97 : vector<16x1xf32> to vector<16x16xf32>
    %99 = arith.mulf %94, %98 : vector<16x16xf32>
    %100 = arith.truncf %99 : vector<16x16xf32> to vector<16x16xbf16>
    %101 = vector.extract_strided_slice %19 {offsets = [16, 32], sizes = [16, 32], strides = [1, 1]} : vector<32x128xbf16> to vector<16x32xbf16>
    %cst_35 = arith.constant dense<0.000000e+00> : vector<16x32xf32>
    %102 = tpu.matmul %100, %101, %cst_35 {dimension_numbers = #tpu.dot_dimension_numbers<[1], [0], [0], [1], [0, 0, 1, 1], [], []>} : vector<16x16xbf16>, vector<16x32xbf16>, vector<16x32xf32> -> vector<16x32xf32>
    %103 = tpu.concatenate %85, %102 in 0 : vector<16x32xf32>, vector<16x32xf32> -> vector<32x32xf32>
    %104 = arith.truncf %103 : vector<32x32xf32> to vector<32x32xbf16>
    %105 = vector.extract_strided_slice %30 {offsets = [32, 0], sizes = [32, 128], strides = [1, 1]} : vector<128x128xbf16> to vector<32x128xbf16>
    %cst_36 = arith.constant dense<0.000000e+00> : vector<32x128xf32>
    %106 = tpu.matmul %104, %105, %cst_36 {dimension_numbers = #tpu.dot_dimension_numbers<[1], [0], [0], [1], [0, 0, 1, 1], [], []>} : vector<32x32xbf16>, vector<32x128xbf16>, vector<32x128xf32> -> vector<32x128xf32>
    %107 = arith.addf %68, %106 : vector<32x128xf32>
    %108 = vector.extract_strided_slice %15 {offsets = [0, 64], sizes = [16, 32], strides = [1, 1]} : vector<32x128xbf16> to vector<16x32xbf16>
    %109 = vector.extract_strided_slice %17 {offsets = [0, 64], sizes = [16, 32], strides = [1, 1]} : vector<32x128xbf16> to vector<16x32xbf16>
    %cst_37 = arith.constant dense<0.000000e+00> : vector<16x16xf32>
    %110 = tpu.matmul %108, %109, %cst_37 {dimension_numbers = #tpu.dot_dimension_numbers<[1], [1], [0], [0], [0, 0, 1, 0], [], []>} : vector<16x32xbf16>, vector<16x32xbf16>, vector<16x16xf32> -> vector<16x16xf32>
    %111 = arith.addf %110, %24 : vector<16x16xf32>
    %cst_38 = arith.constant dense<0xFF800000> : vector<16xf32>
    %112 = vector.multi_reduction <maximumf>, %111, %cst_38 [1] : vector<16x16xf32> to vector<16xf32>
    %113 = vector.shape_cast %112 : vector<16xf32> to vector<16x1xf32>
    %114 = vector.broadcast %113 : vector<16x1xf32> to vector<16x16xf32>
    %115 = arith.subf %111, %114 : vector<16x16xf32>
    %116 = math.exp %115 : vector<16x16xf32>
    %cst_39 = arith.constant dense<0.000000e+00> : vector<16xf32>
    %117 = vector.multi_reduction <add>, %116, %cst_39 [1] : vector<16x16xf32> to vector<16xf32>
    %118 = vector.shape_cast %117 : vector<16xf32> to vector<16x1xf32>
    %119 = tpu.reciprocal %118 {approx = true} : vector<16x1xf32> -> vector<16x1xf32>
    %120 = vector.broadcast %119 : vector<16x1xf32> to vector<16x16xf32>
    %121 = arith.mulf %116, %120 : vector<16x16xf32>
    %122 = arith.truncf %121 : vector<16x16xf32> to vector<16x16xbf16>
    %123 = vector.extract_strided_slice %19 {offsets = [0, 64], sizes = [16, 32], strides = [1, 1]} : vector<32x128xbf16> to vector<16x32xbf16>
    %cst_40 = arith.constant dense<0.000000e+00> : vector<16x32xf32>
    %124 = tpu.matmul %122, %123, %cst_40 {dimension_numbers = #tpu.dot_dimension_numbers<[1], [0], [0], [1], [0, 0, 1, 1], [], []>} : vector<16x16xbf16>, vector<16x32xbf16>, vector<16x32xf32> -> vector<16x32xf32>
    %125 = vector.extract_strided_slice %15 {offsets = [16, 64], sizes = [16, 32], strides = [1, 1]} : vector<32x128xbf16> to vector<16x32xbf16>
    %126 = vector.extract_strided_slice %17 {offsets = [16, 64], sizes = [16, 32], strides = [1, 1]} : vector<32x128xbf16> to vector<16x32xbf16>
    %cst_41 = arith.constant dense<0.000000e+00> : vector<16x16xf32>
    %127 = tpu.matmul %125, %126, %cst_41 {dimension_numbers = #tpu.dot_dimension_numbers<[1], [1], [0], [0], [0, 0, 1, 0], [], []>} : vector<16x32xbf16>, vector<16x32xbf16>, vector<16x16xf32> -> vector<16x16xf32>
    %128 = arith.addf %127, %28 : vector<16x16xf32>
    %cst_42 = arith.constant dense<0xFF800000> : vector<16xf32>
    %129 = vector.multi_reduction <maximumf>, %128, %cst_42 [1] : vector<16x16xf32> to vector<16xf32>
    %130 = vector.shape_cast %129 : vector<16xf32> to vector<16x1xf32>
    %131 = vector.broadcast %130 : vector<16x1xf32> to vector<16x16xf32>
    %132 = arith.subf %128, %131 : vector<16x16xf32>
    %133 = math.exp %132 : vector<16x16xf32>
    %cst_43 = arith.constant dense<0.000000e+00> : vector<16xf32>
    %134 = vector.multi_reduction <add>, %133, %cst_43 [1] : vector<16x16xf32> to vector<16xf32>
    %135 = vector.shape_cast %134 : vector<16xf32> to vector<16x1xf32>
    %136 = tpu.reciprocal %135 {approx = true} : vector<16x1xf32> -> vector<16x1xf32>
    %137 = vector.broadcast %136 : vector<16x1xf32> to vector<16x16xf32>
    %138 = arith.mulf %133, %137 : vector<16x16xf32>
    %139 = arith.truncf %138 : vector<16x16xf32> to vector<16x16xbf16>
    %140 = vector.extract_strided_slice %19 {offsets = [16, 64], sizes = [16, 32], strides = [1, 1]} : vector<32x128xbf16> to vector<16x32xbf16>
    %cst_44 = arith.constant dense<0.000000e+00> : vector<16x32xf32>
    %141 = tpu.matmul %139, %140, %cst_44 {dimension_numbers = #tpu.dot_dimension_numbers<[1], [0], [0], [1], [0, 0, 1, 1], [], []>} : vector<16x16xbf16>, vector<16x32xbf16>, vector<16x32xf32> -> vector<16x32xf32>
    %142 = tpu.concatenate %124, %141 in 0 : vector<16x32xf32>, vector<16x32xf32> -> vector<32x32xf32>
    %143 = arith.truncf %142 : vector<32x32xf32> to vector<32x32xbf16>
    %144 = vector.extract_strided_slice %30 {offsets = [64, 0], sizes = [32, 128], strides = [1, 1]} : vector<128x128xbf16> to vector<32x128xbf16>
    %cst_45 = arith.constant dense<0.000000e+00> : vector<32x128xf32>
    %145 = tpu.matmul %143, %144, %cst_45 {dimension_numbers = #tpu.dot_dimension_numbers<[1], [0], [0], [1], [0, 0, 1, 1], [], []>} : vector<32x32xbf16>, vector<32x128xbf16>, vector<32x128xf32> -> vector<32x128xf32>
    %146 = arith.addf %107, %145 : vector<32x128xf32>
    %147 = vector.extract_strided_slice %15 {offsets = [0, 96], sizes = [16, 32], strides = [1, 1]} : vector<32x128xbf16> to vector<16x32xbf16>
    %148 = vector.extract_strided_slice %17 {offsets = [0, 96], sizes = [16, 32], strides = [1, 1]} : vector<32x128xbf16> to vector<16x32xbf16>
    %cst_46 = arith.constant dense<0.000000e+00> : vector<16x16xf32>
    %149 = tpu.matmul %147, %148, %cst_46 {dimension_numbers = #tpu.dot_dimension_numbers<[1], [1], [0], [0], [0, 0, 1, 0], [], []>} : vector<16x32xbf16>, vector<16x32xbf16>, vector<16x16xf32> -> vector<16x16xf32>
    %150 = arith.addf %149, %24 : vector<16x16xf32>
    %cst_47 = arith.constant dense<0xFF800000> : vector<16xf32>
    %151 = vector.multi_reduction <maximumf>, %150, %cst_47 [1] : vector<16x16xf32> to vector<16xf32>
    %152 = vector.shape_cast %151 : vector<16xf32> to vector<16x1xf32>
    %153 = vector.broadcast %152 : vector<16x1xf32> to vector<16x16xf32>
    %154 = arith.subf %150, %153 : vector<16x16xf32>
    %155 = math.exp %154 : vector<16x16xf32>
    %cst_48 = arith.constant dense<0.000000e+00> : vector<16xf32>
    %156 = vector.multi_reduction <add>, %155, %cst_48 [1] : vector<16x16xf32> to vector<16xf32>
    %157 = vector.shape_cast %156 : vector<16xf32> to vector<16x1xf32>
    %158 = tpu.reciprocal %157 {approx = true} : vector<16x1xf32> -> vector<16x1xf32>
    %159 = vector.broadcast %158 : vector<16x1xf32> to vector<16x16xf32>
    %160 = arith.mulf %155, %159 : vector<16x16xf32>
    %161 = arith.truncf %160 : vector<16x16xf32> to vector<16x16xbf16>
    %162 = vector.extract_strided_slice %19 {offsets = [0, 96], sizes = [16, 32], strides = [1, 1]} : vector<32x128xbf16> to vector<16x32xbf16>
    %cst_49 = arith.constant dense<0.000000e+00> : vector<16x32xf32>
    %163 = tpu.matmul %161, %162, %cst_49 {dimension_numbers = #tpu.dot_dimension_numbers<[1], [0], [0], [1], [0, 0, 1, 1], [], []>} : vector<16x16xbf16>, vector<16x32xbf16>, vector<16x32xf32> -> vector<16x32xf32>
    %164 = vector.extract_strided_slice %15 {offsets = [16, 96], sizes = [16, 32], strides = [1, 1]} : vector<32x128xbf16> to vector<16x32xbf16>
    %165 = vector.extract_strided_slice %17 {offsets = [16, 96], sizes = [16, 32], strides = [1, 1]} : vector<32x128xbf16> to vector<16x32xbf16>
    %cst_50 = arith.constant dense<0.000000e+00> : vector<16x16xf32>
    %166 = tpu.matmul %164, %165, %cst_50 {dimension_numbers = #tpu.dot_dimension_numbers<[1], [1], [0], [0], [0, 0, 1, 0], [], []>} : vector<16x32xbf16>, vector<16x32xbf16>, vector<16x16xf32> -> vector<16x16xf32>
    %167 = arith.addf %166, %28 : vector<16x16xf32>
    %cst_51 = arith.constant dense<0xFF800000> : vector<16xf32>
    %168 = vector.multi_reduction <maximumf>, %167, %cst_51 [1] : vector<16x16xf32> to vector<16xf32>
    %169 = vector.shape_cast %168 : vector<16xf32> to vector<16x1xf32>
    %170 = vector.broadcast %169 : vector<16x1xf32> to vector<16x16xf32>
    %171 = arith.subf %167, %170 : vector<16x16xf32>
    %172 = math.exp %171 : vector<16x16xf32>
    %cst_52 = arith.constant dense<0.000000e+00> : vector<16xf32>
    %173 = vector.multi_reduction <add>, %172, %cst_52 [1] : vector<16x16xf32> to vector<16xf32>
    %174 = vector.shape_cast %173 : vector<16xf32> to vector<16x1xf32>
    %175 = tpu.reciprocal %174 {approx = true} : vector<16x1xf32> -> vector<16x1xf32>
    %176 = vector.broadcast %175 : vector<16x1xf32> to vector<16x16xf32>
    %177 = arith.mulf %172, %176 : vector<16x16xf32>
    %178 = arith.truncf %177 : vector<16x16xf32> to vector<16x16xbf16>
    %179 = vector.extract_strided_slice %19 {offsets = [16, 96], sizes = [16, 32], strides = [1, 1]} : vector<32x128xbf16> to vector<16x32xbf16>
    %cst_53 = arith.constant dense<0.000000e+00> : vector<16x32xf32>
    %180 = tpu.matmul %178, %179, %cst_53 {dimension_numbers = #tpu.dot_dimension_numbers<[1], [0], [0], [1], [0, 0, 1, 1], [], []>} : vector<16x16xbf16>, vector<16x32xbf16>, vector<16x32xf32> -> vector<16x32xf32>
    %181 = tpu.concatenate %163, %180 in 0 : vector<16x32xf32>, vector<16x32xf32> -> vector<32x32xf32>
    %182 = arith.truncf %181 : vector<32x32xf32> to vector<32x32xbf16>
    %183 = vector.extract_strided_slice %30 {offsets = [96, 0], sizes = [32, 128], strides = [1, 1]} : vector<128x128xbf16> to vector<32x128xbf16>
    %cst_54 = arith.constant dense<0.000000e+00> : vector<32x128xf32>
    %184 = tpu.matmul %182, %183, %cst_54 {dimension_numbers = #tpu.dot_dimension_numbers<[1], [0], [0], [1], [0, 0, 1, 1], [], []>} : vector<32x32xbf16>, vector<32x128xbf16>, vector<32x128xf32> -> vector<32x128xf32>
    %185 = arith.addf %146, %184 : vector<32x128xf32>
    %c0_55 = arith.constant 0 : index
    %c0_56 = arith.constant 0 : index
    %c0_57 = arith.constant 0 : index
    %186 = vector.load %arg7[%c0_55, %c0_56, %c0_57] : memref<1x1x128xf32, #tpu.memory_space<vmem>>, vector<1x1x128xf32>
    %187 = vector.shape_cast %186 : vector<1x1x128xf32> to vector<1x128xf32>
    %188 = vector.broadcast %187 : vector<1x128xf32> to vector<32x128xf32>
    %189 = arith.addf %185, %188 : vector<32x128xf32>
    %190 = arith.addf %3, %189 : vector<32x128xf32>
    %c0_58 = arith.constant 0 : index
    %c0_59 = arith.constant 0 : index
    %c0_60 = arith.constant 0 : index
    %191 = vector.load %arg8[%c0_58, %c0_59, %c0_60] : memref<1x1x128xf32, #tpu.memory_space<vmem>>, vector<1x1x128xf32>
    %192 = vector.shape_cast %191 : vector<1x1x128xf32> to vector<1x128xf32>
    %c0_61 = arith.constant 0 : index
    %c0_62 = arith.constant 0 : index
    %c0_63 = arith.constant 0 : index
    %193 = vector.load %arg9[%c0_61, %c0_62, %c0_63] : memref<1x1x128xf32, #tpu.memory_space<vmem>>, vector<1x1x128xf32>
    %194 = vector.shape_cast %193 : vector<1x1x128xf32> to vector<1x128xf32>
    %cst_64 = arith.constant dense<0.000000e+00> : vector<32xf32>
    %195 = vector.multi_reduction <add>, %190, %cst_64 [1] : vector<32x128xf32> to vector<32xf32>
    %196 = vector.shape_cast %195 : vector<32xf32> to vector<32x1xf32>
    %cst_65 = arith.constant 1.280000e+02 : f32
    %197 = vector.broadcast %cst_65 : f32 to vector<32x1xf32>
    %198 = arith.divf %196, %197 : vector<32x1xf32>
    %199 = vector.broadcast %198 : vector<32x1xf32> to vector<32x128xf32>
    %200 = arith.subf %190, %199 : vector<32x128xf32>
    %201 = arith.mulf %200, %200 : vector<32x128xf32>
    %cst_66 = arith.constant dense<0.000000e+00> : vector<32xf32>
    %202 = vector.multi_reduction <add>, %201, %cst_66 [1] : vector<32x128xf32> to vector<32xf32>
    %203 = vector.shape_cast %202 : vector<32xf32> to vector<32x1xf32>
    %cst_67 = arith.constant 1.280000e+02 : f32
    %204 = vector.broadcast %cst_67 : f32 to vector<32x1xf32>
    %205 = arith.divf %203, %204 : vector<32x1xf32>
    %206 = vector.broadcast %198 : vector<32x1xf32> to vector<32x128xf32>
    %207 = arith.subf %190, %206 : vector<32x128xf32>
    %cst_68 = arith.constant 9.99999974E-6 : f32
    %208 = vector.broadcast %cst_68 : f32 to vector<32x1xf32>
    %209 = arith.addf %205, %208 : vector<32x1xf32>
    %210 = math.rsqrt %209 : vector<32x1xf32>
    %211 = vector.broadcast %210 : vector<32x1xf32> to vector<32x128xf32>
    %212 = arith.mulf %207, %211 : vector<32x128xf32>
    %213 = vector.broadcast %192 : vector<1x128xf32> to vector<32x128xf32>
    %214 = arith.mulf %212, %213 : vector<32x128xf32>
    %215 = vector.broadcast %194 : vector<1x128xf32> to vector<32x128xf32>
    %216 = arith.addf %214, %215 : vector<32x128xf32>
    %217 = arith.truncf %216 : vector<32x128xf32> to vector<32x128xbf16>
    %c0_69 = arith.constant 0 : index
    %c0_70 = arith.constant 0 : index
    %c0_71 = arith.constant 0 : index
    %218 = vector.load %arg10[%c0_69, %c0_70, %c0_71] : memref<1x128x256xbf16, #tpu.memory_space<vmem>>, vector<1x128x256xbf16>
    %219 = vector.shape_cast %218 : vector<1x128x256xbf16> to vector<128x256xbf16>
    %cst_72 = arith.constant dense<0.000000e+00> : vector<32x256xf32>
    %220 = tpu.matmul %217, %219, %cst_72 {dimension_numbers = #tpu.dot_dimension_numbers<[1], [0], [0], [1], [0, 0, 1, 1], [], []>} : vector<32x128xbf16>, vector<128x256xbf16>, vector<32x256xf32> -> vector<32x256xf32>
    %c0_73 = arith.constant 0 : index
    %c0_74 = arith.constant 0 : index
    %c0_75 = arith.constant 0 : index
    %221 = vector.load %arg11[%c0_73, %c0_74, %c0_75] : memref<1x1x256xf32, #tpu.memory_space<vmem>>, vector<1x1x256xf32>
    %222 = vector.shape_cast %221 : vector<1x1x256xf32> to vector<1x256xf32>
    %223 = vector.broadcast %222 : vector<1x256xf32> to vector<32x256xf32>
    %224 = arith.addf %220, %223 : vector<32x256xf32>
    %cst_76 = arith.constant 0.000000e+00 : f32
    %225 = vector.broadcast %cst_76 : f32 to vector<32x256xf32>
    %226 = arith.maximumf %224, %225 : vector<32x256xf32>
    %227 = arith.truncf %226 : vector<32x256xf32> to vector<32x256xbf16>
    %c0_77 = arith.constant 0 : index
    %c0_78 = arith.constant 0 : index
    %c0_79 = arith.constant 0 : index
    %228 = vector.load %arg12[%c0_77, %c0_78, %c0_79] : memref<1x256x128xbf16, #tpu.memory_space<vmem>>, vector<1x256x128xbf16>
    %229 = vector.shape_cast %228 : vector<1x256x128xbf16> to vector<256x128xbf16>
    %cst_80 = arith.constant dense<0.000000e+00> : vector<32x128xf32>
    %230 = tpu.matmul %227, %229, %cst_80 {dimension_numbers = #tpu.dot_dimension_numbers<[1], [0], [0], [1], [0, 0, 1, 1], [], []>} : vector<32x256xbf16>, vector<256x128xbf16>, vector<32x128xf32> -> vector<32x128xf32>
    %c0_81 = arith.constant 0 : index
    %c0_82 = arith.constant 0 : index
    %c0_83 = arith.constant 0 : index
    %231 = vector.load %arg13[%c0_81, %c0_82, %c0_83] : memref<1x1x128xf32, #tpu.memory_space<vmem>>, vector<1x1x128xf32>
    %232 = vector.shape_cast %231 : vector<1x1x128xf32> to vector<1x128xf32>
    %233 = vector.broadcast %232 : vector<1x128xf32> to vector<32x128xf32>
    %234 = arith.addf %230, %233 : vector<32x128xf32>
    %235 = arith.addf %216, %234 : vector<32x128xf32>
    %c0_84 = arith.constant 0 : index
    %c0_85 = arith.constant 0 : index
    %c0_86 = arith.constant 0 : index
    %236 = vector.load %arg14[%c0_84, %c0_85, %c0_86] : memref<1x1x128xf32, #tpu.memory_space<vmem>>, vector<1x1x128xf32>
    %237 = vector.shape_cast %236 : vector<1x1x128xf32> to vector<1x128xf32>
    %c0_87 = arith.constant 0 : index
    %c0_88 = arith.constant 0 : index
    %c0_89 = arith.constant 0 : index
    %238 = vector.load %arg15[%c0_87, %c0_88, %c0_89] : memref<1x1x128xf32, #tpu.memory_space<vmem>>, vector<1x1x128xf32>
    %239 = vector.shape_cast %238 : vector<1x1x128xf32> to vector<1x128xf32>
    %cst_90 = arith.constant dense<0.000000e+00> : vector<32xf32>
    %240 = vector.multi_reduction <add>, %235, %cst_90 [1] : vector<32x128xf32> to vector<32xf32>
    %241 = vector.shape_cast %240 : vector<32xf32> to vector<32x1xf32>
    %cst_91 = arith.constant 1.280000e+02 : f32
    %242 = vector.broadcast %cst_91 : f32 to vector<32x1xf32>
    %243 = arith.divf %241, %242 : vector<32x1xf32>
    %244 = vector.broadcast %243 : vector<32x1xf32> to vector<32x128xf32>
    %245 = arith.subf %235, %244 : vector<32x128xf32>
    %246 = arith.mulf %245, %245 : vector<32x128xf32>
    %cst_92 = arith.constant dense<0.000000e+00> : vector<32xf32>
    %247 = vector.multi_reduction <add>, %246, %cst_92 [1] : vector<32x128xf32> to vector<32xf32>
    %248 = vector.shape_cast %247 : vector<32xf32> to vector<32x1xf32>
    %cst_93 = arith.constant 1.280000e+02 : f32
    %249 = vector.broadcast %cst_93 : f32 to vector<32x1xf32>
    %250 = arith.divf %248, %249 : vector<32x1xf32>
    %251 = vector.broadcast %243 : vector<32x1xf32> to vector<32x128xf32>
    %252 = arith.subf %235, %251 : vector<32x128xf32>
    %cst_94 = arith.constant 9.99999974E-6 : f32
    %253 = vector.broadcast %cst_94 : f32 to vector<32x1xf32>
    %254 = arith.addf %250, %253 : vector<32x1xf32>
    %255 = math.rsqrt %254 : vector<32x1xf32>
    %256 = vector.broadcast %255 : vector<32x1xf32> to vector<32x128xf32>
    %257 = arith.mulf %252, %256 : vector<32x128xf32>
    %258 = vector.broadcast %237 : vector<1x128xf32> to vector<32x128xf32>
    %259 = arith.mulf %257, %258 : vector<32x128xf32>
    %260 = vector.broadcast %239 : vector<1x128xf32> to vector<32x128xf32>
    %261 = arith.addf %259, %260 : vector<32x128xf32>
    %c0_95 = arith.constant 0 : index
    %c0_96 = arith.constant 0 : index
    %262 = vector.load %arg19[%c0_95, %c0_96] : memref<32x128xf32, #tpu.memory_space<vmem>>, vector<32x128xf32>
    tpu.vector_store %arg19[%c0_95, %c0_96], %261 {strides = array<i32>} : memref<32x128xf32, #tpu.memory_space<vmem>>, vector<32x128xf32>,
    %c1_i32 = arith.constant 1 : i32
    %263 = arith.cmpi eq, %arg1, %c1_i32 : i32
    %264 = arith.extui %263 : i1 to i32
    %c0_i32_97 = arith.constant 0 : i32
    %265 = arith.cmpi ne, %264, %c0_i32_97 : i32
    scf.if %265 {
      %c0_98 = arith.constant 0 : index
      %c0_99 = arith.constant 0 : index
      %266 = vector.load %arg16[%c0_98, %c0_99] : memref<1x128xf32, #tpu.memory_space<vmem>>, vector<1x128xf32>
      %c0_100 = arith.constant 0 : index
      %c0_101 = arith.constant 0 : index
      %267 = vector.load %arg17[%c0_100, %c0_101] : memref<1x128xf32, #tpu.memory_space<vmem>>, vector<1x128xf32>
      %cst_102 = arith.constant dense<0.000000e+00> : vector<32xf32>
      %268 = vector.multi_reduction <add>, %261, %cst_102 [1] : vector<32x128xf32> to vector<32xf32>
      %269 = vector.shape_cast %268 : vector<32xf32> to vector<32x1xf32>
      %cst_103 = arith.constant 1.280000e+02 : f32
      %270 = vector.broadcast %cst_103 : f32 to vector<32x1xf32>
      %271 = arith.divf %269, %270 : vector<32x1xf32>
      %272 = vector.broadcast %271 : vector<32x1xf32> to vector<32x128xf32>
      %273 = arith.subf %261, %272 : vector<32x128xf32>
      %274 = arith.mulf %273, %273 : vector<32x128xf32>
      %cst_104 = arith.constant dense<0.000000e+00> : vector<32xf32>
      %275 = vector.multi_reduction <add>, %274, %cst_104 [1] : vector<32x128xf32> to vector<32xf32>
      %276 = vector.shape_cast %275 : vector<32xf32> to vector<32x1xf32>
      %cst_105 = arith.constant 1.280000e+02 : f32
      %277 = vector.broadcast %cst_105 : f32 to vector<32x1xf32>
      %278 = arith.divf %276, %277 : vector<32x1xf32>
      %279 = vector.broadcast %271 : vector<32x1xf32> to vector<32x128xf32>
      %280 = arith.subf %261, %279 : vector<32x128xf32>
      %cst_106 = arith.constant 9.99999974E-6 : f32
      %281 = vector.broadcast %cst_106 : f32 to vector<32x1xf32>
      %282 = arith.addf %278, %281 : vector<32x1xf32>
      %283 = math.rsqrt %282 : vector<32x1xf32>
      %284 = vector.broadcast %283 : vector<32x1xf32> to vector<32x128xf32>
      %285 = arith.mulf %280, %284 : vector<32x128xf32>
      %286 = vector.broadcast %266 : vector<1x128xf32> to vector<32x128xf32>
      %287 = arith.mulf %285, %286 : vector<32x128xf32>
      %288 = vector.broadcast %267 : vector<1x128xf32> to vector<32x128xf32>
      %289 = arith.addf %287, %288 : vector<32x128xf32>
      %290 = vector.shape_cast %289 : vector<32x128xf32> to vector<2x16x128xf32>
      %291 = arith.truncf %290 : vector<2x16x128xf32> to vector<2x16x128xbf16>
      %c0_107 = arith.constant 0 : index
      %c0_108 = arith.constant 0 : index
      %c0_109 = arith.constant 0 : index
      %292 = vector.load %arg18[%c0_107, %c0_108, %c0_109] : memref<2x16x128xbf16, #tpu.memory_space<vmem>>, vector<2x16x128xbf16>
      tpu.vector_store %arg18[%c0_107, %c0_108, %c0_109], %291 {strides = array<i32>} : memref<2x16x128xbf16, #tpu.memory_space<vmem>>, vector<2x16x128xbf16>,
    } else {
    }
    return
  }
  func.func @transform_0(%arg0: i32, %arg1: i32) -> (i32, i32, i32) {
    %c0_i32 = arith.constant 0 : i32
    %c0_i32_0 = arith.constant 0 : i32
    %c0_i32_1 = arith.constant 0 : i32
    return %arg0, %c0_i32, %c0_i32_0 : i32, i32, i32
  }
  func.func @transform_1(%arg0: i32, %arg1: i32) -> (i32, i32, i32) {
    %c0_i32 = arith.constant 0 : i32
    %c0_i32_0 = arith.constant 0 : i32
    %c0_i32_1 = arith.constant 0 : i32
    return %arg0, %c0_i32, %c0_i32_0 : i32, i32, i32
  }
  func.func @transform_2(%arg0: i32, %arg1: i32) -> (i32, i32, i32) {
    %c0_i32 = arith.constant 0 : i32
    %c0_i32_0 = arith.constant 0 : i32
    %c0_i32_1 = arith.constant 0 : i32
    return %arg1, %c0_i32, %c0_i32_0 : i32, i32, i32
  }
  func.func @transform_3(%arg0: i32, %arg1: i32) -> (i32, i32, i32) {
    %c0_i32 = arith.constant 0 : i32
    %c0_i32_0 = arith.constant 0 : i32
    %c0_i32_1 = arith.constant 0 : i32
    return %arg1, %c0_i32, %c0_i32_0 : i32, i32, i32
  }
  func.func @transform_4(%arg0: i32, %arg1: i32) -> (i32, i32, i32) {
    %c0_i32 = arith.constant 0 : i32
    %c0_i32_0 = arith.constant 0 : i32
    %c0_i32_1 = arith.constant 0 : i32
    return %arg1, %c0_i32, %c0_i32_0 : i32, i32, i32
  }
  func.func @transform_5(%arg0: i32, %arg1: i32) -> (i32, i32, i32) {
    %c0_i32 = arith.constant 0 : i32
    %c0_i32_0 = arith.constant 0 : i32
    %c0_i32_1 = arith.constant 0 : i32
    return %arg1, %c0_i32, %c0_i32_0 : i32, i32, i32
  }
  func.func @transform_6(%arg0: i32, %arg1: i32) -> (i32, i32, i32) {
    %c0_i32 = arith.constant 0 : i32
    %c0_i32_0 = arith.constant 0 : i32
    %c0_i32_1 = arith.constant 0 : i32
    return %arg1, %c0_i32, %c0_i32_0 : i32, i32, i32
  }
  func.func @transform_7(%arg0: i32, %arg1: i32) -> (i32, i32, i32) {
    %c0_i32 = arith.constant 0 : i32
    %c0_i32_0 = arith.constant 0 : i32
    %c0_i32_1 = arith.constant 0 : i32
    return %arg1, %c0_i32, %c0_i32_0 : i32, i32, i32
  }
  func.func @transform_8(%arg0: i32, %arg1: i32) -> (i32, i32, i32) {
    %c0_i32 = arith.constant 0 : i32
    %c0_i32_0 = arith.constant 0 : i32
    %c0_i32_1 = arith.constant 0 : i32
    return %arg1, %c0_i32, %c0_i32_0 : i32, i32, i32
  }
  func.func @transform_9(%arg0: i32, %arg1: i32) -> (i32, i32, i32) {
    %c0_i32 = arith.constant 0 : i32
    %c0_i32_0 = arith.constant 0 : i32
    %c0_i32_1 = arith.constant 0 : i32
    return %arg1, %c0_i32, %c0_i32_0 : i32, i32, i32
  }
  func.func @transform_10(%arg0: i32, %arg1: i32) -> (i32, i32, i32) {
    %c0_i32 = arith.constant 0 : i32
    %c0_i32_0 = arith.constant 0 : i32
    %c0_i32_1 = arith.constant 0 : i32
    return %arg1, %c0_i32, %c0_i32_0 : i32, i32, i32
  }
  func.func @transform_11(%arg0: i32, %arg1: i32) -> (i32, i32, i32) {
    %c0_i32 = arith.constant 0 : i32
    %c0_i32_0 = arith.constant 0 : i32
    %c0_i32_1 = arith.constant 0 : i32
    return %arg1, %c0_i32, %c0_i32_0 : i32, i32, i32
  }
  func.func @transform_12(%arg0: i32, %arg1: i32) -> (i32, i32, i32) {
    %c0_i32 = arith.constant 0 : i32
    %c0_i32_0 = arith.constant 0 : i32
    %c0_i32_1 = arith.constant 0 : i32
    return %arg1, %c0_i32, %c0_i32_0 : i32, i32, i32
  }
  func.func @transform_13(%arg0: i32, %arg1: i32) -> (i32, i32, i32) {
    %c0_i32 = arith.constant 0 : i32
    %c0_i32_0 = arith.constant 0 : i32
    %c0_i32_1 = arith.constant 0 : i32
    return %arg1, %c0_i32, %c0_i32_0 : i32, i32, i32
  }
  func.func @transform_14(%arg0: i32, %arg1: i32) -> (i32, i32) {
    %c0_i32 = arith.constant 0 : i32
    %c0_i32_0 = arith.constant 0 : i32
    %c0_i32_1 = arith.constant 0 : i32
    return %c0_i32, %c0_i32_0 : i32, i32
  }
  func.func @transform_15(%arg0: i32, %arg1: i32) -> (i32, i32) {
    %c0_i32 = arith.constant 0 : i32
    %c0_i32_0 = arith.constant 0 : i32
    %c0_i32_1 = arith.constant 0 : i32
    return %c0_i32, %c0_i32_0 : i32, i32
  }
  func.func @transform_16(%arg0: i32, %arg1: i32) -> (i32, i32, i32) {
    %c0_i32 = arith.constant 0 : i32
    %c0_i32_0 = arith.constant 0 : i32
    %c0_i32_1 = arith.constant 0 : i32
    return %arg0, %c0_i32, %c0_i32_0 : i32, i32, i32
  }
}

</mosaic_0001>

<bundles_post_ra>
// kernel: tpu_custom_call.1
= control target key start
LH: loop header
LB: loop body
LE: loop exit
PB: predicated region body
PF: predicated region fallthrough
CT: control target
= control target key end

     0   :  { %s5883_s0 = inlined_call_operand.hbm [shape: f32[2,16,128], index: 0, kind: input, shape index: {}]   ;;  %s5884_s1 = inlined_call_operand.hbm [shape: f32[2,1,16], index: 1, kind: input, shape index: {}]   ;;  %s5885_s2 = inlined_call_operand.hbm [shape: bf16[2,128,384], index: 2, kind: input, shape index: {}]   ;;  %s5886_s3 = inlined_call_operand.hbm [shape: f32[2,1,384], index: 3, kind: input, shape index: {}]   ;;  %s5887_s4 = inlined_call_operand.hbm [shape: bf16[2,128,128], index: 4, kind: input, shape index: {}]   ;;  %s5888_s5 = inlined_call_operand.hbm [shape: f32[2,1,128], index: 5, kind: input, shape index: {}]   ;;  %s5889_s6 = inlined_call_operand.hbm [shape: f32[2,1,128], index: 6, kind: input, shape index: {}]   ;;  %s5890_s7 = inlined_call_operand.hbm [shape: f32[2,1,128], index: 7, kind: input, shape index: {}]   ;;  %s5891_s8 = inlined_call_operand.hbm [shape: bf16[2,128,256], index: 8, kind: input, shape index: {}]   ;;  %s5892_s9 = inlined_call_operand.hbm [shape: f32[2,1,256], index: 9, kind: input, shape index: {}]   ;;  %s5893_s10 = inlined_call_operand.hbm [shape: bf16[2,256,128], index: 10, kind: input, shape index: {}]   ;;  %s5894_s11 = inlined_call_operand.hbm [shape: f32[2,1,128], index: 11, kind: input, shape index: {}]   ;;  %s5895_s12 = inlined_call_operand.hbm [shape: f32[2,1,128], index: 12, kind: input, shape index: {}]   ;;  %s5896_s13 = inlined_call_operand.hbm [shape: f32[2,1,128], index: 13, kind: input, shape index: {}]   ;;  %s5897_s14 = inlined_call_operand.hbm [shape: f32[1,128], index: 14, kind: input, shape index: {}]   ;;  %s5898_s15 = inlined_call_operand.hbm [shape: f32[1,128], index: 15, kind: input, shape index: {}]   ;;  %s5899_s16 = inlined_call_operand.hbm [shape: bf16[2,16,128], index: 16, kind: output, shape index: {}]  }
   0x1   :  { %5940 = sst [smem:[#allocation41_spill]] %s5883_s0 }
   0x2   :  { %5941 = sst [smem:[#allocation42_spill]] %s5884_s1 }
   0x3   :  { %5942 = sst [smem:[#allocation43_spill]] %s5885_s2 }
   0x4   :  { %5943 = sst [smem:[#allocation44_spill]] %s5886_s3 }
   0x5   :  { %5944 = sst [smem:[#allocation45_spill]] %s5887_s4 }
   0x6   :  { %5945 = sst [smem:[#allocation46_spill]] %s5895_s12 }
   0x7   :  { %5946 = sst [smem:[#allocation47_spill]] %s5896_s13 }
   0x8   :  { %5947 = sst [smem:[#allocation48_spill]] %s5897_s14 }
   0x9   :  { %5948 = sst [smem:[#allocation49_spill]] %s5898_s15 }
   0xa   :  { %5949 = sst [smem:[#allocation50_spill]] %s5899_s16 }
   0xb   :  { %21 = vsyncpa [#allocation5], 0 }
   0xc   :  { %22 = vsyncpa [#allocation8], 0 }
   0xd   :  { %23 = vsyncpa [#allocation23], 0 }
   0xe   :  { %24 = vsyncpa [#allocation6], 0  ;;  %s4959_s21 = smov 0   ;;  %s4961_s22 = smov 0  }
   0xf   :  { %s4963_s23 = smov 0   ;;  %s4965_s24 = smov 0  }
  0x10   :  { %s4967_s25 = smov 0   ;;  %s4969_s26 = smov 0  }
  0x11 LB: > { %5950 = sst [smem:[#allocation31_spill]] %s4823_s22  ;;  %s4988_s27 = sadd.s32 4294967295, %s4839_s26   ;;  %s4839_s26 = sphi %s4969_s26, %s30_s26   ;;  %s4835_s25 = sphi %s4967_s25, %s6023_s25   ;;  %s4831_s24 = sphi %s4965_s24, %s6022_s24   ;;  %s4827_s23 = sphi %s4963_s23, %s6020_s23   ;;  %s4823_s22 = sphi %s4961_s22, %s6019_s22   ;;  %s4819_s21 = sphi %s4959_s21, %s6018_s21  }
  0x12   : > { %5951 = sst [smem:[#allocation32_spill]] %s4827_s23  ;;  %s39_s28 = sadd.s32 1, %s4835_s25 }
  0x13   : > { %5952 = sst [smem:[#allocation33_spill]] %s4831_s24  ;;  %p40_p0 = scmp.ge.s32.totalorder %s39_s28, 2 }
  0x14   : > { %5953 = sst [smem:[#allocation34_spill]] %s4839_s26  ;;  %s101_s29 = sadd.s32 1, %s4827_s23 }
  0x15   : > { %5954 = sst [smem:[#allocation35_spill]] %s4988_s27  ;;  %p108_p1 = scmp.ne.s32.totalorder %s4827_s23, %s4823_s22 }
  0x16   : > { %p109_p2 = scmp.eq.s32.totalorder %s4839_s26, 0  ;;  %s6025_s28 = smov (%p40_p0, %s39_s28), 0 }
  0x17   : > { %5955 = sst [smem:[#allocation36_spill]] %s6025_s28  ;;  %p114_p4 = scmp.ne.s32.totalorder %s4823_s22, %s4819_s21 }
  0x18   : > { %p4997_p3 = por %p109_p2, %p108_p1  ;;  %s98_s0 = ssub.s32 %s4835_s25, %s6025_s28 }
  0x19   : > { %p5912_p5 = scmp.eq.s32.totalorder %s4988_s27, 0  ;;  %p99_p6 = scmp.eq.s32.totalorder %s98_s0, 0 }
  0x1a   : > { %s5956_s30 = scalar_select %p4997_p3, 1, 0 }
  0x1b   : > { %p3511_p7 = scmp.ge.s32.totalorder %s4839_s26, 1  ;;  %p5008_p8 = por %p5912_p5, %p114_p4 }
  0x1c   : > { %p479_p9 = scmp.lt.s32.totalorder %s4839_s26, 3  ;;  %s4841_s20 = smov [#allocation4]  }
  0x1d   : > { %s5957_s17 = scalar_select %p5008_p8, 1, 0 }
  0x1e   : > { %s5014_s18 = scalar_select %p99_p6, %s4827_s23, %s101_s29  }
  0x1f   : > { %5958 = sst [smem:[#allocation37_spill]] %s5957_s17  ;;  %p5016_p10 = pnand %p3511_p7, %p479_p9 }
  0x20   : > { %5959 = sst [smem:[#allocation38_spill]] %s5014_s18  ;;  %s495_s21 = sshll.u32 %s4841_s20, 4  ;;  %s496_s21 = int_to_ptr.vmem [resolvable:$true] %s495_s21 }
  0x21   : > { %s5960_s19 = scalar_select %p5016_p10, 1, 0 }
  0x22   : > { %p3969_p11 = pneg %p5016_p10  ;;  %s5030_s28 = sand.u32 1, %s4827_s23  }
  0x23   : > { %5961 = sst [smem:[#allocation39_spill]] %s5960_s19  ;;  %s547_s29 = sand.u32 1, %s4839_s26  }
  0x24   : > { %p5024_p12 = pnand %p3969_p11, %p5912_p5  ;;  %s5964_s24 = sld [smem:[#allocation41_spill]] }
  0x26   : > { %s5962_s0 = scalar_select %p5024_p12, 1, 0 }
  0x27   : > { %p5041_p1 = pneg %p5024_p12 }
  0x28   : > { %5963 = sst [smem:[#allocation40_spill]] %s5962_s0 }
  0x29   : > { %s5966_s20 = scalar_select %p5041_p1, 1, 0 }
  0x2a   : > { %s5965_s17 = smov %s5964_s24  ;;  %s4271_s22 = scalar_lea.hbm %s5964_s24, 512 }
  0x2b   : > { %p4272_p0 = scmp.ne.s32.totalorder %s5965_s17, %s4271_s22  ;;  %p4278_p6 = scmp.lt.u32.totalorder %s4271_s22, %s5965_s17 }
  0x2d   : > { %p4274_p2 = pnand %p5041_p1, %p4272_p0 }
  0x2f   : > { %p4275_p4 = pneg %p4274_p2 }
  0x31   : > { %p4280_p7 = pnand %p4278_p6, %p4275_p4 }
  0x33   : > { %4283 = shalt.err (!%p4280_p7)
}
  0x34   : > { %s4284_s16 = scalar_lea.vmem %s496_s21, 512  ;;  %p4292_p13 = scmp.lt.s32.totalorder %s496_s21, %s496_s21 }
  0x35   : > { %p4285_p9 = scmp.ne.s32.totalorder %s496_s21, %s4284_s16  ;;  %p4293_p8 = scmp.lt.s32.totalorder %s4284_s16, %s4284_s16 }
  0x37   : > { %p4287_p11 = pnand %p4285_p9, %p5041_p1  ;;  %p4294_p10 = por %p4293_p8, %p4292_p13 }
  0x39   : > { %p4288_p5 = pneg %p4287_p11 }
  0x3b   : > { %p4295_p3 = pnand %p4294_p10, %p4288_p5 }
  0x3d   : > { %4298 = shalt.err (!%p4295_p3)
}
  0x3e   : > { %s5917_s13 = smov 128   ;;  %s5918_s22 = smov 8  }
  0x3f   : > { %3972 = dma.hbm_to_vmem [thread:$0]  (!%p5024_p12), %s5965_s17, 512, %s496_s21, [#allocation5], %s5917_s13, %s5917_s13, %s5918_s22  }
  0x40   : > { %p5967_p0 = scmp.ne.s32.totalorder %s5956_s30, 0  ;;  %p5968_p8 = scmp.lt.s32.totalorder %s4839_s26, 2 }
  0x41   : > { %s3919_s18 = smul.u32 192, %s5030_s28  ;;  %s5970_s2 = sld [smem:[#allocation43_spill]] }
  0x42   : > { %p5064_p5 = pnand %p5968_p8, %p5967_p0  ;;  %s3920_s19 = smul.u32 3072, %s4835_s25 }
  0x43   : > { %s551_s23 = scalar_lea.vmem [#allocation9], %s3919_s18  ;;  %s3921_s30 = smul.u32 3, %s5030_s28 }
  0x44   : > { %s5969_s27 = scalar_select %p5064_p5, 1, 0 }
  0x45   : > { %s558_s21 = sshll.u32 %s551_s23, 4  ;;  %s5078_s24 = scalar_lea.sflag [#allocation5], %s547_s29  ;;  %s5075_s21 = int_to_ptr.vmem [resolvable:$true] %s558_s21 }
  0x46   : > { %p5084_p10 = pneg %p5064_p5 }
  0x47   : > { %s5073_s14 = scalar_lea.hbm %s5970_s2, %s3920_s19  ;;  %s4304_s18 = scalar_lea.hbm %s5970_s2, 6144 }
  0x48   : > { %s4299_s13 = scalar_lea.hbm %s5073_s14, 3072  ;;  %p4305_p4 = scmp.lt.u32.totalorder %s5073_s14, %s5970_s2 }
  0x49   : > { %p4300_p3 = scmp.ne.s32.totalorder %s5073_s14, %s4299_s13  ;;  %p4306_p6 = scmp.lt.u32.totalorder %s4304_s18, %s4299_s13 }
  0x4a   : > { %s5971_s22 = scalar_select %p5084_p10, 1, 0 }
  0x4b   : > { %p4302_p13 = pnand %p5084_p10, %p4300_p3  ;;  %p4307_p7 = por %p4306_p6, %p4305_p4 }
  0x4c   : > { %p4308_p9 = scmp.lt.u32.totalorder %s4299_s13, %s5073_s14 }
  0x4d   : > { %p4303_p2 = pneg %p4302_p13 }
  0x4e   : > { %p4309_p11 = por %p4308_p9, %p4307_p7 }
  0x50   : > { %p4310_p0 = pnand %p4309_p11, %p4303_p2 }
  0x52   : > { %4313 = shalt.err (!%p4310_p0)
}
  0x53   : > { %s4314_s29 = scalar_lea.vmem %s5075_s21, 3072  ;;  %s4844_s15 = smov [#allocation9]  }
  0x54   : > { %p4315_p8 = scmp.ne.s32.totalorder %s5075_s21, %s4314_s29  ;;  %s4319_s19 = sshll.u32 %s4844_s15, 4  ;;  %s4320_s19 = int_to_ptr.vmem [resolvable:$false] %s4319_s19 }
  0x55   : > { %s4321_s16 = scalar_lea.vmem %s4320_s19, 6144  ;;  %p4322_p12 = scmp.lt.s32.totalorder %s5075_s21, %s4320_s19 }
  0x56   : > { %p4317_p3 = pnand %p4315_p8, %p5084_p10  ;;  %p4323_p1 = scmp.lt.s32.totalorder %s4321_s16, %s4314_s29 }
  0x58   : > { %p4318_p13 = pneg %p4317_p3  ;;  %p4324_p4 = por %p4323_p1, %p4322_p12 }
  0x5a   : > { %p4325_p6 = pnand %p4324_p4, %p4318_p13 }
  0x5c   : > { %4328 = shalt.err (!%p4325_p6)
}
  0x5d   : > { %s4845_s13 = smov 192   ;;  %s4846_s18 = smov 12  }
  0x5e   : > { %3985 = dma.hbm_to_vmem [thread:$0]  (!%p5064_p5), %s5073_s14, 3072, %s5075_s21, %s5078_s24, %s4845_s13, %s4845_s13, %s4846_s18  }
  0x5f   : > { %s3922_s23 = smul.u32 48, %s4835_s25  ;;  %s572_s15 = scalar_lea.vmem [#allocation10], %s3921_s30 }
  0x60   : > { %s580_s19 = sshll.u32 %s572_s15, 4  ;;  %s3519_s29 = sshll.u32 %s5030_s28, 6  ;;  %s581_s19 = int_to_ptr.vmem [resolvable:$true] %s580_s19 }
  0x61   : > { %s5972_s3 = sld [smem:[#allocation44_spill]] }
  0x67   : > { %s578_s17 = scalar_lea.hbm %s5972_s3, %s3922_s23  ;;  %s4334_s1 = scalar_lea.hbm %s5972_s3, 96 }
  0x68   : > { %s4329_s26 = scalar_lea.hbm %s578_s17, 48  ;;  %p4335_p7 = scmp.lt.u32.totalorder %s578_s17, %s5972_s3 }
  0x69   : > { %p4330_p12 = scmp.ne.s32.totalorder %s578_s17, %s4329_s26  ;;  %p4336_p9 = scmp.lt.u32.totalorder %s4334_s1, %s4329_s26 }
  0x6a   : > { %p4338_p0 = scmp.lt.u32.totalorder %s4329_s26, %s578_s17 }
  0x6b   : > { %p4332_p1 = pnand %p4330_p12, %p5084_p10  ;;  %p4337_p11 = por %p4336_p9, %p4335_p7 }
  0x6d   : > { %p4333_p2 = pneg %p4332_p1  ;;  %p4339_p8 = por %p4338_p0, %p4337_p11 }
  0x6f   : > { %p4340_p3 = pnand %p4339_p8, %p4333_p2 }
  0x71   : > { %4343 = shalt.err (!%p4340_p3)
}
  0x72   : > { %s4344_s2 = scalar_lea.vmem %s581_s19, 48  ;;  %s4847_s30 = smov [#allocation10]  }
  0x73   : > { %p4345_p13 = scmp.ne.s32.totalorder %s581_s19, %s4344_s2  ;;  %s4349_s13 = sshll.u32 %s4847_s30, 4  ;;  %s4350_s13 = int_to_ptr.vmem [resolvable:$false] %s4349_s13 }
  0x74   : > { %s4351_s12 = scalar_lea.vmem %s4350_s13, 96  ;;  %p4352_p12 = scmp.lt.s32.totalorder %s581_s19, %s4350_s13 }
  0x75   : > { %p4347_p4 = pnand %p4345_p13, %p5084_p10  ;;  %p4353_p1 = scmp.lt.s32.totalorder %s4351_s12, %s4344_s2 }
  0x77   : > { %p4348_p6 = pneg %p4347_p4  ;;  %p4354_p5 = por %p4353_p1, %p4352_p12 }
  0x79   : > { %p4355_p7 = pnand %p4354_p5, %p4348_p6 }
  0x7b   : > { %4358 = shalt.err (!%p4355_p7)
}
  0x7c   : > { %p5973_p9 = scmp.ne.s32.totalorder %s5969_s27, 0  ;;  %s3654_s1 = sshll.u32 %s4835_s25, 10 }
  0x7d   : > { %s5974_s4 = sld [smem:[#allocation45_spill]]  ;;  %s591_s23 = scalar_lea.vmem [#allocation11], %s3519_s29 }
  0x7e   : > { %3988 = dma.hbm_to_vmem [thread:$0]  (!%p5973_p9), %s578_s17, 48, %s581_s19, %s5078_s24  }
  0x7f   : > { %s598_s15 = sshll.u32 %s591_s23, 4  ;;  %s5136_s15 = int_to_ptr.vmem [resolvable:$true] %s598_s15 }
  0x83   : > { %s5132_s18 = scalar_lea.hbm %s5974_s4, %s3654_s1  ;;  %s4364_s14 = scalar_lea.hbm %s5974_s4, 2048 }
  0x84   : > { %s4359_s16 = scalar_lea.hbm %s5132_s18, 1024  ;;  %p4365_p0 = scmp.lt.u32.totalorder %s5132_s18, %s5974_s4 }
  0x85   : > { %p4360_p5 = scmp.ne.s32.totalorder %s5132_s18, %s4359_s16  ;;  %p4366_p8 = scmp.lt.u32.totalorder %s4364_s14, %s4359_s16 }
  0x86   : > { %p4368_p13 = scmp.lt.u32.totalorder %s4359_s16, %s5132_s18 }
  0x87   : > { %p4362_p2 = pnand %p4360_p5, %p5084_p10  ;;  %p4367_p3 = por %p4366_p8, %p4365_p0 }
  0x89   : > { %p4363_p11 = pneg %p4362_p2  ;;  %p4369_p4 = por %p4368_p13, %p4367_p3 }
  0x8b   : > { %p4370_p6 = pnand %p4369_p4, %p4363_p11 }
  0x8d   : > { %4373 = shalt.err (!%p4370_p6)
}
  0x8e   : > { %s4374_s29 = scalar_lea.vmem %s5136_s15, 1024  ;;  %s4848_s30 = smov [#allocation11]  }
  0x8f   : > { %p4375_p12 = scmp.ne.s32.totalorder %s5136_s15, %s4374_s29  ;;  %s4379_s13 = sshll.u32 %s4848_s30, 4  ;;  %s4380_s13 = int_to_ptr.vmem [resolvable:$false] %s4379_s13 }
  0x90   : > { %s4381_s12 = scalar_lea.vmem %s4380_s13, 2048  ;;  %p4382_p5 = scmp.lt.s32.totalorder %s5136_s15, %s4380_s13 }
  0x91   : > { %p4377_p1 = pnand %p4375_p12, %p5084_p10  ;;  %p4383_p2 = scmp.lt.s32.totalorder %s4381_s12, %s4374_s29 }
  0x93   : > { %p4378_p7 = pneg %p4377_p1  ;;  %p4384_p0 = por %p4383_p2, %p4382_p5 }
  0x95   : > { %p4385_p8 = pnand %p4384_p0, %p4378_p7 }
  0x97   : > { %4388 = shalt.err (!%p4385_p8)
}
  0x98   : > { %s5932_s1 = smov 64   ;;  %s5933_s26 = smov 4  }
  0x99   : > { %3991 = dma.hbm_to_vmem [thread:$0]  (!%p5973_p9), %s5132_s18, 1024, %s5136_s15, %s5078_s24, %s5932_s1, %s5932_s1, %s5933_s26  }
  0x9a   : > { %s5164_s0 = sshll.u32 %s4835_s25, 4  ;;  %s611_s23 = scalar_lea.vmem [#allocation12], %s5030_s28 }
  0x9b   : > { %s618_s16 = sshll.u32 %s611_s23, 4  ;;  %s616_s14 = scalar_lea.hbm %s5888_s5, %s5164_s0  ;;  %s619_s16 = int_to_ptr.vmem [resolvable:$true] %s618_s16 }
  0x9c   : > { %s4389_s21 = scalar_lea.hbm %s616_s14, 16  ;;  %s4394_s30 = scalar_lea.hbm %s5888_s5, 32 }
  0x9d   : > { %p4390_p11 = scmp.ne.s32.totalorder %s616_s14, %s4389_s21  ;;  %p4395_p4 = scmp.lt.u32.totalorder %s616_s14, %s5888_s5 }
  0x9e   : > { %p4396_p6 = scmp.lt.u32.totalorder %s4394_s30, %s4389_s21  ;;  %p4398_p1 = scmp.lt.u32.totalorder %s4389_s21, %s616_s14 }
  0x9f   : > { %p4392_p3 = pnand %p4390_p11, %p5084_p10 }
  0xa0   : > { %p4397_p12 = por %p4396_p6, %p4395_p4 }
  0xa1   : > { %p4393_p13 = pneg %p4392_p3 }
  0xa2   : > { %p4399_p7 = por %p4398_p1, %p4397_p12 }
  0xa4   : > { %p4400_p5 = pnand %p4399_p7, %p4393_p13 }
  0xa6   : > { %4403 = shalt.err (!%p4400_p5)
}
  0xa7   : > { %s4404_s13 = scalar_lea.vmem %s619_s16, 16  ;;  %s4851_s12 = smov [#allocation12]  }
  0xa8   : > { %p4405_p2 = scmp.ne.s32.totalorder %s619_s16, %s4404_s13  ;;  %s4409_s23 = sshll.u32 %s4851_s12, 4  ;;  %s4410_s23 = int_to_ptr.vmem [resolvable:$false] %s4409_s23 }
  0xa9   : > { %s4411_s17 = scalar_lea.vmem %s4410_s23, 32  ;;  %p4412_p11 = scmp.lt.s32.totalorder %s619_s16, %s4410_s23 }
  0xaa   : > { %p4407_p0 = pnand %p4405_p2, %p5084_p10  ;;  %p4413_p3 = scmp.lt.s32.totalorder %s4411_s17, %s4404_s13 }
  0xac   : > { %p4408_p8 = pneg %p4407_p0  ;;  %p4414_p9 = por %p4413_p3, %p4412_p11 }
  0xae   : > { %p4415_p4 = pnand %p4414_p9, %p4408_p8 }
  0xb0   : > { %4418 = shalt.err (!%p4415_p4)
}
  0xb1   : > { %p5975_p6 = scmp.ne.s32.totalorder %s5969_s27, 0  ;;  %s5188_s2 = scalar_lea.hbm %s5889_s6, %s5164_s0 }
  0xb2   : > { %s628_s29 = scalar_lea.vmem [#allocation13], %s5030_s28  ;;  %s5195_s13 = scalar_lea.hbm %s5890_s7, %s5164_s0 }
  0xb3   : > { %3994 = dma.hbm_to_vmem [thread:$0]  (!%p5975_p6), %s616_s14, 16, %s619_s16, %s5078_s24  }
  0xb4   : > { %s635_s30 = sshll.u32 %s628_s29, 4  ;;  %s4419_s12 = scalar_lea.hbm %s5188_s2, 16  ;;  %s636_s30 = int_to_ptr.vmem [resolvable:$true] %s635_s30 }
  0xb5   : > { %p4420_p9 = scmp.ne.s32.totalorder %s5188_s2, %s4419_s12  ;;  %s4424_s23 = scalar_lea.hbm %s5889_s6, 32 }
  0xb6   : > { %p4425_p1 = scmp.lt.u32.totalorder %s5188_s2, %s5889_s6  ;;  %p4426_p7 = scmp.lt.u32.totalorder %s4424_s23, %s4419_s12 }
  0xb7   : > { %p4422_p13 = pnand %p4420_p9, %p5084_p10  ;;  %p4428_p2 = scmp.lt.u32.totalorder %s4419_s12, %s5188_s2 }
  0xb8   : > { %p4427_p5 = por %p4426_p7, %p4425_p1 }
  0xb9   : > { %p4423_p12 = pneg %p4422_p13 }
  0xba   : > { %p4429_p0 = por %p4428_p2, %p4427_p5 }
  0xbc   : > { %p4430_p8 = pnand %p4429_p0, %p4423_p12 }
  0xbe   : > { %4433 = shalt.err (!%p4430_p8)
}
  0xbf   : > { %s4434_s21 = scalar_lea.vmem %s636_s30, 16  ;;  %s4852_s29 = smov [#allocation13]  }
  0xc0   : > { %p4435_p11 = scmp.ne.s32.totalorder %s636_s30, %s4434_s21  ;;  %s4439_s18 = sshll.u32 %s4852_s29, 4  ;;  %s4440_s18 = int_to_ptr.vmem [resolvable:$false] %s4439_s18 }
  0xc1   : > { %s4441_s15 = scalar_lea.vmem %s4440_s18, 32  ;;  %p4442_p9 = scmp.lt.s32.totalorder %s636_s30, %s4440_s18 }
  0xc2   : > { %p4437_p3 = pnand %p4435_p11, %p5084_p10  ;;  %p4443_p13 = scmp.lt.s32.totalorder %s4441_s15, %s4434_s21 }
  0xc4   : > { %p4438_p4 = pneg %p4437_p3  ;;  %p4444_p6 = por %p4443_p13, %p4442_p9 }
  0xc6   : > { %p4445_p1 = pnand %p4444_p6, %p4438_p4 }
  0xc8   : > { %4448 = shalt.err (!%p4445_p1)
}
  0xc9   : > { %p5976_p7 = scmp.ne.s32.totalorder %s5969_s27, 0  ;;  %s645_s12 = scalar_lea.vmem [#allocation14], %s5030_s28 }
  0xca   : > { %s652_s16 = sshll.u32 %s645_s12, 4  ;;  %s5934_s14 = sshll.u32 %s5030_s28, 7  ;;  %s653_s16 = int_to_ptr.vmem [resolvable:$true] %s652_s16 }
  0xcb   : > { %3997 = dma.hbm_to_vmem [thread:$0]  (!%p5976_p7), %s5188_s2, 16, %s636_s30, %s5078_s24  }
  0xcc   : > { %s4449_s23 = scalar_lea.hbm %s5195_s13, 16  ;;  %s4454_s21 = scalar_lea.hbm %s5890_s7, 32 }
  0xcd   : > { %p4450_p12 = scmp.ne.s32.totalorder %s5195_s13, %s4449_s23  ;;  %p4455_p2 = scmp.lt.u32.totalorder %s5195_s13, %s5890_s7 }
  0xce   : > { %p4456_p0 = scmp.lt.u32.totalorder %s4454_s21, %s4449_s23  ;;  %p4458_p11 = scmp.lt.u32.totalorder %s4449_s23, %s5195_s13 }
  0xcf   : > { %p4452_p6 = pnand %p4450_p12, %p5084_p10 }
  0xd0   : > { %p4457_p8 = por %p4456_p0, %p4455_p2 }
  0xd1   : > { %p4453_p5 = pneg %p4452_p6 }
  0xd2   : > { %p4459_p3 = por %p4458_p11, %p4457_p8 }
  0xd4   : > { %p4460_p4 = pnand %p4459_p3, %p4453_p5 }
  0xd6   : > { %4463 = shalt.err (!%p4460_p4)
}
  0xd7   : > { %s4464_s2 = scalar_lea.vmem %s653_s16, 16  ;;  %s4853_s30 = smov [#allocation14]  }
  0xd8   : > { %p4465_p9 = scmp.ne.s32.totalorder %s653_s16, %s4464_s2  ;;  %s4469_s15 = sshll.u32 %s4853_s30, 4  ;;  %s4470_s15 = int_to_ptr.vmem [resolvable:$false] %s4469_s15 }
  0xd9   : > { %s4471_s12 = scalar_lea.vmem %s4470_s15, 32  ;;  %p4472_p12 = scmp.lt.s32.totalorder %s653_s16, %s4470_s15 }
  0xda   : > { %p4467_p13 = pnand %p4465_p9, %p5084_p10  ;;  %p4473_p6 = scmp.lt.s32.totalorder %s4471_s12, %s4464_s2 }
  0xdc   : > { %p4468_p1 = pneg %p4467_p13  ;;  %p4474_p7 = por %p4473_p6, %p4472_p12 }
  0xde   : > { %p4475_p0 = pnand %p4474_p7, %p4468_p1 }
  0xe0   : > { %4478 = shalt.err (!%p4475_p0)
}
  0xe1   : > { %p5977_p2 = scmp.ne.s32.totalorder %s5969_s27, 0  ;;  %s3655_s23 = sshll.u32 %s4835_s25, 11 }
  0xe2   : > { %s663_s17 = scalar_lea.vmem [#allocation15], %s5934_s14  ;;  %s5243_s18 = scalar_lea.hbm %s5891_s8, %s3655_s23 }
  0xe3   : > { %4000 = dma.hbm_to_vmem [thread:$0]  (!%p5977_p2), %s5195_s13, 16, %s653_s16, %s5078_s24  }
  0xe4   : > { %s670_s19 = sshll.u32 %s663_s17, 4  ;;  %s4479_s2 = scalar_lea.hbm %s5243_s18, 2048  ;;  %s5245_s19 = int_to_ptr.vmem [resolvable:$true] %s670_s19 }
  0xe5   : > { %p4480_p7 = scmp.ne.s32.totalorder %s5243_s18, %s4479_s2  ;;  %s4484_s30 = scalar_lea.hbm %s5891_s8, 4096 }
  0xe6   : > { %p4485_p11 = scmp.lt.u32.totalorder %s5243_s18, %s5891_s8  ;;  %p4486_p3 = scmp.lt.u32.totalorder %s4484_s30, %s4479_s2 }
  0xe7   : > { %p4482_p5 = pnand %p4480_p7, %p5084_p10  ;;  %p4488_p9 = scmp.lt.u32.totalorder %s4479_s2, %s5243_s18 }
  0xe8   : > { %p4487_p4 = por %p4486_p3, %p4485_p11 }
  0xe9   : > { %p4483_p8 = pneg %p4482_p5 }
  0xea   : > { %p4489_p13 = por %p4488_p9, %p4487_p4 }
  0xec   : > { %p4490_p1 = pnand %p4489_p13, %p4483_p8 }
  0xee   : > { %4493 = shalt.err (!%p4490_p1)
}
  0xef   : > { %s4494_s17 = scalar_lea.vmem %s5245_s19, 2048  ;;  %s4854_s21 = smov [#allocation15]  }
  0xf0   : > { %p4495_p12 = scmp.ne.s32.totalorder %s5245_s19, %s4494_s17  ;;  %s4499_s29 = sshll.u32 %s4854_s21, 4  ;;  %s4500_s29 = int_to_ptr.vmem [resolvable:$false] %s4499_s29 }
  0xf1   : > { %s4501_s13 = scalar_lea.vmem %s4500_s29, 4096  ;;  %p4502_p7 = scmp.lt.s32.totalorder %s5245_s19, %s4500_s29 }
  0xf2   : > { %p4497_p6 = pnand %p4495_p12, %p5084_p10  ;;  %p4503_p5 = scmp.lt.s32.totalorder %s4501_s13, %s4494_s17 }
  0xf4   : > { %p4498_p0 = pneg %p4497_p6  ;;  %p4504_p11 = por %p4503_p5, %p4502_p7 }
  0xf6   : > { %p4505_p3 = pnand %p4504_p11, %p4498_p0 }
  0xf8   : > { %4508 = shalt.err (!%p4505_p3)
}
  0xf9   : > { %s5978_s2 = smov 8   ;;  %s5979_s16 = smov 128  }
  0xfa   : > { %4003 = dma.hbm_to_vmem [thread:$0]  (!%p5977_p2), %s5243_s18, 2048, %s5245_s19, %s5078_s24, %s5979_s16, %s5979_s16, %s5978_s2  }
  0xfb   : > { %s3528_s30 = sshll.u32 %s5030_s28, 1  ;;  %s3656_s15 = sshll.u32 %s4835_s25, 5 }
  0xfc   : > { %s5277_s21 = scalar_lea.hbm %s5892_s9, %s3656_s15  ;;  %s684_s29 = scalar_lea.vmem [#allocation16], %s3528_s30 }
  0xfd   : > { %s692_s13 = sshll.u32 %s684_s29, 4  ;;  %s5284_s14 = scalar_lea.hbm %s5893_s10, %s3655_s23  ;;  %s693_s13 = int_to_ptr.vmem [resolvable:$true] %s692_s13 }
  0xfe   : > { %s4509_s19 = scalar_lea.hbm %s5277_s21, 32  ;;  %s4514_s16 = scalar_lea.hbm %s5892_s9, 64 }
  0xff   : > { %p4510_p8 = scmp.ne.s32.totalorder %s5277_s21, %s4509_s19  ;;  %p4515_p13 = scmp.lt.u32.totalorder %s5277_s21, %s5892_s9 }
 0x100   : > { %p4516_p1 = scmp.lt.u32.totalorder %s4514_s16, %s4509_s19  ;;  %p4518_p6 = scmp.lt.u32.totalorder %s4509_s19, %s5277_s21 }
 0x101   : > { %p4512_p4 = pnand %p4510_p8, %p5084_p10 }
 0x102   : > { %p4517_p12 = por %p4516_p1, %p4515_p13 }
 0x103   : > { %p4513_p9 = pneg %p4512_p4 }
 0x104   : > { %p4519_p0 = por %p4518_p6, %p4517_p12 }
 0x106   : > { %p4520_p7 = pnand %p4519_p0, %p4513_p9 }
 0x108   : > { %4523 = shalt.err (!%p4520_p7)
}
 0x109   : > { %s4524_s1 = scalar_lea.vmem %s693_s13, 32  ;;  %s4855_s26 = smov [#allocation16]  }
 0x10a   : > { %p4525_p5 = scmp.ne.s32.totalorder %s693_s13, %s4524_s1  ;;  %s4529_s23 = sshll.u32 %s4855_s26, 4  ;;  %s4530_s23 = int_to_ptr.vmem [resolvable:$false] %s4529_s23 }
 0x10b   : > { %s4531_s30 = scalar_lea.vmem %s4530_s23, 64  ;;  %p4532_p8 = scmp.lt.s32.totalorder %s693_s13, %s4530_s23 }
 0x10c   : > { %p4527_p11 = pnand %p4525_p5, %p5084_p10  ;;  %p4533_p4 = scmp.lt.s32.totalorder %s4531_s30, %s4524_s1 }
 0x10e   : > { %p4528_p3 = pneg %p4527_p11  ;;  %p4534_p2 = por %p4533_p4, %p4532_p8 }
 0x110   : > { %p4535_p1 = pnand %p4534_p2, %p4528_p3 }
 0x112   : > { %4538 = shalt.err (!%p4535_p1)
}
 0x113   : > { %p5980_p13 = scmp.ne.s32.totalorder %s5969_s27, 0  ;;  %s5981_s17 = sshll.u32 %s5030_s28, 7 }
 0x114   : > { %s703_s29 = scalar_lea.vmem [#allocation17], %s5981_s17  ;;  %s5312_s16 = scalar_lea.hbm %s5894_s11, %s5164_s0 }
 0x115   : > { %4006 = dma.hbm_to_vmem [thread:$0]  (!%p5980_p13), %s5277_s21, 32, %s693_s13, %s5078_s24  }
 0x116   : > { %s710_s19 = sshll.u32 %s703_s29, 4  ;;  %s4539_s15 = scalar_lea.hbm %s5284_s14, 2048  ;;  %s5306_s19 = int_to_ptr.vmem [resolvable:$true] %s710_s19 }
 0x117   : > { %p4540_p2 = scmp.ne.s32.totalorder %s5284_s14, %s4539_s15  ;;  %s4544_s26 = scalar_lea.hbm %s5893_s10, 4096 }
 0x118   : > { %p4545_p6 = scmp.lt.u32.totalorder %s5284_s14, %s5893_s10  ;;  %p4546_p0 = scmp.lt.u32.totalorder %s4544_s26, %s4539_s15 }
 0x119   : > { %p4542_p9 = pnand %p4540_p2, %p5084_p10  ;;  %p4548_p5 = scmp.lt.u32.totalorder %s4539_s15, %s5284_s14 }
 0x11a   : > { %p4547_p7 = por %p4546_p0, %p4545_p6 }
 0x11b   : > { %p4543_p12 = pneg %p4542_p9 }
 0x11c   : > { %p4549_p11 = por %p4548_p5, %p4547_p7 }
 0x11e   : > { %p4550_p3 = pnand %p4549_p11, %p4543_p12 }
 0x120   : > { %4553 = shalt.err (!%p4550_p3)
}
 0x121   : > { %s4554_s23 = scalar_lea.vmem %s5306_s19, 2048  ;;  %s4856_s30 = smov [#allocation17]  }
 0x122   : > { %p4555_p8 = scmp.ne.s32.totalorder %s5306_s19, %s4554_s23  ;;  %s4559_s17 = sshll.u32 %s4856_s30, 4  ;;  %s4560_s17 = int_to_ptr.vmem [resolvable:$false] %s4559_s17 }
 0x123   : > { %s4561_s29 = scalar_lea.vmem %s4560_s17, 4096  ;;  %p4562_p2 = scmp.lt.s32.totalorder %s5306_s19, %s4560_s17 }
 0x124   : > { %p4557_p4 = pnand %p4555_p8, %p5084_p10  ;;  %p4563_p9 = scmp.lt.s32.totalorder %s4561_s29, %s4554_s23 }
 0x126   : > { %p4558_p1 = pneg %p4557_p4  ;;  %p4564_p6 = por %p4563_p9, %p4562_p2 }
 0x128   : > { %p4565_p0 = pnand %p4564_p6, %p4558_p1 }
 0x12a   : > { %4568 = shalt.err (!%p4565_p0)
}
 0x12b   : > { %s5982_s18 = smov 4   ;;  %s5983_s2 = smov 64  }
 0x12c   : > { %4009 = dma.hbm_to_vmem [thread:$0]  (!%p5980_p13), %s5284_s14, 2048, %s5306_s19, %s5078_s24, %s5983_s2, %s5983_s2, %s5982_s18  }
 0x12d   : > { %s723_s15 = scalar_lea.vmem [#allocation18], %s5030_s28  ;;  %s4857_s1 = smov [#allocation7]  }
 0x12e   : > { %s730_s12 = sshll.u32 %s723_s15, 4  ;;  %s511_s26 = sshll.u32 %s4857_s1, 4  ;;  %s5340_s12 = int_to_ptr.vmem [resolvable:$true] %s730_s12  ;;  %s512_s26 = int_to_ptr.vmem [resolvable:$true] %s511_s26 }
 0x12f   : > { %s4569_s21 = scalar_lea.hbm %s5312_s16, 16  ;;  %s4574_s30 = scalar_lea.hbm %s5894_s11, 32 }
 0x130   : > { %p4570_p12 = scmp.ne.s32.totalorder %s5312_s16, %s4569_s21  ;;  %p4575_p11 = scmp.lt.u32.totalorder %s5312_s16, %s5894_s11 }
 0x131   : > { %p4576_p3 = scmp.lt.u32.totalorder %s4574_s30, %s4569_s21  ;;  %p4578_p4 = scmp.lt.u32.totalorder %s4569_s21, %s5312_s16 }
 0x132   : > { %p4572_p7 = pnand %p4570_p12, %p5084_p10 }
 0x133   : > { %p4577_p8 = por %p4576_p3, %p4575_p11 }
 0x134   : > { %p4573_p5 = pneg %p4572_p7 }
 0x135   : > { %p4579_p1 = por %p4578_p4, %p4577_p8 }
 0x137   : > { %p4580_p2 = pnand %p4579_p1, %p4573_p5 }
 0x139   : > { %4583 = shalt.err (!%p4580_p2)
}
 0x13a   : > { %s4584_s14 = scalar_lea.vmem %s5340_s12, 16  ;;  %s4858_s19 = smov [#allocation18]  }
 0x13b   : > { %p4585_p9 = scmp.ne.s32.totalorder %s5340_s12, %s4584_s14  ;;  %s4589_s18 = sshll.u32 %s4858_s19, 4  ;;  %s4590_s18 = int_to_ptr.vmem [resolvable:$false] %s4589_s18 }
 0x13c   : > { %s4591_s2 = scalar_lea.vmem %s4590_s18, 32  ;;  %p4592_p12 = scmp.lt.s32.totalorder %s5340_s12, %s4590_s18 }
 0x13d   : > { %p4587_p6 = pnand %p4585_p9, %p5084_p10  ;;  %p4593_p7 = scmp.lt.s32.totalorder %s4591_s2, %s4584_s14 }
 0x13f   : > { %p4588_p0 = pneg %p4587_p6  ;;  %p4594_p11 = por %p4593_p7, %p4592_p12 }
 0x141   : > { %p4595_p3 = pnand %p4594_p11, %p4588_p0 }
 0x143   : > { %4598 = shalt.err (!%p4595_p3)
}
 0x144   : > { %4012 = dma.hbm_to_vmem [thread:$0]  (!%p5980_p13), %s5312_s16, 16, %s5340_s12, %s5078_s24  }
 0x145   : > { %s5984_s21 = sld [smem:[#allocation42_spill]]  ;;  %p5986_p8 = scmp.ne.s32.totalorder %s5966_s20, 0 }
 0x14b   : > { %s5985_s13 = smov %s5984_s21  ;;  %s4599_s23 = scalar_lea.hbm %s5984_s21, 32 }
 0x14c   : > { %p4600_p5 = scmp.ne.s32.totalorder %s5985_s13, %s4599_s23  ;;  %p4606_p2 = scmp.lt.u32.totalorder %s4599_s23, %s5985_s13 }
 0x14e   : > { %p4602_p4 = pnand %p4600_p5, %p5986_p8 }
 0x150   : > { %p4603_p1 = pneg %p4602_p4 }
 0x152   : > { %p4608_p9 = pnand %p4606_p2, %p4603_p1 }
 0x154   : > { %4611 = shalt.err (!%p4608_p9)
}
 0x155   : > { %s4612_s19 = scalar_lea.vmem %s512_s26, 32  ;;  %p4620_p7 = scmp.lt.s32.totalorder %s512_s26, %s512_s26 }
 0x156   : > { %p4613_p6 = scmp.ne.s32.totalorder %s512_s26, %s4612_s19  ;;  %p4621_p11 = scmp.lt.s32.totalorder %s4612_s19, %s4612_s19 }
 0x158   : > { %p4615_p0 = pnand %p4613_p6, %p5986_p8  ;;  %p4622_p3 = por %p4621_p11, %p4620_p7 }
 0x15a   : > { %p4616_p12 = pneg %p4615_p0 }
 0x15c   : > { %p4623_p13 = pnand %p4622_p3, %p4616_p12 }
 0x15e   : > { %4626 = shalt.err (!%p4623_p13)
}
 0x15f   : > { %s4859_s16 = smov 16   ;;  %s5987_s12 = sld [smem:[#allocation40_spill]] }
 0x160   : > { %s4860_s18 = smov 1   ;;  %s5989_s23 = sld [smem:[#allocation46_spill]] }
 0x161   : > { %s740_s29 = scalar_lea.vmem [#allocation19], %s5030_s28 }
 0x162   : > { %s747_s14 = sshll.u32 %s740_s29, 4  ;;  %s748_s14 = int_to_ptr.vmem [resolvable:$true] %s747_s14 }
 0x165   : > { %p5988_p5 = scmp.ne.s32.totalorder %s5987_s12, 0 }
 0x166   : > { %s5990_s30 = smov %s5989_s23  ;;  %s5386_s17 = scalar_lea.hbm %s5989_s23, %s5164_s0 }
 0x167   : > { %3975 = dma.hbm_to_vmem [thread:$0]  (!%p5988_p5), %s5985_s13, 32, %s512_s26, [#allocation8], %s4859_s16, %s4859_s16, %s4860_s18  }
 0x168   : > { %s4627_s19 = scalar_lea.hbm %s5386_s17, 16  ;;  %s4632_s26 = scalar_lea.hbm %s5990_s30, 32 }
 0x169   : > { %p4628_p13 = scmp.ne.s32.totalorder %s5386_s17, %s4627_s19  ;;  %p4633_p2 = scmp.lt.u32.totalorder %s5386_s17, %s5990_s30 }
 0x16a   : > { %p4634_p9 = scmp.lt.u32.totalorder %s4632_s26, %s4627_s19  ;;  %p4636_p0 = scmp.lt.u32.totalorder %s4627_s19, %s5386_s17 }
 0x16b   : > { %p4630_p4 = pnand %p4628_p13, %p5084_p10 }
 0x16c   : > { %p4635_p6 = por %p4634_p9, %p4633_p2 }
 0x16d   : > { %p4631_p1 = pneg %p4630_p4 }
 0x16e   : > { %p4637_p12 = por %p4636_p0, %p4635_p6 }
 0x170   : > { %p4638_p7 = pnand %p4637_p12, %p4631_p1 }
 0x172   : > { %4641 = shalt.err (!%p4638_p7)
}
 0x173   : > { %s4642_s15 = scalar_lea.vmem %s748_s14, 16  ;;  %s4861_s1 = smov [#allocation19]  }
 0x174   : > { %p4643_p11 = scmp.ne.s32.totalorder %s748_s14, %s4642_s15  ;;  %s4647_s21 = sshll.u32 %s4861_s1, 4  ;;  %s4648_s21 = int_to_ptr.vmem [resolvable:$false] %s4647_s21 }
 0x175   : > { %s4649_s3 = scalar_lea.vmem %s4648_s21, 32  ;;  %p4650_p4 = scmp.lt.s32.totalorder %s748_s14, %s4648_s21 }
 0x176   : > { %p4645_p3 = pnand %p4643_p11, %p5084_p10  ;;  %p4651_p5 = scmp.lt.s32.totalorder %s4649_s3, %s4642_s15 }
 0x178   : > { %p4646_p13 = pneg %p4645_p3  ;;  %p4652_p8 = por %p4651_p5, %p4650_p4 }
 0x17a   : > { %p4653_p2 = pnand %p4652_p8, %p4646_p13 }
 0x17c   : > { %4656 = shalt.err (!%p4653_p2)
}
 0x17d   : > { %p5991_p9 = scmp.ne.s32.totalorder %s5969_s27, 0  ;;  %s4862_s23 = smov [#allocation21]  }
 0x17e   : > { %s525_s29 = sshll.u32 %s4862_s23, 4  ;;  %s4863_s19 = smov [#allocation22]   ;;  %s526_s29 = int_to_ptr.vmem [resolvable:$true] %s525_s29 }
 0x17f   : > { %4015 = dma.hbm_to_vmem [thread:$0]  (!%p5991_p9), %s5386_s17, 16, %s748_s14, %s5078_s24  }
 0x180   : > { %s536_s2 = sshll.u32 %s4863_s19, 4  ;;  %s5992_s18 = sld [smem:[#allocation48_spill]]  ;;  %s537_s2 = int_to_ptr.vmem [resolvable:$true] %s536_s2 }
 0x181   : > { %p5993_p5 = scmp.ne.s32.totalorder %s5966_s20, 0 }
 0x186   : > { %s4657_s1 = scalar_lea.hbm %s5992_s18, 16 }
 0x187   : > { %p4658_p8 = scmp.ne.s32.totalorder %s5992_s18, %s4657_s1  ;;  %p4664_p0 = scmp.lt.u32.totalorder %s4657_s1, %s5992_s18 }
 0x189   : > { %p4660_p1 = pnand %p4658_p8, %p5993_p5 }
 0x18b   : > { %p4661_p6 = pneg %p4660_p1 }
 0x18d   : > { %p4666_p12 = pnand %p4664_p0, %p4661_p6 }
 0x18f   : > { %4669 = shalt.err (!%p4666_p12)
}
 0x190   : > { %s4670_s17 = scalar_lea.vmem %s526_s29, 16  ;;  %s4677_s14 = scalar_lea.vmem %s526_s29, 32 }
 0x191   : > { %p4671_p7 = scmp.ne.s32.totalorder %s526_s29, %s4670_s17  ;;  %p4678_p13 = scmp.lt.s32.totalorder %s526_s29, %s526_s29 }
 0x192   : > { %p4679_p4 = scmp.lt.s32.totalorder %s4677_s14, %s4670_s17 }
 0x193   : > { %p4673_p11 = pnand %p4671_p7, %p5993_p5 }
 0x194   : > { %p4680_p2 = por %p4679_p4, %p4678_p13 }
 0x195   : > { %p4674_p3 = pneg %p4673_p11 }
 0x197   : > { %p4681_p9 = pnand %p4680_p2, %p4674_p3 }
 0x199   : > { %4684 = shalt.err (!%p4681_p9)
}
 0x19a   : > { %p5994_p8 = scmp.ne.s32.totalorder %s5987_s12, 0  ;;  %s5995_s16 = sld [smem:[#allocation49_spill]] }
 0x19c   : > { %3978 = dma.hbm_to_vmem [thread:$0]  (!%p5994_p8), %s5992_s18, 16, %s526_s29, [#allocation8]  }
 0x1a0   : > { %s4685_s1 = scalar_lea.hbm %s5995_s16, 16 }
 0x1a1   : > { %p4686_p1 = scmp.ne.s32.totalorder %s5995_s16, %s4685_s1  ;;  %p4692_p9 = scmp.lt.u32.totalorder %s4685_s1, %s5995_s16 }
 0x1a3   : > { %p4688_p6 = pnand %p4686_p1, %p5993_p5 }
 0x1a5   : > { %p4689_p0 = pneg %p4688_p6 }
 0x1a7   : > { %p4694_p12 = pnand %p4692_p9, %p4689_p0 }
 0x1a9   : > { %4697 = shalt.err (!%p4694_p12)
}
 0x1aa   : > { %s4698_s14 = scalar_lea.vmem %s537_s2, 16  ;;  %s4705_s29 = scalar_lea.vmem %s537_s2, 32 }
 0x1ab   : > { %p4699_p7 = scmp.ne.s32.totalorder %s537_s2, %s4698_s14  ;;  %p4706_p13 = scmp.lt.s32.totalorder %s537_s2, %s537_s2 }
 0x1ac   : > { %p4707_p4 = scmp.lt.s32.totalorder %s4705_s29, %s4698_s14 }
 0x1ad   : > { %p4701_p11 = pnand %p4699_p7, %p5993_p5 }
 0x1ae   : > { %p4708_p2 = por %p4707_p4, %p4706_p13 }
 0x1af   : > { %p4702_p3 = pneg %p4701_p11 }
 0x1b1   : > { %p4709_p10 = pnand %p4708_p2, %p4702_p3 }
 0x1b3   : > { %4712 = shalt.err (!%p4709_p10)
}
 0x1b4   : > { %3981 = dma.hbm_to_vmem [thread:$0]  (!%p5994_p8), %s5995_s16, 16, %s537_s2, [#allocation23]  }
 0x1b5   : > { %s5996_s20 = sld [smem:[#allocation47_spill]]  ;;  %s757_s21 = scalar_lea.vmem [#allocation20], %s5030_s28 }
 0x1b6   : > { %s764_s15 = sshll.u32 %s757_s21, 4  ;;  %p5997_p5 = scmp.ne.s32.totalorder %s5971_s22, 0  ;;  %s765_s15 = int_to_ptr.vmem [resolvable:$true] %s764_s15 }
 0x1bb   : > { %s5447_s1 = scalar_lea.hbm %s5996_s20, %s5164_s0  ;;  %s4718_s2 = scalar_lea.hbm %s5996_s20, 32 }
 0x1bc   : > { %s4713_s12 = scalar_lea.hbm %s5447_s1, 16  ;;  %p4719_p8 = scmp.lt.u32.totalorder %s5447_s1, %s5996_s20 }
 0x1bd   : > { %p4714_p10 = scmp.ne.s32.totalorder %s5447_s1, %s4713_s12  ;;  %p4720_p0 = scmp.lt.u32.totalorder %s4718_s2, %s4713_s12 }
 0x1be   : > { %p4722_p12 = scmp.lt.u32.totalorder %s4713_s12, %s5447_s1 }
 0x1bf   : > { %p4716_p1 = pnand %p4714_p10, %p5997_p5  ;;  %p4721_p9 = por %p4720_p0, %p4719_p8 }
 0x1c1   : > { %p4717_p6 = pneg %p4716_p1  ;;  %p4723_p7 = por %p4722_p12, %p4721_p9 }
 0x1c3   : > { %p4724_p11 = pnand %p4723_p7, %p4717_p6 }
 0x1c5   : > { %4727 = shalt.err (!%p4724_p11)
}
 0x1c6   : > { %s4728_s28 = scalar_lea.vmem %s765_s15, 16  ;;  %s4864_s0 = smov [#allocation20]  }
 0x1c7   : > { %p4729_p3 = scmp.ne.s32.totalorder %s765_s15, %s4728_s28  ;;  %s4733_s23 = sshll.u32 %s4864_s0, 4  ;;  %s4734_s23 = int_to_ptr.vmem [resolvable:$false] %s4733_s23 }
 0x1c8   : > { %s4735_s19 = scalar_lea.vmem %s4734_s23, 32  ;;  %p4736_p2 = scmp.lt.s32.totalorder %s765_s15, %s4734_s23 }
 0x1c9   : > { %p4731_p13 = pnand %p4729_p3, %p5997_p5  ;;  %p4737_p10 = scmp.lt.s32.totalorder %s4735_s19, %s4728_s28 }
 0x1cb   : > { %p4732_p4 = pneg %p4731_p13  ;;  %p4738_p1 = por %p4737_p10, %p4736_p2 }
 0x1cd   : > { %p4739_p0 = pnand %p4738_p1, %p4732_p4 }
 0x1cf   : > { %4742 = shalt.err (!%p4739_p0)
}
 0x1d0   : > { %p5998_p8 = scmp.ne.s32.totalorder %s5969_s27, 0  ;;  %s5999_s4 = sld [smem:[#allocation39_spill]] }
 0x1d2   : > { %4018 = dma.hbm_to_vmem [thread:$0]  (!%p5998_p8), %s5447_s1, 16, %s765_s15, %s5078_s24  }
 0x1d6   : > { %p6000_p6 = scmp.ne.s32.totalorder %s5999_s4, 0 }
 0x1d7   : > { %s6001_s22 = sld [smem:[#allocation35_spill]] (!%p6000_p6) }
 0x1d8   : > { %773 = sbr.rel (%p6000_p6) target bundleno = 4620 (0x120c), region = 84 }
 0x1dd   : > { %p6002_p5 = scmp.eq.s32.totalorder (!%p6000_p6), %s6001_s22, 0 }
 0x1df   : > { %4794 = dma.done.wait (%p6002_p5), [#allocation5], 512   ;;  %p6003_p9 = pmov %p6002_p5 }
 0x1e0   : > { %p6004_p12 = pmov %p6002_p5 }
 0x1e1   : > { %4796 = vsyncadd (%p6003_p9), [#allocation5], 4294966784 }
 0x1e2   : > { %4798 = dma.done.wait (%p6004_p12), [#allocation8], 32   ;;  %p6005_p7 = pmov %p6002_p5 }
 0x1e3   : > { %s6006_s27 = sld [smem:[#allocation31_spill]]  ;;  %s6007_s26 = sld [smem:[#allocation37_spill]] }
 0x1e4   : > { %4800 = vsyncadd (%p6005_p7), [#allocation8], 4294967264  ;;  %s783_s21 = sand.u32 1, %s6001_s22  }
 0x1e5   : > { %s784_s15 = scalar_lea.sflag [#allocation5], %s783_s21 }
 0x1e9   : > { %s5480_s24 = sand.u32 1, %s6006_s27   ;;  %p6008_p11 = scmp.ne.s32.totalorder %s6007_s26, 0 }
 0x1ea   : > { %s3923_s1 = smul.u32 192, %s5480_s24 }
 0x1ec   : > { %s5483_s12 = scalar_lea.vmem [#allocation9], %s3923_s1 }
 0x1ed   : > { %4802 = dma.done.wait (%p6008_p11), %s784_s15, 8368  }
 0x1ee   : > { %4804 = vsyncadd (%p6008_p11), %s784_s15, 4294958928  ;;  %s3924_s3 = smul.u32 3, %s5480_s24  ;;  %s3540_s17 = sshll.u32 %s5480_s24, 6 }
 0x1ef   : > { %s3541_s2 = sshll.u32 %s5480_s24, 7  ;;  %s3542_s14 = sshll.u32 %s5480_s24, 1 }
 0x1f0   : > { %s5493_s29 = scalar_lea.vmem [#allocation10], %s3924_s3  ;;  %s5495_s28 = scalar_lea.vmem [#allocation11], %s3540_s17 }
 0x1f1   : > { %s813_s0 = scalar_lea.vmem [#allocation12], %s5480_s24  ;;  %s821_s23 = scalar_lea.vmem [#allocation13], %s5480_s24 }
 0x1f2   : > { %s829_s19 = scalar_lea.vmem [#allocation14], %s5480_s24  ;;  %s5500_s4 = scalar_lea.vmem [#allocation15], %s3541_s2 }
 0x1f3   : > { %s5502_s27 = scalar_lea.vmem [#allocation16], %s3542_s14  ;;  %s5504_s26 = scalar_lea.vmem [#allocation17], %s3541_s2 }
 0x1f4   : > { %s864_s21 = scalar_lea.vmem [#allocation18], %s5480_s24  ;;  %s872_s1 = scalar_lea.vmem [#allocation19], %s5480_s24 }
 0x1f5   : > { %s880_s15 = scalar_lea.vmem [#allocation20], %s5480_s24  ;;  %p6009_p3 = pmov %p6002_p5 }
 0x1f7   : > { %4806 = dma.done.wait (%p6009_p3), [#allocation8], 16   ;;  %p6010_p13 = pmov %p6009_p3 }
 0x1f8   : > { %p6011_p4 = pmov %p6009_p3 }
 0x1f9   : > { %4808 = vsyncadd (%p6010_p13), [#allocation8], 4294967280 }
 0x1fa   : > { %4810 = dma.done.wait (%p6011_p4), [#allocation23], 16   ;;  %p6012_p2 = pmov %p6009_p3 }
 0x1fb   : > { %s6013_s3 = sld [smem:[#allocation33_spill]] }
 0x1fc   : > { %4812 = vsyncadd (%p6012_p2), [#allocation23], 4294967280 }
 0x201   : > { %p3546_p10 = scmp.ne.s32.totalorder %s6013_s3, 0 }
 0x202   : > { %v989_v0 = vld [vmem:[#allocation4] sm:$0xff] (!%p3546_p10)  ;;  %v990_v1 = vld [vmem:[#allocation4 + $0x8] sm:$0xff] (!%p3546_p10)  ;;  %v991_v2 = vld [vmem:[#allocation4 + $0x10] sm:$0xff] (!%p3546_p10)  ;;  %v997_v3 = vlaneseq (!%p3546_p10)  ;;  %vm1006_vm0 = vcmask (!%p3546_p10), 130048   ;;  %v4865_v8 = vmov (!%p3546_p10), 0.0  }
 0x203   : > { %988 = sbr.rel (%p3546_p10) target bundleno = 523 (0x20b), region = 152  ;;  %993 = vst [vmem:[#allocation2] sm:$0xff] (!%p3546_p10), %v989_v0  ;;  %994 = vst [vmem:[#allocation2 + $0x8] sm:$0xff] (!%p3546_p10), %v990_v1  ;;  %v992_v4 = vld [vmem:[#allocation4 + $0x18] sm:$0xff] (!%p3546_p10) }
 0x204   : > { %995 = vst [vmem:[#allocation2 + $0x10] sm:$0xff] (!%p3546_p10), %v991_v2  ;;  %996 = vst [vmem:[#allocation2 + $0x18] sm:$0xff] (!%p3546_p10), %v992_v4  ;;  %v998_v5 = vshrl.u32 (!%p3546_p10), %v997_v3, 7  ;;  %v1001_v6 = vand.u32 (!%p3546_p10), 127, %v997_v3 }
 0x206   : > { %vm1002_vm1 = vcmp.gt.s32.totalorder (!%p3546_p10), %v1001_v6, %v998_v5  ;;  %v999_v7 = vadd.s32 (!%p3546_p10), 8, %v998_v5 }
 0x207   : > { %v1004_v9 = vsel (!%p3546_p10), %vm1002_vm1, -1e+09, %v4865_v8 }
 0x208   : > { %1007 = vst.msk [vmem:[#allocation3] sm:$0xff] (!%p3546_p10), %vm1006_vm0, %v1004_v9  ;;  %vm1003_vm2 = vcmp.gt.s32.totalorder (!%p3546_p10), %v1001_v6, %v999_v7 }
 0x209   : > { %v1005_v10 = vsel (!%p3546_p10), %vm1003_vm2, -1e+09, %v4865_v8 }
 0x20a   : > { %1008 = vst.msk [vmem:[#allocation3 + $0x8] sm:$0xff] %vm1006_vm0, %v1005_v10 }
 0x20b PF: > { %v4099_v11 = vld [vmem:[%s5483_s12 + $0x4] ss:$12 sps:$4 sm:$0xff]   ;;  %v4101_v12 = vld [vmem:[%s5483_s12] ss:$12 sps:$4 sm:$0xff]   ;;  %v4866_v13 = vmov 0   ;;  %v1010_v22 = vld [vmem:[#allocation2 + $0x8] sm:$0xff]  ;;  %v1049_v43 = vlaneseq }
 0x20c   : > { %1224 = vmatprep.mubr.bf16.mxu0 %v4866_v13  ;;  %1192 = vmatprep.subr.bf16.mxu0 %v4099_v11  ;;  %v4102_v14 = vld [vmem:[%s5483_s12 + $0x1c] ss:$12 sps:$4 sm:$0xff]   ;;  %v4104_v15 = vld [vmem:[%s5483_s12 + $0x18] ss:$12 sps:$4 sm:$0xff]   ;;  %v4105_v16 = vld [vmem:[%s5483_s12 + $0x34] ss:$12 sps:$4 sm:$0xff]  }
 0x20d   : > { %1193 = vmatpush1.bf16.msra.mxu0 %v4101_v12  ;;  %v4107_v17 = vld [vmem:[%s5483_s12 + $0x30] ss:$12 sps:$4 sm:$0xff]   ;;  %v4108_v18 = vld [vmem:[%s5483_s12 + $0x4c] ss:$12 sps:$4 sm:$0xff]   ;;  %v4110_v20 = vld [vmem:[%s5483_s12 + $0x48] ss:$12 sps:$4 sm:$0xff]  }
 0x20e   : > { %1194 = vmatprep.subr.bf16.mxu0 %v4102_v14  ;;  %v1009_v19 = vld [vmem:[#allocation2] sm:$0xff]  ;;  %v4114_v27 = vld [vmem:[%s5483_s12 + $0x7c] ss:$12 sps:$4 sm:$0xff]   ;;  %v4125_v28 = vld [vmem:[%s5483_s12 + $0x38] ss:$12 sps:$4 sm:$0xff]   ;;  %v4867_v42 = vmov 0.0  }
 0x20f   : > { %v4111_v21 = vld [vmem:[%s5483_s12 + $0x64] ss:$12 sps:$4 sm:$0xff]   ;;  %v1013_v23 = vpack.c.bf16 %v1010_v22, %v1009_v19  ;;  %v4123_v24 = vld [vmem:[%s5483_s12 + $0x8] ss:$12 sps:$4 sm:$0xff]   ;;  %v4124_v25 = vld [vmem:[%s5483_s12 + $0x20] ss:$12 sps:$4 sm:$0xff]  }
 0x210   : > { %v4113_v26 = vld [vmem:[%s5483_s12 + $0x60] ss:$12 sps:$4 sm:$0xff]   ;;  %3759 = vmatprep.subr.bf16.mxu1 %v4123_v24  ;;  %v4116_v29 = vld [vmem:[%s5483_s12 + $0x78] ss:$12 sps:$4 sm:$0xff]   ;;  %v4126_v31 = vld [vmem:[%s5483_s12 + $0x50] ss:$12 sps:$4 sm:$0xff]  }
 0x211   : > { %1195 = vmatpush1.bf16.msra.mxu0 %v4104_v15  ;;  %3775 = vmatprep.mubr.bf16.mxu1 %v1013_v23  ;;  %v4117_v30 = vld [vmem:[%s5483_s12 + $0x94] ss:$12 sps:$4 sm:$0xff]   ;;  %v4119_v32 = vld [vmem:[%s5483_s12 + $0x90] ss:$12 sps:$4 sm:$0xff]   ;;  %v4120_v33 = vld [vmem:[%s5483_s12 + $0xac] ss:$12 sps:$4 sm:$0xff]  }
 0x212   : > { %1196 = vmatprep.subr.bf16.mxu0 %v4105_v16  ;;  %3760 = vmatpush3.bf16.msra.mxu1 %v4123_v24  ;;  %v4127_v34 = vld [vmem:[%s5483_s12 + $0x68] ss:$12 sps:$4 sm:$0xff]   ;;  %v4128_v36 = vld [vmem:[%s5483_s12 + $0x80] ss:$12 sps:$4 sm:$0xff]   ;;  %v4129_v37 = vld [vmem:[%s5483_s12 + $0x98] ss:$12 sps:$4 sm:$0xff]  }
 0x213   : > { %3761 = vmatprep.subr.bf16.mxu1 %v4124_v25  ;;  %v4122_v35 = vld [vmem:[%s5483_s12 + $0xa8] ss:$12 sps:$4 sm:$0xff]   ;;  %v1011_v38 = vld [vmem:[#allocation2 + $0x10] sm:$0xff]  ;;  %vm4868_vm3 = vmmov 0   ;;  %v5550_v44 = vshrl.u32 %v1049_v43, 7  ;;  %vm1341_vm4 = vcmask 261120  }
 0x214   : > { %v1012_v39 = vld [vmem:[#allocation2 + $0x18] sm:$0xff]  ;;  %v4130_v40 = vld [vmem:[%s5483_s12 + $0xb0] ss:$12 sps:$4 sm:$0xff]   ;;  %v1047_v46 = vld [vmem:[%s5493_s29] sm:$0x7]  ;;  %s4869_s22 = smov 96  }
 0x215   : > { %1197 = vmatpush1.bf16.msra.mxu0 %v4107_v17  ;;  %v1014_v41 = vpack.c.bf16 %v1012_v39, %v1011_v38  ;;  %v1051_v45 = vsub.s32 0, %v5550_v44  ;;  %v1055_v47 = vsub.s32 1, %v5550_v44  ;;  %v1059_v5 = vsub.s32 2, %v5550_v44  ;;  %s4870_s12 = smov 64   ;;  %s4871_s17 = smov 32  }
 0x216   : > { %1198 = vmatprep.subr.bf16.mxu0 %v4108_v18  ;;  %3762 = vmatpush3.bf16.msra.mxu1 %v4124_v25  ;;  %vm1389_vm5 = vcmask 130048   ;;  %s6014_s2 = sld [smem:[#allocation33_spill]] }
 0x217   : > { %3763 = vmatprep.subr.bf16.mxu1 %v4125_v28  ;;  %v1052_v48 = vrot.slane %v1047_v46, %v1051_v45  ;;  %v1056_v50 = vrot.slane %v1047_v46, %v1055_v47  ;;  %v1060_v11 = vrot.slane %v1047_v46, %v1059_v5 }
 0x219   : > { %1199 = vmatpush1.bf16.msra.mxu0 %v4110_v20 }
 0x21a   : > { %1200 = vmatprep.subr.bf16.mxu0 %v4111_v21  ;;  %3764 = vmatpush3.bf16.msra.mxu1 %v4125_v28 }
 0x21b   : > { %3765 = vmatprep.subr.bf16.mxu1 %v4126_v31 }
 0x21c   : > { %p3643_p1 = scmp.ne.s32.totalorder %s6014_s2, 1 }
 0x21d   : > { %1201 = vmatpush1.bf16.msra.mxu0 %v4113_v26 }
 0x21e   : > { %1202 = vmatprep.subr.bf16.mxu0 %v4114_v27  ;;  %3766 = vmatpush3.bf16.msra.mxu1 %v4126_v31  ;;  %v1304_v31 = vld [vmem:[#allocation3] sm:$0xff] }
 0x21f   : > { %3767 = vmatprep.subr.bf16.mxu1 %v4127_v34 }
 0x221   : > { %1203 = vmatpush1.bf16.msra.mxu0 %v4116_v29 }
 0x222   : > { %1204 = vmatprep.subr.bf16.mxu0 %v4117_v30  ;;  %3768 = vmatpush3.bf16.msra.mxu1 %v4127_v34 }
 0x223   : > { %3769 = vmatprep.subr.bf16.mxu1 %v4128_v36 }
 0x225   : > { %1205 = vmatpush1.bf16.msra.mxu0 %v4119_v32  ;;  %v3571_v32 = vld [vmem:[#allocation7] ss:$0 sm:$0xff] }
 0x226   : > { %1206 = vmatprep.subr.bf16.mxu0 %v4120_v33  ;;  %3770 = vmatpush3.bf16.msra.mxu1 %v4128_v36  ;;  %v1305_v33 = vld [vmem:[#allocation3 + $0x8] sm:$0xff]  ;;  %v5603_v34 = vadd.f32 %v3571_v32, %v1304_v31 }
 0x227   : > { %3771 = vmatprep.subr.bf16.mxu1 %v4129_v37 }
 0x229   : > { %1207 = vmatpush1.bf16.msra.mxu0 %v4122_v35  ;;  %v5605_v35 = vadd.f32 %v3571_v32, %v1305_v33 }
 0x22a   : > { %3772 = vmatpush3.bf16.msra.mxu1 %v4129_v37  ;;  %3785 = vmatprep.subr.bf16.mxu0 %v4867_v42 }
 0x22b   : > { %3773 = vmatprep.subr.bf16.mxu1 %v4130_v40 }
 0x22c   : > { %1225 = vmatmul.mubr.bf16.vlgmr.msra.gmra.mrb[0].mxu0 %v1013_v23 }
 0x22d   : > { %1234 = vmatprep.mubr.bf16.mxu0 %v4866_v13 }
 0x22e   : > { %3774 = vmatpush3.bf16.msra.mxu1 %v4130_v40  ;;  %v3572_v40 = vld [vmem:[#allocation7 + $0x1] ss:$0 sm:$0xff] }
 0x22f   : > { %3779 = vmatprep.subr.bf16.mxu1 %v4867_v42 }
 0x231   : > { %3776 = vmatmul.mubr.bf16.vlgmr.msra.gmra.mrb[0].mxu1 %v1014_v41 }
 0x232   : > { %3781 = vmatprep.mubr.msk.bf16.mxu1 %vm4868_vm3, %v4867_v42 }
 0x234   : > { %1235 = vmatmul.mubr.bf16.gmra.mrb[4].mxu0 %v1014_v41 }
 0x235   : > { %3787 = vmatprep.mubr.msk.bf16.mxu0 %vm4868_vm3, %v4867_v42 }
 0x2ff   : > { %v1226_v49 = vpop.f32.mrb[0].mxu0 }
 0x300   : > { %v1227_v51 = vadd.f32 %v1226_v49, %v1052_v48  ;;  %v1228_v52 = vpop.f32.mrb[1].mxu0  ;;  %v5611_v49 = vadd.f32 %v3572_v40, %v1304_v31 }
 0x301   : > { %v1230_v53 = vpop.f32.mrb[2].mxu0  ;;  %v1229_v56 = vadd.f32 %v1228_v52, %v1056_v50 }
 0x302   : > { %v1231_v54 = vadd.f32 %v1230_v53, %v1052_v48  ;;  %v1232_v55 = vpop.f32.mrb[3].mxu0  ;;  %v1294_v58 = vmul.f32 0.17677669, %v1227_v51 }
 0x303   : > { %v1233_v57 = vadd.f32 %v1232_v55, %v1056_v50 }
 0x304   : > { %v1295_v59 = vmul.f32 0.17677669, %v1231_v54  ;;  %v3777_v8 = vpop.f32.mrb[0].mxu1 }
 0x305   : > { %v5559_v60 = vpack.c.bf16 %v1233_v57, %v1229_v56  ;;  %v1279_v12 = vpop.f32.mrb[1].mxu1  ;;  %v1288_v17 = vadd.f32 %v3777_v8, %v1060_v11 }
 0x306   : > { %v5561_v61 = vpack.c.bf16 %v1295_v59, %v1294_v58  ;;  %v3778_v15 = vpop.f32.mrb[2].mxu1  ;;  %v1280_v18 = vadd.f32 %v1279_v12, %v1060_v11 }
 0x307   : > { %v1236_v62 = vpop.f32.mrb[4].mxu0  ;;  %1577 = vrot.lane.b32.xlu0 %v5559_v60, %s4869_s22  ;;  %v1346_v63 = vsel %vm1341_vm4, %v5559_v60, 0  ;;  %v1291_v19 = vadd.f32 %v3778_v15, %v1060_v11  ;;  %v1282_v20 = vpop.f32.mrb[3].mxu1 }
 0x308   : > { %v1237_v0 = vadd.f32 %v1236_v62, %v1052_v48  ;;  %v1238_v1 = vpop.f32.mrb[5].mxu0  ;;  %3780 = vmatpush3.bf16.xpose.msra.mxu1 %v1346_v63  ;;  %v1283_v22 = vadd.f32 %v1282_v20, %v1060_v11 }
 0x309   : > { %v1240_v2 = vpop.f32.mrb[6].mxu0  ;;  %3791 = vmatprep.subr.bf16.mxu1 %v4867_v42  ;;  %v1239_v6 = vadd.f32 %v1238_v1, %v1056_v50  ;;  %v5583_v23 = vpack.c.bf16 %v1291_v19, %v1288_v17 }
 0x30a   : > { %v1241_v3 = vadd.f32 %v1240_v2, %v1052_v48  ;;  %v1242_v4 = vpop.f32.mrb[7].mxu0  ;;  %v1296_v9 = vmul.f32 0.17677669, %v1237_v0  ;;  %v5586_v24 = vpack.c.bf16 %v1283_v22, %v1280_v18 }
 0x30b   : > { %v1243_v7 = vadd.f32 %v1242_v4, %v1056_v50  ;;  %1574 = vrot.lane.b32.xlu0 %v5561_v61, %s4869_s22  ;;  %v5613_v50 = vadd.f32 %v3572_v40, %v1305_v33 }
 0x30c   : > { %v1297_v10 = vmul.f32 0.17677669, %v1241_v3  ;;  %3786 = vmatpush3.bf16.msra.mxu0 %v5586_v24 }
 0x30d   : > { %v5571_v14 = vpack.c.bf16 %v1243_v7, %v1239_v6  ;;  %3797 = vmatprep.subr.bf16.mxu0 %v4867_v42 }
 0x30e   : > { %v5573_v16 = vpack.c.bf16 %v1297_v10, %v1296_v9 }
 0x30f   : > { %1701 = vrot.lane.b32.xlu1 %v5571_v14, %s4869_s22  ;;  %3782 = vmatmul.mubr.msk.bf16.vlgmr.msra.gmra.mrb[4].mxu1 %vm1341_vm4, %v5561_v61  ;;  %v1461_v21 = vsel %vm1341_vm4, %v5571_v14, 0 }
 0x310   : > { %3792 = vmatpush3.bf16.xpose.msra.mxu1 %v1461_v21  ;;  %3793 = vmatprep.mubr.msk.bf16.mxu1 %vm4868_vm3, %v4867_v42 }
 0x311   : > { %3803 = vmatprep.subr.bf16.mxu1 %v4867_v42 }
 0x313   : > { %1698 = vrot.lane.b32.xlu1 %v5573_v16, %s4869_s22 }
 0x317   : > { %3794 = vmatmul.mubr.msk.bf16.vlgmr.msra.gmra.mrb[8].mxu1 %vm1341_vm4, %v5573_v16 }
 0x318   : > { %3805 = vmatprep.mubr.msk.bf16.mxu1 %vm4868_vm3, %v4867_v42 }
 0x379   : > { %v1578_v25 = vpop.permute.xlu0 %1577 }
 0x37a   : > { %v1583_v26 = vsel %vm1341_vm4, %v1578_v25, 0 }
 0x37b   : > { %3804 = vmatpush3.bf16.xpose.msra.mxu1 %v1583_v26 }
 0x37c   : > { %3815 = vmatprep.subr.bf16.mxu1 %v4867_v42 }
 0x37d   : > { %v1575_v27 = vpop.permute.xlu0 %1574 }
 0x381   : > { %v1702_v28 = vpop.permute.xlu1 %1701 }
 0x382   : > { %v1707_v29 = vsel %vm1341_vm4, %v1702_v28, 0  ;;  %3806 = vmatmul.mubr.msk.bf16.vlgmr.msra.gmra.mrb[12].mxu1 %vm1341_vm4, %v1575_v27 }
 0x383   : > { %3816 = vmatpush3.bf16.xpose.msra.mxu1 %v1707_v29  ;;  %3817 = vmatprep.mubr.msk.bf16.mxu1 %vm4868_vm3, %v4867_v42 }
 0x385   : > { %v1699_v30 = vpop.permute.xlu1 %1698 }
 0x38a   : > { %3818 = vmatmul.mubr.msk.bf16.vlgmr.msra.gmra.mrb[16].mxu1 %vm1341_vm4, %v1699_v30 }
 0x3e2   : > { %v1382_v36 = vpop.f32.mrb[4].mxu1 }
 0x3e3   : > { %v1383_v37 = vadd.f32 %v1382_v36, %v5603_v34  ;;  %v3783_v38 = vpop.f32.mrb[5].mxu1 }
 0x3e4   : > { %v1385_v39 = vpop.f32.mrb[6].mxu1 }
 0x3e5   : > { %v1386_v41 = vadd.f32 %v1385_v39, %v5605_v35  ;;  %v3784_v43 = vpop.f32.mrb[7].mxu1  ;;  %v1390_v46 = vsel %vm1389_vm5, %v1383_v37, -inf }
 0x3e6   : > { %1391 = vmax.xlane.f32.xlu0 %v1390_v46 }
 0x3e7   : > { %v1393_v48 = vsel %vm1389_vm5, %v1386_v41, -inf }
 0x3e8   : > { %1394 = vmax.xlane.f32.xlu1 %v1393_v48 }
 0x3ea   : > { %v1497_v51 = vpop.f32.mrb[8].mxu1 }
 0x3eb   : > { %v1498_v52 = vadd.f32 %v1497_v51, %v5611_v49  ;;  %v3795_v53 = vpop.f32.mrb[9].mxu1 }
 0x3ec   : > { %v1500_v54 = vpop.f32.mrb[10].mxu1 }
 0x3ed   : > { %v1501_v55 = vadd.f32 %v1500_v54, %v5613_v50  ;;  %v3796_v56 = vpop.f32.mrb[11].mxu1  ;;  %v1504_v57 = vsel %vm1389_vm5, %v1498_v52, -inf }
 0x3ee   : > { %1505 = vmax.xlane.f32.xlu0 %v1504_v57 }
 0x3ef   : > { %v1507_v58 = vsel %vm1389_vm5, %v1501_v55, -inf }
 0x3f2   : > { %1508 = vmax.xlane.f32.xlu0 %v1507_v58 }
 0x455   : > { %v1619_v59 = vpop.f32.mrb[12].mxu1 }
 0x456   : > { %v1620_v62 = vadd.f32 %v1619_v59, %v5603_v34  ;;  %v3807_v63 = vpop.f32.mrb[13].mxu1 }
 0x457   : > { %v1622_v0 = vpop.f32.mrb[14].mxu1 }
 0x458   : > { %v1623_v1 = vadd.f32 %v1622_v0, %v5605_v35  ;;  %v3808_v2 = vpop.f32.mrb[15].mxu1  ;;  %v1626_v3 = vsel %vm1389_vm5, %v1620_v62, -inf }
 0x459   : > { %1627 = vmax.xlane.f32.xlu1 %v1626_v3 }
 0x45a   : > { %v1629_v4 = vsel %vm1389_vm5, %v1623_v1, -inf }
 0x45b   : > { %1630 = vmax.xlane.f32.xlu0 %v1629_v4 }
 0x45d   : > { %v1743_v5 = vpop.f32.mrb[16].mxu1 }
 0x45e   : > { %v1744_v6 = vadd.f32 %v1743_v5, %v5611_v49  ;;  %v3819_v7 = vpop.f32.mrb[17].mxu1 }
 0x45f   : > { %v1746_v8 = vpop.f32.mrb[18].mxu1 }
 0x460   : > { %v1747_v9 = vadd.f32 %v1746_v8, %v5613_v50  ;;  %v3820_v10 = vpop.f32.mrb[19].mxu1  ;;  %v1750_v11 = vsel %vm1389_vm5, %v1744_v6, -inf }
 0x461   : > { %1751 = vmax.xlane.f32.xlu1 %v1750_v11 }
 0x462   : > { %v1753_v12 = vsel %vm1389_vm5, %v1747_v9, -inf }
 0x463   : > { %1754 = vmax.xlane.f32.xlu0 %v1753_v12 }
 0x473   : > { %v1392_v15 = vpop.xlane.xlu0 %1391 }
 0x474   : > { %v1396_v17 = vsub.f32 %v1383_v37, %v1392_v15 }
 0x475   : > { %v1395_v18 = vpop.xlane.xlu1 %1394 }
 0x476   : > { %v1398_v19 = vmul.f32 1.442695, %v1396_v17  ;;  %v1397_v20 = vsub.f32 %v1386_v41, %v1395_v18 }
 0x478   : > { %4179 = vpow2.f32 %v1398_v19  ;;  %v1400_v21 = vmul.f32 1.442695, %v1397_v20 }
 0x47a   : > { %4181 = vpow2.f32 %v1400_v21 }
 0x47b   : > { %v1506_v22 = vpop.xlane.xlu0 %1505 }
 0x47c   : > { %v1510_v25 = vsub.f32 %v1498_v52, %v1506_v22 }
 0x47e   : > { %v1512_v26 = vmul.f32 1.442695, %v1510_v25 }
 0x47f   : > { %v1509_v27 = vpop.xlane.xlu0 %1508 }
 0x480   : > { %4183 = vpow2.f32 %v1512_v26  ;;  %v1511_v28 = vsub.f32 %v1501_v55, %v1509_v27 }
 0x482   : > { %v4180_v29 = vpop.eup %4179  ;;  %v1514_v30 = vmul.f32 1.442695, %v1511_v28 }
 0x483   : > { %v1402_v31 = vsel %vm1389_vm5, %v4180_v29, 0.0 }
 0x484   : > { %v4182_v32 = vpop.eup %4181  ;;  %4185 = vpow2.f32 %v1514_v30  ;;  %1403 = vadd.xlane.f32.xlu1 %v1402_v31 }
 0x485   : > { %v1405_v33 = vsel %vm1389_vm5, %v4182_v32, 0.0 }
 0x486   : > { %1406 = vadd.xlane.f32.xlu0 %v1405_v33 }
 0x48a   : > { %v4184_v36 = vpop.eup %4183 }
 0x48b   : > { %v1516_v37 = vsel %vm1389_vm5, %v4184_v36, 0.0 }
 0x48c   : > { %1517 = vadd.xlane.f32.xlu1 %v1516_v37 }
 0x48e   : > { %v4186_v38 = vpop.eup %4185 }
 0x48f   : > { %v1519_v39 = vsel %vm1389_vm5, %v4186_v38, 0.0 }
 0x490   : > { %1520 = vadd.xlane.f32.xlu0 %v1519_v39 }
 0x4e6   : > { %v1628_v40 = vpop.xlane.xlu1 %1627 }
 0x4e7   : > { %v1632_v41 = vsub.f32 %v1620_v62, %v1628_v40 }
 0x4e8   : > { %v1631_v43 = vpop.xlane.xlu0 %1630 }
 0x4e9   : > { %v1634_v46 = vmul.f32 1.442695, %v1632_v41  ;;  %v1633_v48 = vsub.f32 %v1623_v1, %v1631_v43 }
 0x4eb   : > { %4187 = vpow2.f32 %v1634_v46  ;;  %v1636_v51 = vmul.f32 1.442695, %v1633_v48  ;;  %v4131_v48 = vld [vmem:[%s5495_s28 + $0x10] sm:$0xff]  }
 0x4ec   : > { %3827 = vmatprep.subr.bf16.mxu1 %v4131_v48 }
 0x4ed   : > { %4189 = vpow2.f32 %v1636_v51  ;;  %3828 = vmatpush3.bf16.msra.mxu1 %v4131_v48  ;;  %v4132_v51 = vld [vmem:[%s5495_s28 + $0x18] sm:$0xff]  }
 0x4ee   : > { %v1752_v52 = vpop.xlane.xlu1 %1751  ;;  %3829 = vmatprep.subr.bf16.mxu1 %v4132_v51 }
 0x4ef   : > { %v1756_v53 = vsub.f32 %v1744_v6, %v1752_v52  ;;  %v4133_v52 = vld [vmem:[%s5495_s28] sm:$0xff]  }
 0x4f0   : > { %v1755_v54 = vpop.xlane.xlu0 %1754 }
 0x4f1   : > { %v1758_v55 = vmul.f32 1.442695, %v1756_v53  ;;  %v1757_v56 = vsub.f32 %v1747_v9, %v1755_v54  ;;  %3830 = vmatpush3.bf16.msra.mxu1 %v4132_v51 }
 0x4f2   : > { %3835 = vmatprep.subr.bf16.mxu1 %v4133_v52 }
 0x4f3   : > { %4191 = vpow2.f32 %v1758_v55  ;;  %v1760_v57 = vmul.f32 1.442695, %v1757_v56 }
 0x4f5   : > { %v4188_v58 = vpop.eup %4187  ;;  %4193 = vpow2.f32 %v1760_v57 }
 0x4f6   : > { %v1638_v59 = vsel %vm1389_vm5, %v4188_v58, 0.0 }
 0x4f7   : > { %v4190_v63 = vpop.eup %4189  ;;  %1639 = vadd.xlane.f32.xlu1 %v1638_v59 }
 0x4f8   : > { %v1641_v62 = vsel %vm1389_vm5, %v4190_v63, 0.0 }
 0x4f9   : > { %1642 = vadd.xlane.f32.xlu0 %v1641_v62 }
 0x4fd   : > { %v4192_v0 = vpop.eup %4191 }
 0x4fe   : > { %v1762_v1 = vsel %vm1389_vm5, %v4192_v0, 0.0 }
 0x4ff   : > { %v4194_v2 = vpop.eup %4193  ;;  %1763 = vadd.xlane.f32.xlu1 %v1762_v1 }
 0x500   : > { %v1765_v3 = vsel %vm1389_vm5, %v4194_v2, 0.0 }
 0x501   : > { %1766 = vadd.xlane.f32.xlu0 %v1765_v3 }
 0x510   : > { %1650 = vrot.lane.b32.xlu1 %v5586_v24, %s4869_s22 }
 0x511   : > { %v1404_v4 = vpop.xlane.xlu1 %1403 }
 0x512   : > { %4195 = vrcp.f32 %v1404_v4 }
 0x513   : > { %v1407_v5 = vpop.xlane.xlu0 %1406 }
 0x514   : > { %4197 = vrcp.f32 %v1407_v5  ;;  %1959 = vrot.lane.b32.xlu1 %v5559_v60, %s4870_s12 }
 0x517   : > { %1774 = vrot.lane.b32.xlu0 %v5583_v23, %s4869_s22 }
 0x518   : > { %1957 = vrot.lane.b32.xlu1 %v5561_v61, %s4870_s12 }
 0x519   : > { %v1518_v6 = vpop.xlane.xlu1 %1517 }
 0x51a   : > { %4199 = vrcp.f32 %v1518_v6 }
 0x51b   : > { %2080 = vrot.lane.b32.xlu0 %v5571_v14, %s4870_s12 }
 0x51c   : > { %v4196_v7 = vpop.eup %4195  ;;  %2078 = vrot.lane.b32.xlu1 %v5573_v16, %s4870_s12 }
 0x51d   : > { %v1521_v8 = vpop.xlane.xlu0 %1520  ;;  %v1410_v10 = vmul.f32 %v4196_v7, %v4180_v29 }
 0x51e   : > { %v4198_v9 = vpop.eup %4197  ;;  %4201 = vrcp.f32 %v1521_v8 }
 0x51f   : > { %v1411_v11 = vmul.f32 %v4198_v9, %v4182_v32 }
 0x521   : > { %v1412_v12 = vpack.c.bf16 %v1411_v11, %v1410_v10  ;;  %v4134_v11 = vld [vmem:[%s5495_s28 + $0x8] sm:$0xff]  }
 0x523   : > { %3788 = vmatmul.mubr.msk.bf16.vlgmr.msra.gmra.mrb[8].mxu0 %vm1389_vm5, %v1412_v12 }
 0x524   : > { %3798 = vmatpush3.bf16.msra.mxu0 %v5583_v23  ;;  %3799 = vmatprep.mubr.msk.bf16.mxu0 %vm4868_vm3, %v4867_v42  ;;  %v4200_v15 = vpop.eup %4199 }
 0x525   : > { %3809 = vmatprep.subr.bf16.mxu0 %v4867_v42  ;;  %v1524_v18 = vmul.f32 %v4200_v15, %v4184_v36 }
 0x528   : > { %v4202_v17 = vpop.eup %4201 }
 0x529   : > { %v1525_v19 = vmul.f32 %v4202_v17, %v4186_v38 }
 0x52b   : > { %v1526_v20 = vpack.c.bf16 %v1525_v19, %v1524_v18 }
 0x52d   : > { %3800 = vmatmul.mubr.msk.bf16.vlgmr.msra.gmra.mrb[12].mxu0 %vm1389_vm5, %v1526_v20 }
 0x52e   : > { %3811 = vmatprep.mubr.msk.bf16.mxu0 %vm4868_vm3, %v4867_v42 }
 0x584   : > { %v1640_v21 = vpop.xlane.xlu1 %1639 }
 0x585   : > { %4203 = vrcp.f32 %v1640_v21 }
 0x586   : > { %v1643_v22 = vpop.xlane.xlu0 %1642 }
 0x587   : > { %4205 = vrcp.f32 %v1643_v22 }
 0x58c   : > { %v1764_v25 = vpop.xlane.xlu1 %1763 }
 0x58d   : > { %4207 = vrcp.f32 %v1764_v25 }
 0x58e   : > { %v1767_v26 = vpop.xlane.xlu0 %1766 }
 0x58f   : > { %v4204_v27 = vpop.eup %4203  ;;  %4209 = vrcp.f32 %v1767_v26 }
 0x590   : > { %v1651_v28 = vpop.permute.xlu1 %1650  ;;  %v1646_v30 = vmul.f32 %v4204_v27, %v4188_v58 }
 0x591   : > { %v4206_v29 = vpop.eup %4205  ;;  %3810 = vmatpush3.bf16.msra.mxu0 %v1651_v28 }
 0x592   : > { %v1647_v31 = vmul.f32 %v4206_v29, %v4190_v63  ;;  %3821 = vmatprep.subr.bf16.mxu0 %v4867_v42  ;;  %v1775_v33 = vpop.permute.xlu0 %1774 }
 0x594   : > { %v1648_v32 = vpack.c.bf16 %v1647_v31, %v1646_v30  ;;  %v1960_v40 = vpop.permute.xlu1 %1959 }
 0x595   : > { %v1965_v43 = vsel %vm1341_vm4, %v1960_v40, 0 }
 0x596   : > { %3812 = vmatmul.mubr.msk.bf16.vlgmr.msra.gmra.mrb[16].mxu0 %vm1389_vm5, %v1648_v32  ;;  %v2081_v25 = vpop.permute.xlu0 %2080 }
 0x597   : > { %v4208_v36 = vpop.eup %4207  ;;  %3822 = vmatpush3.bf16.msra.mxu0 %v1775_v33  ;;  %3823 = vmatprep.mubr.msk.bf16.mxu0 %vm4868_vm3, %v4867_v42  ;;  %v2086_v26 = vsel %vm1341_vm4, %v2081_v25, 0 }
 0x598   : > { %3843 = vmatprep.subr.bf16.mxu0 %v4867_v42  ;;  %v1770_v38 = vmul.f32 %v4208_v36, %v4192_v0  ;;  %v1958_v46 = vpop.permute.xlu1 %1957 }
 0x599   : > { %v4210_v37 = vpop.eup %4209 }
 0x59a   : > { %v1771_v39 = vmul.f32 %v4210_v37, %v4194_v2 }
 0x59c   : > { %v1772_v41 = vpack.c.bf16 %v1771_v39, %v1770_v38  ;;  %v2079_v27 = vpop.permute.xlu1 %2078 }
 0x59e   : > { %3824 = vmatmul.mubr.msk.bf16.vlgmr.msra.gmra.mrb[20].mxu0 %vm1389_vm5, %v1772_v41 }
 0x59f   : > { %3845 = vmatprep.mubr.msk.bf16.mxu0 %vm4868_vm3, %v4867_v42 }
 0x5a0   : > { %3844 = vmatpush3.bf16.xpose.msra.mxu0 %v1965_v43 }
 0x5a1   : > { %3849 = vmatprep.subr.bf16.mxu0 %v4867_v42 }
 0x5a7   : > { %3846 = vmatmul.mubr.msk.bf16.vlgmr.msra.gmra.mrb[24].mxu0 %vm1341_vm4, %v1958_v46 }
 0x5a8   : > { %3851 = vmatprep.mubr.msk.bf16.mxu0 %vm4868_vm3, %v4867_v42 }
 0x5f6   : > { %v1450_v53 = vpop.f32.mrb[8].mxu0 }
 0x5f7   : > { %v3789_v54 = vpop.f32.mrb[9].mxu0 }
 0x5f8   : > { %v1453_v55 = vpop.f32.mrb[10].mxu0 }
 0x5f9   : > { %v1571_v56 = vpack.c.bf16 %v1453_v55, %v1450_v53  ;;  %v3790_v57 = vpop.f32.mrb[11].mxu0 }
 0x600   : > { %v1564_v58 = vpop.f32.mrb[12].mxu0 }
 0x601   : > { %v3801_v59 = vpop.f32.mrb[13].mxu0 }
 0x602   : > { %v1567_v63 = vpop.f32.mrb[14].mxu0 }
 0x603   : > { %v1572_v62 = vpack.c.bf16 %v1567_v63, %v1564_v58  ;;  %v3802_v0 = vpop.f32.mrb[15].mxu0 }
 0x669   : > { %v1690_v1 = vpop.f32.mrb[16].mxu0 }
 0x66a   : > { %v3813_v2 = vpop.f32.mrb[17].mxu0 }
 0x66b   : > { %v1693_v3 = vpop.f32.mrb[18].mxu0 }
 0x66c   : > { %v1821_v4 = vpack.c.bf16 %v1693_v3, %v1690_v1  ;;  %v3814_v5 = vpop.f32.mrb[19].mxu0 }
 0x66e   : > { %3831 = vmatprep.mubr.msk.bf16.mxu1 %vm1341_vm4, %v1821_v4 }
 0x671   : > { %v1814_v6 = vpop.f32.mrb[20].mxu0 }
 0x672   : > { %v3825_v7 = vpop.f32.mrb[21].mxu0 }
 0x673   : > { %v1817_v8 = vpop.f32.mrb[22].mxu0 }
 0x674   : > { %v1822_v9 = vpack.c.bf16 %v1817_v8, %v1814_v6  ;;  %v3826_v10 = vpop.f32.mrb[23].mxu0 }
 0x675   : > { %v4135_v10 = vld [vmem:[%s5495_s28 + $0x20] sm:$0xff]  }
 0x676   : > { %3832 = vmatmul.mubr.msk.bf16.vlgmr.msra.gmra.mrb[20].mxu1 %vm1341_vm4, %v1822_v9 }
 0x677   : > { %3836 = vmatpush3.bf16.msra.mxu1 %v4133_v52  ;;  %3839 = vmatprep.mubr.msk.bf16.mxu1 %vm1341_vm4, %v1571_v56 }
 0x678   : > { %3837 = vmatprep.subr.bf16.mxu1 %v4134_v11 }
 0x67a   : > { %v2001_v12 = vpop.f32.mrb[24].mxu0 }
 0x67b   : > { %v2002_v15 = vadd.f32 %v2001_v12, %v5603_v34  ;;  %3838 = vmatpush3.bf16.msra.mxu1 %v4134_v11  ;;  %v3847_v17 = vpop.f32.mrb[25].mxu0 }
 0x67c   : > { %v2004_v18 = vpop.f32.mrb[26].mxu0  ;;  %3855 = vmatprep.subr.bf16.mxu1 %v4867_v42 }
 0x67d   : > { %v2005_v19 = vadd.f32 %v2004_v18, %v5605_v35  ;;  %v3848_v20 = vpop.f32.mrb[27].mxu0  ;;  %v2008_v21 = vsel %vm1389_vm5, %v2002_v15, -inf }
 0x67e   : > { %2009 = vmax.xlane.f32.xlu0 %v2008_v21 }
 0x67f   : > { %v2011_v22 = vsel %vm1389_vm5, %v2005_v19, -inf }
 0x680   : > { %2012 = vmax.xlane.f32.xlu1 %v2011_v22 }
 0x682   : > { %3840 = vmatmul.mubr.msk.bf16.vlgmr.msra.gmra.mrb[20].mxu1 %vm1341_vm4, %v1572_v62 }
 0x683   : > { %3857 = vmatprep.mubr.msk.bf16.mxu1 %vm4868_vm3, %v4867_v42 }
 0x684   : > { %3856 = vmatpush3.bf16.xpose.msra.mxu1 %v2086_v26 }
 0x685   : > { %3867 = vmatprep.subr.bf16.mxu1 %v4135_v10 }
 0x68b   : > { %3858 = vmatmul.mubr.msk.bf16.vlgmr.msra.gmra.mrb[24].mxu1 %vm1341_vm4, %v2079_v27 }
 0x68c   : > { %3868 = vmatpush3.bf16.msra.mxu1 %v4135_v10 }
 0x70b   : > { %v2010_v28 = vpop.xlane.xlu0 %2009 }
 0x70c   : > { %v2014_v29 = vsub.f32 %v2002_v15, %v2010_v28 }
 0x70d   : > { %v2013_v33 = vpop.xlane.xlu1 %2012 }
 0x70e   : > { %v2016_v30 = vmul.f32 1.442695, %v2014_v29  ;;  %v2015_v36 = vsub.f32 %v2005_v19, %v2013_v33 }
 0x710   : > { %4211 = vpow2.f32 %v2016_v30  ;;  %v2018_v37 = vmul.f32 1.442695, %v2015_v36 }
 0x712   : > { %4213 = vpow2.f32 %v2018_v37 }
 0x71a   : > { %v4212_v31 = vpop.eup %4211 }
 0x71b   : > { %v2020_v32 = vsel %vm1389_vm5, %v4212_v31, 0.0 }
 0x71c   : > { %2021 = vadd.xlane.f32.xlu1 %v2020_v32  ;;  %v4214_v52 = vpop.eup %4213 }
 0x71d   : > { %v2023_v53 = vsel %vm1389_vm5, %v4214_v52, 0.0 }
 0x72d   : > { %2031 = vrot.lane.b32.xlu1 %v5586_v24, %s4870_s12 }
 0x75e   : > { %v2122_v38 = vpop.f32.mrb[24].mxu1 }
 0x75f   : > { %v2123_v39 = vadd.f32 %v2122_v38, %v5611_v49  ;;  %v3859_v40 = vpop.f32.mrb[25].mxu1 }
 0x760   : > { %v2125_v41 = vpop.f32.mrb[26].mxu1 }
 0x761   : > { %v2126_v43 = vadd.f32 %v2125_v41, %v5613_v50  ;;  %v3860_v46 = vpop.f32.mrb[27].mxu1  ;;  %v2129_v48 = vsel %vm1389_vm5, %v2123_v39, -inf }
 0x762   : > { %2130 = vmax.xlane.f32.xlu0 %v2129_v48 }
 0x763   : > { %v2132_v51 = vsel %vm1389_vm5, %v2126_v43, -inf }
 0x766   : > { %2133 = vmax.xlane.f32.xlu0 %v2132_v51 }
 0x76a   : > { %2024 = vadd.xlane.f32.xlu0 %v2023_v53 }
 0x7a9   : > { %v2022_v54 = vpop.xlane.xlu1 %2021 }
 0x7ad   : > { %v2032_v55 = vpop.permute.xlu1 %2031 }
 0x7ae   : > { %3850 = vmatpush3.bf16.msra.mxu0 %v2032_v55 }
 0x7af   : > { %3861 = vmatprep.subr.bf16.mxu0 %v4867_v42 }
 0x7ef   : > { %v2131_v56 = vpop.xlane.xlu0 %2130 }
 0x7f0   : > { %v2135_v57 = vsub.f32 %v2123_v39, %v2131_v56 }
 0x7f2   : > { %v2137_v58 = vmul.f32 1.442695, %v2135_v57 }
 0x7f3   : > { %v2134_v59 = vpop.xlane.xlu0 %2133 }
 0x7f4   : > { %4215 = vpow2.f32 %v2137_v58  ;;  %v2136_v63 = vsub.f32 %v2126_v43, %v2134_v59 }
 0x7f5   : > { %4217 = vrcp.f32 %v2022_v54 }
 0x7f6   : > { %v2139_v62 = vmul.f32 1.442695, %v2136_v63 }
 0x7f7   : > { %v2025_v0 = vpop.xlane.xlu0 %2024 }
 0x7f8   : > { %4219 = vpow2.f32 %v2139_v62 }
 0x7f9   : > { %4221 = vrcp.f32 %v2025_v0 }
 0x7fe   : > { %v4216_v1 = vpop.eup %4215 }
 0x7ff   : > { %v2141_v2 = vsel %vm1389_vm5, %v4216_v1, 0.0  ;;  %v4218_v3 = vpop.eup %4217 }
 0x800   : > { %2142 = vadd.xlane.f32.xlu1 %v2141_v2  ;;  %v2028_v7 = vmul.f32 %v4218_v3, %v4212_v31  ;;  %v4136_v31 = vld [vmem:[%s5495_s28 + $0x28] sm:$0xff]  }
 0x801   : > { %3869 = vmatprep.subr.bf16.mxu1 %v4136_v31 }
 0x802   : > { %v4220_v4 = vpop.eup %4219  ;;  %3870 = vmatpush3.bf16.msra.mxu1 %v4136_v31  ;;  %v4138_v31 = vld [vmem:[%s5495_s28 + $0x38] sm:$0xff]  }
 0x803   : > { %v4222_v5 = vpop.eup %4221  ;;  %v2144_v6 = vsel %vm1389_vm5, %v4220_v4, 0.0  ;;  %3881 = vmatprep.subr.bf16.mxu1 %v4867_v42 }
 0x804   : > { %v2029_v8 = vmul.f32 %v4222_v5, %v4214_v52  ;;  %2145 = vadd.xlane.f32.xlu0 %v2144_v6 }
 0x806   : > { %v2030_v9 = vpack.c.bf16 %v2029_v8, %v2028_v7 }
 0x808   : > { %3852 = vmatmul.mubr.msk.bf16.vlgmr.msra.gmra.mrb[28].mxu0 %vm1389_vm5, %v2030_v9 }
 0x809   : > { %3863 = vmatprep.mubr.msk.bf16.mxu0 %vm4868_vm3, %v4867_v42 }
 0x811   : > { %2274 = vrot.lane.b32.xlu1 %v5559_v60, %s4871_s17 }
 0x815   : > { %2272 = vrot.lane.b32.xlu1 %v5561_v61, %s4871_s17 }
 0x819   : > { %2393 = vrot.lane.b32.xlu1 %v5573_v16, %s4871_s17 }
 0x81a   : > { %2152 = vrot.lane.b32.xlu0 %v5583_v23, %s4870_s12 }
 0x81e   : > { %2395 = vrot.lane.b32.xlu0 %v5571_v14, %s4871_s17 }
 0x88d   : > { %v2143_v11 = vpop.xlane.xlu1 %2142 }
 0x88e   : > { %4223 = vrcp.f32 %v2143_v11 }
 0x891   : > { %v2146_v12 = vpop.xlane.xlu0 %2145  ;;  %v2275_v18 = vpop.permute.xlu1 %2274 }
 0x892   : > { %4225 = vrcp.f32 %v2146_v12  ;;  %v2280_v20 = vsel %vm1341_vm4, %v2275_v18, 0 }
 0x895   : > { %v2153_v60 = vpop.permute.xlu0 %2152  ;;  %v2273_v21 = vpop.permute.xlu1 %2272 }
 0x896   : > { %3862 = vmatpush3.bf16.msra.mxu0 %v2153_v60 }
 0x897   : > { %3875 = vmatprep.subr.bf16.mxu0 %v4867_v42 }
 0x898   : > { %v4224_v61 = vpop.eup %4223 }
 0x899   : > { %v2149_v16 = vmul.f32 %v4224_v61, %v4216_v1  ;;  %v2396_v14 = vpop.permute.xlu0 %2395  ;;  %v2394_v25 = vpop.permute.xlu1 %2393 }
 0x89a   : > { %v2401_v22 = vsel %vm1341_vm4, %v2396_v14, 0 }
 0x89c   : > { %v4226_v15 = vpop.eup %4225 }
 0x89d   : > { %v2150_v17 = vmul.f32 %v4226_v15, %v4220_v4 }
 0x89f   : > { %v2151_v19 = vpack.c.bf16 %v2150_v17, %v2149_v16 }
 0x8a1   : > { %3864 = vmatmul.mubr.msk.bf16.vlgmr.msra.gmra.mrb[32].mxu0 %vm1389_vm5, %v2151_v19 }
 0x8a2   : > { %3876 = vmatpush3.bf16.xpose.msra.mxu0 %v2280_v20  ;;  %3877 = vmatprep.mubr.msk.bf16.mxu0 %vm4868_vm3, %v4867_v42 }
 0x8a3   : > { %3887 = vmatprep.subr.bf16.mxu0 %v4867_v42 }
 0x8a9   : > { %3878 = vmatmul.mubr.msk.bf16.vlgmr.msra.gmra.mrb[36].mxu0 %vm1341_vm4, %v2273_v21 }
 0x8aa   : > { %3888 = vmatpush3.bf16.xpose.msra.mxu0 %v2401_v22  ;;  %3889 = vmatprep.mubr.msk.bf16.mxu0 %vm4868_vm3, %v4867_v42 }
 0x8b1   : > { %3890 = vmatmul.mubr.msk.bf16.vlgmr.msra.gmra.mrb[40].mxu0 %vm1341_vm4, %v2394_v25 }
 0x8b2   : > { %2811 = vmatprep.mubr.bf16.mxu0 %v4866_v13 }
 0x8db   : > { %v2071_v26 = vpop.f32.mrb[28].mxu0 }
 0x8dc   : > { %v3853_v27 = vpop.f32.mrb[29].mxu0 }
 0x8dd   : > { %v2074_v28 = vpop.f32.mrb[30].mxu0 }
 0x8de   : > { %v2199_v29 = vpack.c.bf16 %v2074_v28, %v2071_v26  ;;  %v3854_v30 = vpop.f32.mrb[31].mxu0 }
 0x8df   : > { %v4137_v30 = vld [vmem:[%s5495_s28 + $0x30] sm:$0xff]  }
 0x8e0   : > { %3871 = vmatprep.mubr.msk.bf16.mxu1 %vm1341_vm4, %v2199_v29 }
 0x974   : > { %v2192_v32 = vpop.f32.mrb[32].mxu0 }
 0x975   : > { %v3865_v33 = vpop.f32.mrb[33].mxu0 }
 0x976   : > { %v2195_v36 = vpop.f32.mrb[34].mxu0 }
 0x977   : > { %v2200_v37 = vpack.c.bf16 %v2195_v36, %v2192_v32  ;;  %v3866_v38 = vpop.f32.mrb[35].mxu0 }
 0x979   : > { %3872 = vmatmul.mubr.msk.bf16.vlgmr.msra.gmra.mrb[20].mxu1 %vm1341_vm4, %v2200_v37 }
 0x97a   : > { %3883 = vmatprep.mubr.msk.bf16.mxu1 %vm4868_vm3, %v4867_v42 }
 0x97c   : > { %v2316_v39 = vpop.f32.mrb[36].mxu0 }
 0x97d   : > { %v2317_v40 = vadd.f32 %v2316_v39, %v5603_v34  ;;  %v3879_v41 = vpop.f32.mrb[37].mxu0 }
 0x97e   : > { %v2319_v43 = vpop.f32.mrb[38].mxu0 }
 0x97f   : > { %v2320_v46 = vadd.f32 %v2319_v43, %v5605_v35  ;;  %v3880_v48 = vpop.f32.mrb[39].mxu0  ;;  %v2323_v51 = vsel %vm1389_vm5, %v2317_v40, -inf }
 0x980   : > { %2324 = vmax.xlane.f32.xlu0 %v2323_v51 }
 0x981   : > { %v2326_v52 = vsel %vm1389_vm5, %v2320_v46, -inf }
 0x982   : > { %2327 = vmax.xlane.f32.xlu1 %v2326_v52 }
 0x984   : > { %v2437_v53 = vpop.f32.mrb[40].mxu0 }
 0x985   : > { %v2438_v54 = vadd.f32 %v2437_v53, %v5611_v49  ;;  %v3891_v55 = vpop.f32.mrb[41].mxu0 }
 0x986   : > { %v2440_v56 = vpop.f32.mrb[42].mxu0 }
 0x987   : > { %v2441_v57 = vadd.f32 %v2440_v56, %v5613_v50  ;;  %v3892_v58 = vpop.f32.mrb[43].mxu0  ;;  %v2444_v34 = vsel %vm1389_vm5, %v2438_v54, -inf }
 0x988   : > { %2445 = vmax.xlane.f32.xlu0 %v2444_v34 }
 0x989   : > { %v2447_v35 = vsel %vm1389_vm5, %v2441_v57, -inf }
 0x98c   : > { %2448 = vmax.xlane.f32.xlu0 %v2447_v35  ;;  %v4260_v35 = vld [vmem:[#allocation2 + $0x8] sm:$0xff] }
 0xa0d   : > { %v2325_v59 = vpop.xlane.xlu0 %2324 }
 0xa0e   : > { %v2329_v63 = vsub.f32 %v2317_v40, %v2325_v59 }
 0xa0f   : > { %v2328_v62 = vpop.xlane.xlu1 %2327 }
 0xa10   : > { %v2331_v0 = vmul.f32 1.442695, %v2329_v63  ;;  %v2330_v1 = vsub.f32 %v2320_v46, %v2328_v62  ;;  %v3605_v46 = vld [vmem:[%s813_s0] ss:$0 sm:$0xff]  ;;  %v4261_v63 = vld [vmem:[#allocation2 + $0x10] sm:$0xff] }
 0xa12   : > { %4227 = vpow2.f32 %v2331_v0  ;;  %v2333_v2 = vmul.f32 1.442695, %v2330_v1  ;;  %v4262_v0 = vld [vmem:[#allocation2 + $0x18] sm:$0xff] }
 0xa14   : > { %4229 = vpow2.f32 %v2333_v2  ;;  %v4139_v2 = vld [vmem:[%s5500_s4] ss:$8 sps:$4 sm:$0xff]  }
 0xa15   : > { %v2446_v49 = vpop.xlane.xlu0 %2445 }
 0xa16   : > { %v2450_v3 = vsub.f32 %v2438_v54, %v2446_v49  ;;  %v4141_v49 = vld [vmem:[%s5500_s4 + $0x4] ss:$8 sps:$4 sm:$0xff]  }
 0xa17   : > { %2779 = vmatprep.subr.bf16.mxu0 %v4141_v49 }
 0xa18   : > { %v2452_v4 = vmul.f32 1.442695, %v2450_v3  ;;  %v4144_v3 = vld [vmem:[%s5500_s4 + $0x14] ss:$8 sps:$4 sm:$0xff]   ;;  %2780 = vmatpush1.bf16.msra.mxu0 %v4139_v2 }
 0xa19   : > { %v2449_v5 = vpop.xlane.xlu0 %2448  ;;  %2781 = vmatprep.subr.bf16.mxu0 %v4144_v3  ;;  %v3607_v3 = vld [vmem:[%s829_s19] ss:$0 sm:$0xff] }
 0xa1a   : > { %4231 = vpow2.f32 %v2452_v4  ;;  %v2451_v50 = vsub.f32 %v2441_v57, %v2449_v5  ;;  %v4259_v57 = vld [vmem:[#allocation2] sm:$0xff]  ;;  %v4142_v4 = vld [vmem:[%s5500_s4 + $0x10] ss:$8 sps:$4 sm:$0xff]  }
 0xa1c   : > { %v4228_v6 = vpop.eup %4227  ;;  %v2454_v7 = vmul.f32 1.442695, %v2451_v50  ;;  %2782 = vmatpush1.bf16.msra.mxu0 %v4142_v4 }
 0xa1d   : > { %v2335_v8 = vsel %vm1389_vm5, %v4228_v6, 0.0 }
 0xa1e   : > { %v4230_v9 = vpop.eup %4229  ;;  %4233 = vpow2.f32 %v2454_v7  ;;  %2336 = vadd.xlane.f32.xlu1 %v2335_v8 }
 0xa1f   : > { %v2338_v10 = vsel %vm1389_vm5, %v4230_v9, 0.0 }
 0xa20   : > { %2339 = vadd.xlane.f32.xlu0 %v2338_v10 }
 0xa24   : > { %v4232_v11 = vpop.eup %4231 }
 0xa25   : > { %v2456_v12 = vsel %vm1389_vm5, %v4232_v11, 0.0 }
 0xa26   : > { %2457 = vadd.xlane.f32.xlu1 %v2456_v12 }
 0xa28   : > { %v4234_v60 = vpop.eup %4233 }
 0xa29   : > { %v2459_v61 = vsel %vm1389_vm5, %v4234_v60, 0.0 }
 0xa2a   : > { %2460 = vadd.xlane.f32.xlu0 %v2459_v61 }
 0xa37   : > { %2346 = vrot.lane.b32.xlu1 %v5586_v24, %s4871_s17 }
 0xa40   : > { %2467 = vrot.lane.b32.xlu0 %v5583_v23, %s4871_s17 }
 0xaab   : > { %v2337_v15 = vpop.xlane.xlu1 %2336 }
 0xaac   : > { %4235 = vrcp.f32 %v2337_v15 }
 0xaad   : > { %v2340_v16 = vpop.xlane.xlu0 %2339 }
 0xaae   : > { %4237 = vrcp.f32 %v2340_v16 }
 0xab3   : > { %v2458_v17 = vpop.xlane.xlu1 %2457 }
 0xab4   : > { %4239 = vrcp.f32 %v2458_v17 }
 0xab6   : > { %v4236_v18 = vpop.eup %4235 }
 0xab7   : > { %v2347_v19 = vpop.permute.xlu1 %2346  ;;  %v2461_v20 = vpop.xlane.xlu0 %2460  ;;  %v2343_v21 = vmul.f32 %v4236_v18, %v4228_v6 }
 0xab8   : > { %v4238_v14 = vpop.eup %4237  ;;  %4241 = vrcp.f32 %v2461_v20  ;;  %3882 = vmatpush3.bf16.msra.mxu1 %v2347_v19  ;;  %v4147_v20 = vld [vmem:[%s5500_s4 + $0x24] ss:$8 sps:$4 sm:$0xff]  }
 0xab9   : > { %v2344_v22 = vmul.f32 %v4238_v14, %v4230_v9  ;;  %3893 = vmatprep.subr.bf16.mxu1 %v4867_v42  ;;  %v4145_v14 = vld [vmem:[%s5500_s4 + $0x20] ss:$8 sps:$4 sm:$0xff]   ;;  %2783 = vmatprep.subr.bf16.mxu0 %v4147_v20 }
 0xaba   : > { %2784 = vmatpush1.bf16.msra.mxu0 %v4145_v14  ;;  %v2687_v20 = vld [vmem:[%s5502_s27] sm:$0x3] }
 0xabb   : > { %v2468_v24 = vpop.permute.xlu0 %2467  ;;  %v2345_v23 = vpack.c.bf16 %v2344_v22, %v2343_v21  ;;  %v4150_v21 = vld [vmem:[%s5500_s4 + $0x34] ss:$8 sps:$4 sm:$0xff]   ;;  %v4148_v22 = vld [vmem:[%s5500_s4 + $0x30] ss:$8 sps:$4 sm:$0xff]   ;;  %v2696_v14 = vrot.slane %v2687_v20, %v1055_v47 }
 0xabc   : > { %2785 = vmatprep.subr.bf16.mxu0 %v4150_v21 }
 0xabd   : > { %3884 = vmatmul.mubr.msk.bf16.vlgmr.msra.gmra.mrb[28].mxu1 %vm1389_vm5, %v2345_v23  ;;  %v4151_v23 = vld [vmem:[%s5500_s4 + $0x40] ss:$8 sps:$4 sm:$0xff]  }
 0xabe   : > { %3894 = vmatpush3.bf16.msra.mxu1 %v2468_v24  ;;  %3895 = vmatprep.mubr.msk.bf16.mxu1 %vm4868_vm3, %v4867_v42  ;;  %v4240_v25 = vpop.eup %4239  ;;  %v4153_v24 = vld [vmem:[%s5500_s4 + $0x44] ss:$8 sps:$4 sm:$0xff]  }
 0xabf   : > { %v2464_v27 = vmul.f32 %v4240_v25, %v4232_v11  ;;  %3899 = vmatprep.subr.bf16.mxu1 %v4137_v30  ;;  %2786 = vmatpush1.bf16.msra.mxu0 %v4148_v22  ;;  %v4156_v25 = vld [vmem:[%s5500_s4 + $0x54] ss:$8 sps:$4 sm:$0xff]  }
 0xac0   : > { %2787 = vmatprep.subr.bf16.mxu0 %v4153_v24 }
 0xac2   : > { %v4242_v26 = vpop.eup %4241 }
 0xac3   : > { %v2465_v28 = vmul.f32 %v4242_v26, %v4234_v60  ;;  %2788 = vmatpush1.bf16.msra.mxu0 %v4151_v23  ;;  %v4154_v26 = vld [vmem:[%s5500_s4 + $0x50] ss:$8 sps:$4 sm:$0xff]  }
 0xac4   : > { %2789 = vmatprep.subr.bf16.mxu0 %v4156_v25 }
 0xac5   : > { %v2466_v29 = vpack.c.bf16 %v2465_v28, %v2464_v27  ;;  %v4159_v27 = vld [vmem:[%s5500_s4 + $0x64] ss:$8 sps:$4 sm:$0xff]   ;;  %v4157_v28 = vld [vmem:[%s5500_s4 + $0x60] ss:$8 sps:$4 sm:$0xff]  }
 0xac7   : > { %3896 = vmatmul.mubr.msk.bf16.vlgmr.msra.gmra.mrb[32].mxu1 %vm1389_vm5, %v2466_v29  ;;  %2790 = vmatpush1.bf16.msra.mxu0 %v4154_v26  ;;  %v4162_v29 = vld [vmem:[%s5500_s4 + $0x74] ss:$8 sps:$4 sm:$0xff]  }
 0xac8   : > { %3900 = vmatpush3.bf16.msra.mxu1 %v4137_v30  ;;  %2791 = vmatprep.subr.bf16.mxu0 %v4159_v27  ;;  %v4160_v30 = vld [vmem:[%s5500_s4 + $0x70] ss:$8 sps:$4 sm:$0xff]  }
 0xac9   : > { %3901 = vmatprep.subr.bf16.mxu1 %v4138_v31 }
 0xacb   : > { %2792 = vmatpush1.bf16.msra.mxu0 %v4157_v28 }
 0xacc   : > { %3902 = vmatpush3.bf16.msra.mxu1 %v4138_v31  ;;  %2793 = vmatprep.subr.bf16.mxu0 %v4162_v29  ;;  %v4163_v31 = vld [vmem:[%s5504_s26 + $0x40] sm:$0xff]  }
 0xacd   : > { %3731 = vmatprep.subr.bf16.mxu1 %v4163_v31 }
 0xacf   : > { %2794 = vmatpush1.bf16.msra.mxu0 %v4160_v30 }
 0xb90   : > { %v2386_v32 = vpop.f32.mrb[28].mxu1 }
 0xb91   : > { %v3885_v33 = vpop.f32.mrb[29].mxu1 }
 0xb92   : > { %v2389_v36 = vpop.f32.mrb[30].mxu1  ;;  %v4165_v33 = vld [vmem:[%s5504_s26 + $0x48] sm:$0xff]  }
 0xb93   : > { %v2514_v37 = vpack.c.bf16 %v2389_v36, %v2386_v32  ;;  %v3886_v38 = vpop.f32.mrb[31].mxu1  ;;  %v4164_v32 = vld [vmem:[%s5504_s26] sm:$0xff]   ;;  %v4166_v36 = vld [vmem:[%s5504_s26 + $0x8] sm:$0xff]  }
 0xb94   : > { %v4168_v38 = vld [vmem:[%s5504_s26 + $0x10] sm:$0xff]  }
 0xb95   : > { %3903 = vmatprep.mubr.msk.bf16.mxu1 %vm1341_vm4, %v2514_v37  ;;  %v4167_v37 = vld [vmem:[%s5504_s26 + $0x50] sm:$0xff]  }
 0xb9a   : > { %v2507_v42 = vpop.f32.mrb[32].mxu1 }
 0xb9b   : > { %v3897_v39 = vpop.f32.mrb[33].mxu1 }
 0xb9c   : > { %v2510_v40 = vpop.f32.mrb[34].mxu1  ;;  %v4170_v39 = vld [vmem:[%s5504_s26 + $0x18] sm:$0xff]  }
 0xb9d   : > { %v2515_v41 = vpack.c.bf16 %v2510_v40, %v2507_v42  ;;  %v3898_v43 = vpop.f32.mrb[35].mxu1  ;;  %v4169_v42 = vld [vmem:[%s5504_s26 + $0x58] sm:$0xff]   ;;  %v4171_v40 = vld [vmem:[%s5504_s26 + $0x60] sm:$0xff]  }
 0xb9e   : > { %v4173_v43 = vld [vmem:[%s5504_s26 + $0x68] sm:$0xff]  }
 0xb9f   : > { %3904 = vmatmul.mubr.msk.bf16.vlgmr.msra.gmra.mrb[20].mxu1 %vm1341_vm4, %v2515_v41  ;;  %v4172_v41 = vld [vmem:[%s5504_s26 + $0x20] sm:$0xff]  }
 0xba0   : > { %3732 = vmatpush3.bf16.msra.mxu1 %v4164_v32 }
 0xba1   : > { %3733 = vmatprep.subr.bf16.mxu1 %v4165_v33 }
 0xba4   : > { %3734 = vmatpush3.bf16.msra.mxu1 %v4166_v36 }
 0xba5   : > { %3735 = vmatprep.subr.bf16.mxu1 %v4167_v37 }
 0xba8   : > { %3736 = vmatpush3.bf16.msra.mxu1 %v4168_v38 }
 0xba9   : > { %3737 = vmatprep.subr.bf16.mxu1 %v4169_v42 }
 0xbac   : > { %3738 = vmatpush3.bf16.msra.mxu1 %v4170_v39 }
 0xbad   : > { %3739 = vmatprep.subr.bf16.mxu1 %v4171_v40 }
 0xbb0   : > { %3740 = vmatpush3.bf16.msra.mxu1 %v4172_v41 }
 0xbb1   : > { %3741 = vmatprep.subr.bf16.mxu1 %v4173_v43 }
 0xc72   : > { %v3905_v48 = vpop.f32.mrb[20].mxu1 }
 0xc73   : > { %v2568_v51 = vpop.f32.mrb[21].mxu1  ;;  %v2596_v55 = vadd.f32 %v3905_v48, %v3605_v46 }
 0xc74   : > { %v2594_v52 = vadd.f32 %v3605_v46, %v2568_v51  ;;  %v3906_v53 = vpop.f32.mrb[22].mxu1 }
 0xc75   : > { %v2571_v54 = vpop.f32.mrb[23].mxu1  ;;  %v2597_v34 = vadd.f32 %v3906_v53, %v3605_v46  ;;  %v2600_v62 = vadd.f32 %v4261_v63, %v2596_v55  ;;  %v3606_v63 = vld [vmem:[%s821_s23] ss:$0 sm:$0xff] }
 0xc76   : > { %v2595_v56 = vadd.f32 %v3605_v46, %v2571_v54  ;;  %v2598_v58 = vadd.f32 %v4259_v57, %v2594_v52 }
 0xc77   : > { %v2601_v1 = vadd.f32 %v4262_v0, %v2597_v34 }
 0xc78   : > { %2604 = vadd.xlane.f32.xlu1 %v2598_v58  ;;  %v2599_v59 = vadd.f32 %v4260_v35, %v2595_v56 }
 0xc7a   : > { %2606 = vadd.xlane.f32.xlu0 %v2599_v59 }
 0xc7c   : > { %2608 = vadd.xlane.f32.xlu1 %v2600_v62 }
 0xc7e   : > { %2610 = vadd.xlane.f32.xlu0 %v2601_v1 }
 0xd05   : > { %v2605_v5 = vpop.xlane.xlu1 %2604 }
 0xd06   : > { %v2613_v50 = vmul.f32 0.0078125, %v2605_v5 }
 0xd07   : > { %v2607_v6 = vpop.xlane.xlu0 %2606 }
 0xd08   : > { %v5759_v7 = vsub.f32 %v2598_v58, %v2613_v50  ;;  %v2614_v8 = vmul.f32 0.0078125, %v2607_v6 }
 0xd09   : > { %v2609_v9 = vpop.xlane.xlu1 %2608 }
 0xd0a   : > { %v5761_v10 = vsub.f32 %v2599_v59, %v2614_v8  ;;  %v2615_v11 = vmul.f32 0.0078125, %v2609_v9  ;;  %v2621_v12 = vmul.f32 %v5759_v7, %v5759_v7 }
 0xd0b   : > { %v2611_v60 = vpop.xlane.xlu0 %2610 }
 0xd0c   : > { %v5765_v61 = vsub.f32 %v2600_v62, %v2615_v11  ;;  %v2616_v15 = vmul.f32 0.0078125, %v2611_v60  ;;  %2625 = vadd.xlane.f32.xlu1 %v2621_v12  ;;  %v2622_v16 = vmul.f32 %v5761_v10, %v5761_v10 }
 0xd0e   : > { %v5769_v17 = vsub.f32 %v2601_v1, %v2616_v15  ;;  %2627 = vadd.xlane.f32.xlu0 %v2622_v16  ;;  %v2623_v18 = vmul.f32 %v5765_v61, %v5765_v61  ;;  %v4174_v15 = vld [vmem:[%s5504_s26 + $0x28] sm:$0xff]   ;;  %v4175_v16 = vld [vmem:[%s5504_s26 + $0x70] sm:$0xff]  }
 0xd0f   : > { %3742 = vmatpush3.bf16.msra.mxu1 %v4174_v15 }
 0xd10   : > { %2629 = vadd.xlane.f32.xlu1 %v2623_v18  ;;  %v2624_v19 = vmul.f32 %v5769_v17, %v5769_v17  ;;  %3743 = vmatprep.subr.bf16.mxu1 %v4175_v16  ;;  %v4177_v18 = vld [vmem:[%s5504_s26 + $0x78] sm:$0xff]  }
 0xd12   : > { %2631 = vadd.xlane.f32.xlu0 %v2624_v19  ;;  %v4178_v19 = vld [vmem:[%s5504_s26 + $0x38] sm:$0xff]  }
 0xd99   : > { %v2626_v46 = vpop.xlane.xlu1 %2625 }
 0xd9a   : > { %v2633_v48 = vmul.f32 0.0078125, %v2626_v46 }
 0xd9b   : > { %v2628_v51 = vpop.xlane.xlu0 %2627 }
 0xd9c   : > { %v2637_v52 = vadd.f32 1e-05, %v2633_v48  ;;  %v2634_v53 = vmul.f32 0.0078125, %v2628_v51 }
 0xd9d   : > { %v2630_v54 = vpop.xlane.xlu1 %2629 }
 0xd9e   : > { %4243 = vrsqrt.f32 %v2637_v52  ;;  %v2638_v55 = vadd.f32 1e-05, %v2634_v53  ;;  %v2635_v56 = vmul.f32 0.0078125, %v2630_v54  ;;  %v3624_v54 = vld [vmem:[%s864_s21] ss:$0 sm:$0xff] }
 0xd9f   : > { %v2632_v57 = vpop.xlane.xlu0 %2631 }
 0xda0   : > { %4245 = vrsqrt.f32 %v2638_v55  ;;  %v2639_v58 = vadd.f32 1e-05, %v2635_v56  ;;  %v2636_v34 = vmul.f32 0.0078125, %v2632_v57 }
 0xda2   : > { %4247 = vrsqrt.f32 %v2639_v58  ;;  %v2640_v35 = vadd.f32 1e-05, %v2636_v34 }
 0xda4   : > { %4249 = vrsqrt.f32 %v2640_v35 }
 0xda8   : > { %v4244_v59 = vpop.eup %4243 }
 0xda9   : > { %v2645_v62 = vmul.f32 %v4244_v59, %v5759_v7 }
 0xdaa   : > { %v4246_v0 = vpop.eup %4245 }
 0xdab   : > { %v2646_v1 = vmul.f32 %v4246_v0, %v5761_v10  ;;  %v2655_v2 = vmul.f32 %v3606_v63, %v2645_v62 }
 0xdac   : > { %v4248_v49 = vpop.eup %4247 }
 0xdad   : > { %v2656_v4 = vmul.f32 %v3606_v63, %v2646_v1  ;;  %v5804_v50 = vadd.f32 %v3607_v3, %v2655_v2  ;;  %v2647_v8 = vmul.f32 %v4248_v49, %v5765_v61 }
 0xdae   : > { %v4250_v5 = vpop.eup %4249 }
 0xdaf   : > { %v5806_v6 = vadd.f32 %v3607_v3, %v2656_v4  ;;  %v2648_v7 = vmul.f32 %v4250_v5, %v5769_v17  ;;  %v2657_v11 = vmul.f32 %v3606_v63, %v2647_v8  ;;  %v4176_v17 = vld [vmem:[%s5504_s26 + $0x30] sm:$0xff]  }
 0xdb0   : > { %3744 = vmatpush3.bf16.msra.mxu1 %v4176_v17 }
 0xdb1   : > { %v2669_v9 = vpack.c.bf16 %v5806_v6, %v5804_v50  ;;  %v2658_v10 = vmul.f32 %v3606_v63, %v2648_v7  ;;  %v5815_v60 = vadd.f32 %v3607_v3, %v2657_v11  ;;  %3745 = vmatprep.subr.bf16.mxu1 %v4177_v18 }
 0xdb3   : > { %2812 = vmatmul.mubr.bf16.vlgmr.msra.gmra.mrb[44].mxu0 %v2669_v9  ;;  %v5813_v12 = vadd.f32 %v3607_v3, %v2658_v10 }
 0xdb4   : > { %2821 = vmatprep.mubr.bf16.mxu0 %v4866_v13  ;;  %3746 = vmatpush3.bf16.msra.mxu1 %v4178_v19  ;;  %v2692_v13 = vrot.slane %v2687_v20, %v1051_v45 }
 0xdb5   : > { %v2670_v61 = vpack.c.bf16 %v5813_v12, %v5815_v60 }
 0xdbb   : > { %2822 = vmatmul.mubr.bf16.gmra.mrb[48].mxu0 %v2670_v61 }
 0xe86   : > { %v2813_v21 = vpop.f32.mrb[44].mxu0 }
 0xe87   : > { %v2814_v22 = vadd.f32 %v2813_v21, %v2692_v13  ;;  %v2815_v24 = vpop.f32.mrb[45].mxu0 }
 0xe88   : > { %v2816_v23 = vadd.f32 %v2815_v24, %v2696_v14  ;;  %v2817_v25 = vpop.f32.mrb[46].mxu0 }
 0xe89   : > { %v2818_v26 = vadd.f32 %v2817_v25, %v2692_v13  ;;  %v2819_v27 = vpop.f32.mrb[47].mxu0  ;;  %v2832_v29 = vmax.f32 %v2814_v22, 0.0 }
 0xe8a   : > { %v2820_v28 = vadd.f32 %v2819_v27, %v2696_v14  ;;  %v2833_v31 = vmax.f32 %v2816_v23, 0.0 }
 0xe8b   : > { %v2834_v30 = vmax.f32 %v2818_v26, 0.0 }
 0xe8c   : > { %v2835_v32 = vmax.f32 %v2820_v28, 0.0 }
 0xe8d   : > { %v2840_v33 = vpack.c.bf16 %v2834_v30, %v2832_v29 }
 0xe8e   : > { %v2841_v36 = vpack.c.bf16 %v2835_v32, %v2833_v31  ;;  %v2823_v37 = vpop.f32.mrb[48].mxu0 }
 0xe8f   : > { %v2824_v38 = vadd.f32 %v2823_v37, %v2692_v13  ;;  %v2825_v45 = vpop.f32.mrb[49].mxu0  ;;  %v3641_v37 = vld [vmem:[%s872_s1] ss:$0 sm:$0xff] }
 0xe90   : > { %v2826_v42 = vadd.f32 %v2825_v45, %v2696_v14  ;;  %v2827_v44 = vpop.f32.mrb[50].mxu0  ;;  %3011 = vmatprep.mubr.bf16.mxu1 %v2841_v36 }
 0xe91   : > { %v2828_v47 = vadd.f32 %v2827_v44, %v2692_v13  ;;  %v2829_v39 = vpop.f32.mrb[51].mxu0  ;;  %3012 = vmatmul.mubr.bf16.vlgmr.msra.gmra.mrb[36].mxu1 %v2840_v33  ;;  %v2836_v41 = vmax.f32 %v2824_v38, 0.0 }
 0xe92   : > { %v2830_v40 = vadd.f32 %v2829_v39, %v2696_v14  ;;  %v2837_v46 = vmax.f32 %v2826_v42, 0.0  ;;  %v3642_v42 = vld [vmem:[%s880_s15] ss:$0 sm:$0xff] }
 0xe93   : > { %v2838_v43 = vmax.f32 %v2828_v47, 0.0 }
 0xe94   : > { %v2839_v48 = vmax.f32 %v2830_v40, 0.0 }
 0xe95   : > { %v2842_v51 = vpack.c.bf16 %v2838_v43, %v2836_v41 }
 0xe96   : > { %v2843_v52 = vpack.c.bf16 %v2839_v48, %v2837_v46 }
 0xe98   : > { %3019 = vmatprep.mubr.bf16.mxu1 %v2843_v52 }
 0xe99   : > { %3020 = vmatmul.mubr.bf16.gmra.mrb[40].mxu1 %v2842_v51 }
 0xf64   : > { %v3747_v53 = vpop.f32.mrb[36].mxu1 }
 0xf65   : > { %v3748_v55 = vpop.f32.mrb[37].mxu1 }
 0xf66   : > { %v3749_v56 = vadd.f32 %v3748_v55, %v3747_v53  ;;  %v3750_v57 = vpop.f32.mrb[38].mxu1 }
 0xf67   : > { %v3751_v58 = vpop.f32.mrb[39].mxu1 }
 0xf68   : > { %v3014_v34 = vadd.f32 %v3749_v56, %v3624_v54  ;;  %v3752_v35 = vadd.f32 %v3751_v58, %v3750_v57 }
 0xf6a   : > { %v3017_v59 = vadd.f32 %v3752_v35, %v3624_v54  ;;  %v3028_v63 = vadd.f32 %v3014_v34, %v5804_v50 }
 0xf6c   : > { %3034 = vadd.xlane.f32.xlu1 %v3028_v63  ;;  %v3753_v62 = vpop.f32.mrb[40].mxu1  ;;  %v3029_v0 = vadd.f32 %v3017_v59, %v5806_v6 }
 0xf6d   : > { %v3754_v1 = vpop.f32.mrb[41].mxu1 }
 0xf6e   : > { %v3755_v2 = vadd.f32 %v3754_v1, %v3753_v62  ;;  %3036 = vadd.xlane.f32.xlu0 %v3029_v0  ;;  %v3756_v49 = vpop.f32.mrb[42].mxu1 }
 0xf6f   : > { %v3757_v3 = vpop.f32.mrb[43].mxu1 }
 0xf70   : > { %v3022_v4 = vadd.f32 %v3755_v2, %v3624_v54  ;;  %v3758_v5 = vadd.f32 %v3757_v3, %v3756_v49 }
 0xf72   : > { %v3025_v8 = vadd.f32 %v3758_v5, %v3624_v54  ;;  %v3030_v7 = vadd.f32 %v3022_v4, %v5815_v60 }
 0xf74   : > { %3038 = vadd.xlane.f32.xlu1 %v3030_v7  ;;  %v3031_v9 = vadd.f32 %v3025_v8, %v5813_v12 }
 0xf76   : > { %3040 = vadd.xlane.f32.xlu0 %v3031_v9 }
 0xff9   : > { %v3035_v10 = vpop.xlane.xlu1 %3034 }
 0xffa   : > { %v3042_v50 = vmul.f32 0.0078125, %v3035_v10 }
 0xffb   : > { %v3037_v11 = vpop.xlane.xlu0 %3036 }
 0xffc   : > { %v3046_v61 = vsub.f32 %v3028_v63, %v3042_v50  ;;  %v3043_v15 = vmul.f32 0.0078125, %v3037_v11 }
 0xffe   : > { %v3047_v6 = vsub.f32 %v3029_v0, %v3043_v15  ;;  %v3050_v16 = vmul.f32 %v3046_v61, %v3046_v61 }
0x1000   : > { %3054 = vadd.xlane.f32.xlu1 %v3050_v16  ;;  %v3051_v17 = vmul.f32 %v3047_v6, %v3047_v6 }
0x1001   : > { %v3039_v18 = vpop.xlane.xlu1 %3038 }
0x1002   : > { %v3044_v19 = vmul.f32 0.0078125, %v3039_v18  ;;  %3056 = vadd.xlane.f32.xlu0 %v3051_v17 }
0x1003   : > { %v3041_v20 = vpop.xlane.xlu0 %3040 }
0x1004   : > { %v3048_v13 = vsub.f32 %v3030_v7, %v3044_v19  ;;  %v3045_v14 = vmul.f32 0.0078125, %v3041_v20 }
0x1006   : > { %v3049_v60 = vsub.f32 %v3031_v9, %v3045_v14  ;;  %v3052_v21 = vmul.f32 %v3048_v13, %v3048_v13  ;;  %v3644_v14 = vld [vmem:[#allocation21] ss:$0 sm:$0xff] (!%p3643_p1) }
0x1008   : > { %3058 = vadd.xlane.f32.xlu1 %v3052_v21  ;;  %v3053_v12 = vmul.f32 %v3049_v60, %v3049_v60 }
0x100a   : > { %3060 = vadd.xlane.f32.xlu0 %v3053_v12 }
0x108d   : > { %v3055_v22 = vpop.xlane.xlu1 %3054 }
0x108e   : > { %v3062_v24 = vmul.f32 0.0078125, %v3055_v22 }
0x108f   : > { %v3057_v23 = vpop.xlane.xlu0 %3056 }
0x1090   : > { %v3066_v25 = vadd.f32 1e-05, %v3062_v24  ;;  %v3063_v26 = vmul.f32 0.0078125, %v3057_v23  ;;  %v3645_v24 = vld [vmem:[#allocation22] ss:$0 sm:$0xff] (!%p3643_p1) }
0x1092   : > { %4251 = vrsqrt.f32 %v3066_v25  ;;  %v3067_v27 = vadd.f32 1e-05, %v3063_v26 }
0x1094   : > { %4253 = vrsqrt.f32 %v3067_v27 }
0x1095   : > { %v3059_v28 = vpop.xlane.xlu1 %3058 }
0x1096   : > { %v3064_v29 = vmul.f32 0.0078125, %v3059_v28 }
0x1097   : > { %v3061_v30 = vpop.xlane.xlu0 %3060 }
0x1098   : > { %v3068_v31 = vadd.f32 1e-05, %v3064_v29  ;;  %v3065_v32 = vmul.f32 0.0078125, %v3061_v30 }
0x109a   : > { %4255 = vrsqrt.f32 %v3068_v31  ;;  %v3069_v33 = vadd.f32 1e-05, %v3065_v32 }
0x109c   : > { %v4252_v36 = vpop.eup %4251  ;;  %4257 = vrsqrt.f32 %v3069_v33 }
0x109d   : > { %v3074_v38 = vmul.f32 %v4252_v36, %v3046_v61 }
0x109e   : > { %v4254_v45 = vpop.eup %4253 }
0x109f   : > { %v3084_v44 = vmul.f32 %v3641_v37, %v3074_v38  ;;  %v3075_v47 = vmul.f32 %v4254_v45, %v3047_v6 }
0x10a1   : > { %v3094_v39 = vadd.f32 %v3642_v42, %v3084_v44  ;;  %v3085_v40 = vmul.f32 %v3641_v37, %v3075_v47 }
0x10a3   : > { %3098 = vst [vmem:[#allocation2] sm:$0xff] %v3094_v39  ;;  %v3095_v41 = vadd.f32 %v3642_v42, %v3085_v40  ;;  %3108 = vadd.xlane.f32.xlu0 (!%p3643_p1), %v3094_v39 }
0x10a4   : > { %v4256_v43 = vpop.eup %4255 }
0x10a5   : > { %3099 = vst [vmem:[#allocation2 + $0x8] sm:$0xff] %v3095_v41  ;;  %v3076_v46 = vmul.f32 %v4256_v43, %v3048_v13 }
0x10a6   : > { %v4258_v48 = vpop.eup %4257 }
0x10a7   : > { %v3086_v51 = vmul.f32 %v3641_v37, %v3076_v46  ;;  %v3077_v52 = vmul.f32 %v4258_v48, %v3049_v60  ;;  %3105 = sbr.rel (%p3643_p1) target bundleno = 4585 (0x11e9), region = 156  ;;  %3110 = vadd.xlane.f32.xlu0 (!%p3643_p1), %v3095_v41 }
0x10a9   : > { %v3096_v53 = vadd.f32 %v3642_v42, %v3086_v51  ;;  %v3087_v54 = vmul.f32 %v3641_v37, %v3077_v52 }
0x10ab   : > { %3100 = vst [vmem:[#allocation2 + $0x10] sm:$0xff] %v3096_v53  ;;  %v3097_v55 = vadd.f32 %v3642_v42, %v3087_v54  ;;  %3112 = vadd.xlane.f32.xlu1 (!%p3643_p1), %v3096_v53 }
0x10ad   : > { %3101 = vst [vmem:[#allocation2 + $0x18] sm:$0xff] %v3097_v55 }
0x10af   : > { %3114 = vadd.xlane.f32.xlu1 %v3097_v55 }
0x1130   : > { %v3109_v56 = vpop.xlane.xlu0 %3108 }
0x1131   : > { %v3116_v58 = vmul.f32 0.0078125, %v3109_v56 }
0x1133   : > { %v3120_v35 = vsub.f32 %v3094_v39, %v3116_v58 }
0x1134   : > { %v3111_v63 = vpop.xlane.xlu0 %3110 }
0x1135   : > { %v3117_v0 = vmul.f32 0.0078125, %v3111_v63  ;;  %v3124_v1 = vmul.f32 %v3120_v35, %v3120_v35 }
0x1137   : > { %v3121_v49 = vsub.f32 %v3095_v41, %v3117_v0  ;;  %3128 = vadd.xlane.f32.xlu0 %v3124_v1 }
0x1138   : > { %v3113_v57 = vpop.xlane.xlu1 %3112 }
0x1139   : > { %v3118_v34 = vmul.f32 0.0078125, %v3113_v57  ;;  %v3125_v5 = vmul.f32 %v3121_v49, %v3121_v49 }
0x113b   : > { %v3122_v59 = vsub.f32 %v3096_v53, %v3118_v34  ;;  %3130 = vadd.xlane.f32.xlu1 %v3125_v5 }
0x113c   : > { %v3115_v62 = vpop.xlane.xlu1 %3114 }
0x113d   : > { %v3119_v2 = vmul.f32 0.0078125, %v3115_v62  ;;  %v3126_v4 = vmul.f32 %v3122_v59, %v3122_v59 }
0x113f   : > { %v3123_v3 = vsub.f32 %v3097_v55, %v3119_v2  ;;  %3132 = vadd.xlane.f32.xlu0 %v3126_v4 }
0x1141   : > { %v3127_v8 = vmul.f32 %v3123_v3, %v3123_v3 }
0x1143   : > { %3134 = vadd.xlane.f32.xlu1 %v3127_v8 }
0x11c4   : > { %v3129_v7 = vpop.xlane.xlu0 %3128 }
0x11c5   : > { %v3136_v9 = vmul.f32 0.0078125, %v3129_v7 }
0x11c7   : > { %v3140_v10 = vadd.f32 1e-05, %v3136_v9 }
0x11c8   : > { %v3131_v50 = vpop.xlane.xlu1 %3130 }
0x11c9   : > { %4263 = vrsqrt.f32 %v3140_v10  ;;  %v3137_v61 = vmul.f32 0.0078125, %v3131_v50 }
0x11cb   : > { %v3141_v6 = vadd.f32 1e-05, %v3137_v61 }
0x11cc   : > { %v3133_v11 = vpop.xlane.xlu0 %3132 }
0x11cd   : > { %v3138_v15 = vmul.f32 0.0078125, %v3133_v11  ;;  %4265 = vrsqrt.f32 %v3141_v6 }
0x11cf   : > { %v3142_v16 = vadd.f32 1e-05, %v3138_v15 }
0x11d0   : > { %v3135_v17 = vpop.xlane.xlu1 %3134 }
0x11d1   : > { %v3139_v18 = vmul.f32 0.0078125, %v3135_v17  ;;  %4267 = vrsqrt.f32 %v3142_v16 }
0x11d3   : > { %v3143_v19 = vadd.f32 1e-05, %v3139_v18  ;;  %v4264_v20 = vpop.eup %4263 }
0x11d4   : > { %v3148_v13 = vmul.f32 %v4264_v20, %v3120_v35 }
0x11d5   : > { %4269 = vrsqrt.f32 %v3143_v19 }
0x11d6   : > { %v3158_v12 = vmul.f32 %v3644_v14, %v3148_v13 }
0x11d7   : > { %v4266_v60 = vpop.eup %4265 }
0x11d8   : > { %v3149_v22 = vmul.f32 %v4266_v60, %v3121_v49  ;;  %v3168_v27 = vadd.f32 %v3645_v24, %v3158_v12 }
0x11da   : > { %v3159_v25 = vmul.f32 %v3644_v14, %v3149_v22 }
0x11db   : > { %v4268_v21 = vpop.eup %4267 }
0x11dc   : > { %v3150_v23 = vmul.f32 %v4268_v21, %v3122_v59  ;;  %v3169_v28 = vadd.f32 %v3645_v24, %v3159_v25 }
0x11de   : > { %v3160_v29 = vmul.f32 %v3644_v14, %v3150_v23  ;;  %v3665_v31 = vpack.c.bf16 %v3169_v28, %v3168_v27 }
0x11df   : > { %v4270_v26 = vpop.eup %4269 }
0x11e0   : > { %v3151_v30 = vmul.f32 %v4270_v26, %v3123_v3  ;;  %3666 = vst [vmem:[#allocation24] sm:$0xff] %v3665_v31   ;;  %v3170_v33 = vadd.f32 %v3645_v24, %v3160_v29 }
0x11e2   : > { %v3161_v32 = vmul.f32 %v3644_v14, %v3151_v30 }
0x11e4   : > { %v3171_v36 = vadd.f32 %v3645_v24, %v3161_v32 }
0x11e6   : > { %v3670_v37 = vpack.c.bf16 %v3171_v36, %v3170_v33 }
0x11e8   : > { %3672 = vst [vmem:[#allocation24 + $0x8] sm:$0xff] %v3670_v37  }
0x11e9 PF: > { %s6015_s24 = sld [smem:[#allocation35_spill]]  ;;  %s4872_s14 = smov [#allocation24]  }
0x11ea   : > { %s3202_s29 = sshll.u32 %s4872_s14, 4  ;;  %s3203_s29 = int_to_ptr.vmem [resolvable:$true] %s3202_s29 }
0x11eb   : > { %s4743_s28 = scalar_lea.vmem %s3203_s29, 256  ;;  %p4750_p9 = scmp.lt.s32.totalorder %s3203_s29, %s3203_s29 }
0x11ec   : > { %p4744_p8 = scmp.ne.s32.totalorder %s3203_s29, %s4743_s28  ;;  %p4751_p12 = scmp.lt.s32.totalorder %s4743_s28, %s4743_s28 }
0x11ee   : > { %p4752_p7 = por %p4751_p12, %p4750_p9 }
0x11ef   : > { %p4028_p0 = scmp.eq.s32.totalorder %s6015_s24, 1 }
0x11f1   : > { %p4745_p6 = pnand %p4744_p8, %p4028_p0 }
0x11f3   : > { %p4746_p5 = pneg %p4745_p6 }
0x11f5   : > { %p4753_p11 = pnand %p4752_p7, %p4746_p5 }
0x11f7   : > { %4756 = shalt.err (!%p4753_p11)
}
0x11f8   : > { %s6016_s19 = sld [smem:[#allocation50_spill]] }
0x11fe   : > { %s4757_s4 = scalar_lea.hbm %s6016_s19, 256 }
0x11ff   : > { %p4758_p3 = scmp.ne.s32.totalorder %s6016_s19, %s4757_s4  ;;  %p4763_p2 = scmp.lt.u32.totalorder %s4757_s4, %s6016_s19 }
0x1201   : > { %p4759_p13 = pnand %p4758_p3, %p4028_p0 }
0x1203   : > { %p4760_p4 = pneg %p4759_p13 }
0x1205   : > { %p4765_p10 = pnand %p4763_p2, %p4760_p4 }
0x1207   : > { %4768 = shalt.err (!%p4765_p10)
}
0x1208   : > { %s4873_s15 = smov 4  }
0x1209   : > { %3966 = dma.vmem_to_hbm [thread:$0]  (%p4028_p0), %s3203_s29, 256, %s6016_s19, [#allocation6], %s4870_s12, %s4870_s12, %s4873_s15  }
0x120a   : > { %4814 = dma.done.wait (%p4028_p0), [#allocation6], 256  }
0x120b   : > { %4816 = vsyncadd (%p4028_p0), [#allocation6], 4294967040 }
0x120c PF: > { %s6017_s17 = sld [smem:[#allocation34_spill]]  ;;  %s6018_s21 = sld [smem:[#allocation31_spill]] }
0x120d   : > { %s6019_s22 = sld [smem:[#allocation32_spill]]  ;;  %s6020_s23 = sld [smem:[#allocation38_spill]] }
0x120e   : > { %s6021_s2 = sld [smem:[#allocation36_spill]]  ;;  %s6022_s24 = smov %s4835_s25 }
0x1212   : > { %s30_s26 = sadd.s32 1, %s6017_s17  }
0x1213   : > { %p27_p1 = scmp.ge.s32.totalorder %s30_s26, 4  }
0x1214   : > { %s6023_s25 = smov %s6021_s2 }
0x1215   :  { %29 = sbr.rel (!%p27_p1) target bundleno = 17 (0x11), region = 269 }
0x121c   :  { %3218 = vsyncpa [#allocation5], 1 }
0x121d   :  { %3220 = vsyncpa [#allocation5 + $0x1], 1 }
0x121e   :  { %3221 = vsyncpa [#allocation8], 1 }
0x121f   :  { %3222 = vsyncpa [#allocation23], 1 }
0x1220   :  { %3223 = vsyncpa [#allocation6], 1 }
0x1221   :  { %3225 = vsyncpa [#allocation6 + $0x1], 1 }

</bundles_post_ra>
